<compile_context>
chip_gen: v5e
topology: v5e:2x2
jax: 0.10.0
libtpu: 0.0.40
codegen_flags: <defaults>
</compile_context>

<pallas_src>
import functools

import jax
import jax.numpy as jnp
from jax import lax
from jax.experimental import pallas as pl
from jax.experimental.pallas import tpu as pltpu


# ----------------------------- helpers -----------------------------

def _full_spec(shape):
    n = len(shape)
    return pl.BlockSpec(shape, lambda i, _n=n: (0,) * _n)


_ARB = pltpu.CompilerParams(dimension_semantics=("arbitrary",))


# ----------------------------- fused linear (gate pre-compute) -----------------------------

def _linear_kernel(x_ref, w_ref, b_ref, o_ref):
    y = jnp.dot(x_ref[...], w_ref[...], preferred_element_type=jnp.float32)
    o_ref[...] = (y + b_ref[...]).astype(o_ref.dtype)


def pallas_linear(x, w, b):
    """y = x @ w + b, single VMEM block (shapes here are tiny)."""
    M, K = x.shape
    N = w.shape[1]
    return pl.pallas_call(
        _linear_kernel,
        grid=(1,),
        in_specs=[_full_spec((M, K)), _full_spec((K, N)), _full_spec((1, N))],
        out_specs=_full_spec((M, N)),
        out_shape=jax.ShapeDtypeStruct((M, N), jnp.float32),
        compiler_params=_ARB,
    )(x, w, b.reshape(1, N))


# ----------------------------- fused BiLSTM recurrence -----------------------------

def _bilstm_kernel(gx_ref, m_ref, whh_ref, out_ref):
    """Whole time recurrence in one kernel.

    gx_ref : (T, BB, 4H)  pre-computed x@W_ih + b per step; rows [0:BB/2) forward
             direction (original time order), rows [BB/2:BB) backward direction
             (time-flipped gates).
    m_ref  : (T, BB, 1)   packed-sequence step mask (flipped for the backward rows).
    whh_ref: (2, H, 4H)   recurrent weights, [0]=forward, [1]=backward. Gate order (i,f,g,o).
    out_ref: (T, BB, H)   per-step hidden outputs (0 on padded steps, as pad_packed_sequence).
    """
    T, BB, H4 = gx_ref.shape
    H = H4 // 4
    half = BB // 2
    w_f = whh_ref[0]
    w_b = whh_ref[1]

    def step(t, carry):
        h, c = carry
        # TODO(synk): for H >= 128 restructure the gate layout so each gates[:, k*H:(k+1)*H]
        # slice is a full 128-lane vreg block; at H=32 the slices are sub-lane but tiny.
        rec = jnp.concatenate(
            [jnp.dot(h[:half], w_f, preferred_element_type=jnp.float32),
             jnp.dot(h[half:], w_b, preferred_element_type=jnp.float32)], axis=0)
        gates = gx_ref[t] + rec
        i = jax.nn.sigmoid(gates[:, 0:H])
        f = jax.nn.sigmoid(gates[:, H:2 * H])
        g = jnp.tanh(gates[:, 2 * H:3 * H])
        o = jax.nn.sigmoid(gates[:, 3 * H:4 * H])
        c_new = f * c + i * g
        h_new = o * jnp.tanh(c_new)
        m = m_ref[t]                               # (BB, 1): 1 inside packed seq, 0 on pad
        c = m * c_new + (1.0 - m) * c
        h_out = m * h_new                          # padded output steps are 0
        h = h_out + (1.0 - m) * h
        out_ref[t] = h_out
        return (h, c)

    init = (jnp.zeros((BB, H), jnp.float32), jnp.zeros((BB, H), jnp.float32))
    lax.fori_loop(0, T, step, init, unroll=True)


def pallas_bilstm(gx_tm, m_tm, whh):
    T, BB, H4 = gx_tm.shape
    H = H4 // 4
    return pl.pallas_call(
        _bilstm_kernel,
        grid=(1,),
        in_specs=[_full_spec((T, BB, H4)),
                  _full_spec((T, BB, 1)),
                  _full_spec((2, H, H4))],
        out_specs=_full_spec((T, BB, H)),
        out_shape=jax.ShapeDtypeStruct((T, BB, H), jnp.float32),
        compiler_params=_ARB,
    )(gx_tm, m_tm, whh)


def bilstm(x, step_mask, p):
    """Packed bidirectional single-layer nn.LSTM(batch_first=True), masked emulation.

    x: (Bc, T, E) stacked batch (both sentences), step_mask: (Bc, T) length mask.
    Both directions + both sentences run in a single recurrence kernel call.
    """
    Bc, T, E = x.shape
    H = p["whh"].shape[1]

    # One matmul produces both directions' input-gate contributions: W_ih = [W_f | W_b].
    gx = pallas_linear(x.reshape(Bc * T, E), p["wih"], p["b"]).reshape(Bc, T, 8 * H)
    gx_f = gx[..., :4 * H]
    gx_b = jnp.flip(gx[..., 4 * H:], axis=1)       # backward direction = masked scan over flipped time
    gx_all = jnp.concatenate([gx_f, gx_b], axis=0)                     # (2Bc, T, 4H)
    m_all = jnp.concatenate([step_mask, jnp.flip(step_mask, axis=1)], axis=0)

    # time-major for the kernel: leading-dim dynamic loads/stores, (sublane, lane) = (2Bc, 4H)
    gx_tm = jnp.swapaxes(gx_all, 0, 1)                                 # (T, 2Bc, 4H)
    m_tm = jnp.swapaxes(m_all, 0, 1)[:, :, None]                       # (T, 2Bc, 1)

    h_tm = pallas_bilstm(gx_tm, m_tm, p["whh"])                        # (T, 2Bc, H)
    h_all = jnp.swapaxes(h_tm, 0, 1)                                   # (2Bc, T, H)
    h_f = h_all[:Bc]
    h_b = jnp.flip(h_all[Bc:], axis=1)
    return jnp.concatenate([h_f, h_b], axis=-1)                        # (Bc, T, 2H)


# ----------------------------- fused attention + rich features + projection -----------------------------

def _masked_softmax(scores, mask_last):
    # Single-pass equivalent of torch: softmax(scores*mask) -> *mask -> /(sum+1e-13).
    m = mask_last[:, None, :]
    x = scores * m
    x = x - jnp.max(x, axis=-1, keepdims=True)
    p = jnp.exp(x) * m
    return p / (jnp.sum(p, axis=-1, keepdims=True) + 1e-13)


def _attn_proj_kernel(e1_ref, e2_ref, m1_ref, m2_ref, wp_ref, bp_ref, p1_ref, p2_ref):
    e1 = e1_ref[...]            # (B, T1, D)
    e2 = e2_ref[...]            # (B, T2, D)
    m1 = m1_ref[...]            # (B, T1)
    m2 = m2_ref[...]            # (B, T2)

    scores = jnp.einsum("btd,bsd->bts", e1, e2,
                        preferred_element_type=jnp.float32)            # (B, T1, T2)
    w12 = _masked_softmax(scores, m2)                                  # (B, T1, T2)
    w21 = _masked_softmax(jnp.swapaxes(scores, 1, 2), m1)              # (B, T2, T1), reuse transpose

    a1 = jnp.einsum("bts,bsd->btd", w12, e2,
                    preferred_element_type=jnp.float32) * m1[:, :, None]
    a2 = jnp.einsum("bst,btd->bsd", w21, e1,
                    preferred_element_type=jnp.float32) * m2[:, :, None]

    wp = wp_ref[...]            # (4D, H)
    bp = bp_ref[...]            # (1, H)

    def project(enc, att):
        rich = jnp.concatenate([enc, att, enc - att, enc * att], axis=-1)   # stays in VMEM
        y = jnp.einsum("btk,kn->btn", rich, wp,
                       preferred_element_type=jnp.float32) + bp
        return jnp.maximum(y, 0.0)                                     # Linear + ReLU

    p1_ref[...] = project(e1, a1)
    p2_ref[...] = project(e2, a2)


def pallas_attention_project(e1, m1, e2, m2, proj_w, proj_b):
    B, T1, D = e1.shape
    T2 = e2.shape[1]
    H = proj_w.shape[1]
    # TODO(synk): at production sizes (B~32, T~512) tile this over batch with
    # grid=(B,), dimension_semantics=("parallel",) so it fits v7x's 64 MiB VMEM
    # and uses both TensorCores; at these demo sizes one block is optimal.
    return pl.pallas_call(
        _attn_proj_kernel,
        grid=(1,),
        in_specs=[_full_spec((B, T1, D)), _full_spec((B, T2, D)),
                  _full_spec((B, T1)), _full_spec((B, T2)),
                  _full_spec((4 * D, H)), _full_spec((1, H))],
        out_specs=(_full_spec((B, T1, H)), _full_spec((B, T2, H))),
        out_shape=(jax.ShapeDtypeStruct((B, T1, H), jnp.float32),
                   jax.ShapeDtypeStruct((B, T2, H), jnp.float32)),
        compiler_params=_ARB,
    )(e1, e2, m1, m2, proj_w, proj_b.reshape(1, H))


# ----------------------------- fused head: masked pool + fc1(tanh) + fc2 + softmax -----------------------------

def _head_kernel(c1_ref, c2_ref, m1_ref, m2_ref, w1_ref, b1_ref, w2_ref, b2_ref,
                 logits_ref, prob_ref):
    def pool(x, m):
        mm = m[:, :, None]
        denom = jnp.maximum(jnp.sum(m, axis=1, keepdims=True), 1e-13)   # guard (lens>=1 -> identical)
        avg = jnp.sum(x * mm, axis=1) / denom
        mx = jnp.max(x * mm + (-10000000.0) * (1.0 - mm), axis=1)       # replace_masked(..., -1e7)
        return avg, mx

    a1, x1 = pool(c1_ref[...], m1_ref[...])
    a2, x2 = pool(c2_ref[...], m2_ref[...])
    v = jnp.concatenate([a1, x1, a2, x2], axis=-1)                      # (B, 8H)
    hid = jnp.tanh(jnp.dot(v, w1_ref[...], preferred_element_type=jnp.float32) + b1_ref[...])
    logits = jnp.dot(hid, w2_ref[...], preferred_element_type=jnp.float32) + b2_ref[...]
    logits_ref[...] = logits
    prob_ref[...] = jax.nn.softmax(logits, axis=-1)


def pallas_head(c1, m1, c2, m2, w1, b1, w2, b2):
    B, T1, D = c1.shape
    T2 = c2.shape[1]
    H = w1.shape[1]
    C = w2.shape[1]
    return pl.pallas_call(
        _head_kernel,
        grid=(1,),
        in_specs=[_full_spec((B, T1, D)), _full_spec((B, T2, D)),
                  _full_spec((B, T1)), _full_spec((B, T2)),
                  _full_spec((4 * D, H)), _full_spec((1, H)),
                  _full_spec((H, C)), _full_spec((1, C))],
        out_specs=(_full_spec((B, C)), _full_spec((B, C))),
        out_shape=(jax.ShapeDtypeStruct((B, C), jnp.float32),
                   jax.ShapeDtypeStruct((B, C), jnp.float32)),
        compiler_params=_ARB,
    )(c1, c2, m1, m2, w1, b1.reshape(1, H), w2, b2.reshape(1, C))


# ------------------------------ ESIM forward ------------------------------

def esim_forward(params, sent1, lens1, sent2, lens2):
    B, T1 = sent1.shape
    T2 = sent2.shape[1]
    T = max(T1, T2)

    # get_mask(): positions whose token id == 0 are masked out (float mask).
    mask1 = (sent1 != 0).astype(jnp.float32)          # (B, T1)
    mask2 = (sent2 != 0).astype(jnp.float32)          # (B, T2)
    # pack_padded_sequence uses the length tensors for the LSTM step mask.
    sm1 = (jnp.arange(T)[None, :] < lens1[:, None]).astype(jnp.float32)
    sm2 = (jnp.arange(T)[None, :] < lens2[:, None]).astype(jnp.float32)
    step_mask = jnp.concatenate([sm1, sm2], axis=0)   # (2B, T)

    emb1 = params["embedding"][sent1]                 # (B, T1, E)
    emb2 = params["embedding"][sent2]
    # RNNDropout / nn.Dropout are identity at inference.

    def pad_t(x):
        return x if x.shape[1] == T else jnp.pad(x, ((0, 0), (0, T - x.shape[1]), (0, 0)))

    # --- encoder: both sentences + both directions in ONE recurrence kernel ---
    x_cat = jnp.concatenate([pad_t(emb1), pad_t(emb2)], axis=0)         # (2B, T, E)
    enc_cat = bilstm(x_cat, step_mask, params["enc"])                   # (2B, T, 2H)
    enc1 = enc_cat[:B, :T1]
    enc2 = enc_cat[B:, :T2]

    # --- fused attention + rich features + 8H->H ReLU projection ---
    proj1, proj2 = pallas_attention_project(enc1, mask1, enc2, mask2,
                                            params["proj_w"], params["proj_b"])

    # --- composition: both sentences + both directions in ONE recurrence kernel ---
    x_cat2 = jnp.concatenate([pad_t(proj1), pad_t(proj2)], axis=0)      # (2B, T, H)
    comp_cat = bilstm(x_cat2, step_mask, params["comp"])                # (2B, T, 2H)
    comp1 = comp_cat[:B, :T1]
    comp2 = comp_cat[B:, :T2]

    # --- fused head: masked avg/max pooling, fc1+tanh, fc2, softmax ---
    logits, prob = pallas_head(comp1, mask1, comp2, mask2,
                               params["fc1_w"], params["fc1_b"],
                               params["fc2_w"], params["fc2_b"])
    return logits, prob


# ------------------------------ parameters ------------------------------

def init_params(key, vocab_size, embed_dim, hidden_dim, num_classes=2):
    keys = jax.random.split(key, 10)

    def xavier(k, shape):
        lim = jnp.sqrt(6.0 / (shape[0] + shape[1]))
        return jax.random.uniform(k, shape, jnp.float32, -lim, lim)

    emb = jax.random.normal(keys[0], (vocab_size, embed_dim), jnp.float32) * 0.1
    emb = emb.at[0].set(0.0)   # pad token id 0 -> zero embedding row (matches masking semantics)

    def lstm_params(k, in_dim):
        kf1, kf2, kb1, kb2 = jax.random.split(k, 4)
        b = jnp.zeros((4 * hidden_dim,), jnp.float32)
        b = b.at[hidden_dim:2 * hidden_dim].set(1.0)   # forget-gate bias = 1 (b_ih + b_hh)
        return {
            # [W_ih_fwd | W_ih_bwd] so one matmul feeds both directions
            "wih": jnp.concatenate([xavier(kf1, (in_dim, 4 * hidden_dim)),
                                    xavier(kb1, (in_dim, 4 * hidden_dim))], axis=1),
            # stacked recurrent weights: [0]=forward, [1]=backward
            "whh": jnp.stack([xavier(kf2, (hidden_dim, 4 * hidden_dim)),
                              xavier(kb2, (hidden_dim, 4 * hidden_dim))], axis=0),
            "b": jnp.concatenate([b, b], axis=0),
        }

    return {
        "embedding": emb,
        "enc": lstm_params(keys[1], embed_dim),
        "comp": lstm_params(keys[2], hidden_dim),
        "proj_w": xavier(keys[3], (8 * hidden_dim, hidden_dim)),
        "proj_b": jnp.zeros((hidden_dim,), jnp.float32),
        "fc1_w": xavier(keys[4], (8 * hidden_dim, hidden_dim)),
        "fc1_b": jnp.zeros((hidden_dim,), jnp.float32),
        "fc2_w": xavier(keys[5], (hidden_dim, num_classes)),
        "fc2_b": jnp.zeros((num_classes,), jnp.float32),
    }


# ------------------------------ main ------------------------------

if __name__ == "__main__":
    B, T = 2, 8
    VOCAB, E, H, NUM_CLASSES = 50, 32, 32, 2

    params = init_params(jax.random.PRNGKey(0), VOCAB, E, H, NUM_CLASSES)

    # deterministic example inputs; pad token id = 0, max(lens) == T
    k1, k2 = jax.random.split(jax.random.PRNGKey(0), 2)
    lens1 = jnp.array([8, 5], dtype=jnp.int32)
    lens2 = jnp.array([8, 6], dtype=jnp.int32)
    s1 = jax.random.randint(k1, (B, T), 1, VOCAB - 1, dtype=jnp.int32)
    s2 = jax.random.randint(k2, (B, T), 1, VOCAB - 1, dtype=jnp.int32)
    pos = jnp.arange(T)[None, :]
    s1 = jnp.where(pos < lens1[:, None], s1, 0)
    s2 = jnp.where(pos < lens2[:, None], s2, 0)

    fwd = jax.jit(esim_forward)
    logits, prob = fwd(params, s1, lens1, s2, lens2)
    jax.block_until_ready((logits, prob))

    assert logits.shape == (B, NUM_CLASSES) and prob.shape == (B, NUM_CLASSES)
    assert bool(jnp.all(jnp.isfinite(logits))) and bool(jnp.all(jnp.isfinite(prob)))
    print("KERNEL_OK")
</pallas_src>

<mosaic_0001>
module attributes {stable_mosaic.version = 11 : i64} {
  func.func @_linear_kernel(%arg0: i32, %arg1: memref<32x32xf32, #tpu.memory_space<vmem>>, %arg2: memref<32x256xf32, #tpu.memory_space<vmem>>, %arg3: memref<1x256xf32, #tpu.memory_space<vmem>>, %arg4: memref<32x256xf32, #tpu.memory_space<vmem>>) attributes {dimension_semantics = [#tpu.dimension_semantics<arbitrary>], iteration_bounds = array<i64: 1>, scalar_prefetch = 0 : i64, scratch_operands = 0 : i64, tpu.core_type = #tpu.core_type<tc>, window_params = [{pipeline_mode = #tpu.pipeline_mode<synchronous>, transform_indices = @transform_0, window_bounds = array<i64: 32, 32>}, {pipeline_mode = #tpu.pipeline_mode<synchronous>, transform_indices = @transform_1, window_bounds = array<i64: 32, 256>}, {pipeline_mode = #tpu.pipeline_mode<synchronous>, transform_indices = @transform_2, window_bounds = array<i64: 1, 256>}, {pipeline_mode = #tpu.pipeline_mode<synchronous>, transform_indices = @transform_3, window_bounds = array<i64: 32, 256>}]} {
    %c0 = arith.constant 0 : index
    %c0_0 = arith.constant 0 : index
    %0 = vector.load %arg1[%c0, %c0_0] : memref<32x32xf32, #tpu.memory_space<vmem>>, vector<32x32xf32>
    %c0_1 = arith.constant 0 : index
    %c0_2 = arith.constant 0 : index
    %1 = vector.load %arg2[%c0_1, %c0_2] : memref<32x256xf32, #tpu.memory_space<vmem>>, vector<32x256xf32>
    %cst = arith.constant dense<0.000000e+00> : vector<32x256xf32>
    %2 = tpu.matmul %0, %1, %cst {dimension_numbers = #tpu.dot_dimension_numbers<[1], [0], [0], [1], [0, 0, 1, 1], [], []>} : vector<32x32xf32>, vector<32x256xf32>, vector<32x256xf32> -> vector<32x256xf32>
    %c0_3 = arith.constant 0 : index
    %c0_4 = arith.constant 0 : index
    %3 = vector.load %arg3[%c0_3, %c0_4] : memref<1x256xf32, #tpu.memory_space<vmem>>, vector<1x256xf32>
    %4 = vector.broadcast %3 : vector<1x256xf32> to vector<32x256xf32>
    %5 = arith.addf %2, %4 : vector<32x256xf32>
    %c0_5 = arith.constant 0 : index
    %c0_6 = arith.constant 0 : index
    %6 = vector.load %arg4[%c0_5, %c0_6] : memref<32x256xf32, #tpu.memory_space<vmem>>, vector<32x256xf32>
    tpu.vector_store %arg4[%c0_5, %c0_6], %5 {strides = array<i32>} : memref<32x256xf32, #tpu.memory_space<vmem>>, vector<32x256xf32>,
    return
  }
  func.func @transform_0(%arg0: i32) -> (i32, i32) {
    %c0_i32 = arith.constant 0 : i32
    %c0_i32_0 = arith.constant 0 : i32
    %c0_i32_1 = arith.constant 0 : i32
    return %c0_i32, %c0_i32_0 : i32, i32
  }
  func.func @transform_1(%arg0: i32) -> (i32, i32) {
    %c0_i32 = arith.constant 0 : i32
    %c0_i32_0 = arith.constant 0 : i32
    %c0_i32_1 = arith.constant 0 : i32
    return %c0_i32, %c0_i32_0 : i32, i32
  }
  func.func @transform_2(%arg0: i32) -> (i32, i32) {
    %c0_i32 = arith.constant 0 : i32
    %c0_i32_0 = arith.constant 0 : i32
    %c0_i32_1 = arith.constant 0 : i32
    return %c0_i32, %c0_i32_0 : i32, i32
  }
  func.func @transform_3(%arg0: i32) -> (i32, i32) {
    %c0_i32 = arith.constant 0 : i32
    %c0_i32_0 = arith.constant 0 : i32
    %c0_i32_1 = arith.constant 0 : i32
    return %c0_i32, %c0_i32_0 : i32, i32
  }
}

module attributes {stable_mosaic.version = 11 : i64} {
  func.func @_bilstm_kernel(%arg0: i32, %arg1: memref<8x8x128xf32, #tpu.memory_space<vmem>>, %arg2: memref<8x8x1xf32, #tpu.memory_space<vmem>>, %arg3: memref<2x32x128xf32, #tpu.memory_space<vmem>>, %arg4: memref<8x8x32xf32, #tpu.memory_space<vmem>>) attributes {dimension_semantics = [#tpu.dimension_semantics<arbitrary>], iteration_bounds = array<i64: 1>, scalar_prefetch = 0 : i64, scratch_operands = 0 : i64, tpu.core_type = #tpu.core_type<tc>, window_params = [{pipeline_mode = #tpu.pipeline_mode<synchronous>, transform_indices = @transform_0, window_bounds = array<i64: 8, 8, 128>}, {pipeline_mode = #tpu.pipeline_mode<synchronous>, transform_indices = @transform_1, window_bounds = array<i64: 8, 8, 1>}, {pipeline_mode = #tpu.pipeline_mode<synchronous>, transform_indices = @transform_2, window_bounds = array<i64: 2, 32, 128>}, {pipeline_mode = #tpu.pipeline_mode<synchronous>, transform_indices = @transform_3, window_bounds = array<i64: 8, 8, 32>}]} {
    %c0 = arith.constant 0 : index
    %c0_0 = arith.constant 0 : index
    %c0_1 = arith.constant 0 : index
    %0 = vector.load %arg3[%c0, %c0_0, %c0_1] : memref<2x32x128xf32, #tpu.memory_space<vmem>>, vector<1x32x128xf32>
    %1 = vector.shape_cast %0 : vector<1x32x128xf32> to vector<32x128xf32>
    %c1 = arith.constant 1 : index
    %c0_2 = arith.constant 0 : index
    %c0_3 = arith.constant 0 : index
    %2 = vector.load %arg3[%c1, %c0_2, %c0_3] : memref<2x32x128xf32, #tpu.memory_space<vmem>>, vector<1x32x128xf32>
    %3 = vector.shape_cast %2 : vector<1x32x128xf32> to vector<32x128xf32>
    %cst = arith.constant 0.000000e+00 : f32
    %4 = vector.broadcast %cst : f32 to vector<8x32xf32>
    %cst_4 = arith.constant 0.000000e+00 : f32
    %5 = vector.broadcast %cst_4 : f32 to vector<8x32xf32>
    %c0_i32 = arith.constant 0 : i32
    %6 = vector.extract_strided_slice %4 {offsets = [0, 0], sizes = [4, 32], strides = [1, 1]} : vector<8x32xf32> to vector<4x32xf32>
    %cst_5 = arith.constant dense<0.000000e+00> : vector<4x128xf32>
    %7 = tpu.matmul %6, %1, %cst_5 {dimension_numbers = #tpu.dot_dimension_numbers<[1], [0], [0], [1], [0, 0, 1, 1], [], []>} : vector<4x32xf32>, vector<32x128xf32>, vector<4x128xf32> -> vector<4x128xf32>
    %8 = vector.extract_strided_slice %4 {offsets = [4, 0], sizes = [4, 32], strides = [1, 1]} : vector<8x32xf32> to vector<4x32xf32>
    %cst_6 = arith.constant dense<0.000000e+00> : vector<4x128xf32>
    %9 = tpu.matmul %8, %3, %cst_6 {dimension_numbers = #tpu.dot_dimension_numbers<[1], [0], [0], [1], [0, 0, 1, 1], [], []>} : vector<4x32xf32>, vector<32x128xf32>, vector<4x128xf32> -> vector<4x128xf32>
    %10 = tpu.concatenate %7, %9 in 0 : vector<4x128xf32>, vector<4x128xf32> -> vector<8x128xf32>
    %11 = arith.index_cast %c0_i32 : i32 to index
    %c0_7 = arith.constant 0 : index
    %c0_8 = arith.constant 0 : index
    %12 = vector.load %arg1[%11, %c0_7, %c0_8] : memref<8x8x128xf32, #tpu.memory_space<vmem>>, vector<1x8x128xf32>
    %13 = vector.shape_cast %12 : vector<1x8x128xf32> to vector<8x128xf32>
    %14 = arith.addf %13, %10 : vector<8x128xf32>
    %15 = vector.extract_strided_slice %14 {offsets = [0, 0], sizes = [8, 32], strides = [1, 1]} : vector<8x128xf32> to vector<8x32xf32>
    %16 = arith.negf %15 : vector<8x32xf32>
    %17 = math.exp %16 : vector<8x32xf32>
    %cst_9 = arith.constant 1.000000e+00 : f32
    %18 = vector.broadcast %cst_9 : f32 to vector<8x32xf32>
    %19 = arith.addf %18, %17 : vector<8x32xf32>
    %20 = arith.divf %18, %19 : vector<8x32xf32>
    %21 = vector.extract_strided_slice %14 {offsets = [0, 32], sizes = [8, 32], strides = [1, 1]} : vector<8x128xf32> to vector<8x32xf32>
    %22 = arith.negf %21 : vector<8x32xf32>
    %23 = math.exp %22 : vector<8x32xf32>
    %cst_10 = arith.constant 1.000000e+00 : f32
    %24 = vector.broadcast %cst_10 : f32 to vector<8x32xf32>
    %25 = arith.addf %24, %23 : vector<8x32xf32>
    %26 = arith.divf %24, %25 : vector<8x32xf32>
    %27 = vector.extract_strided_slice %14 {offsets = [0, 64], sizes = [8, 32], strides = [1, 1]} : vector<8x128xf32> to vector<8x32xf32>
    %28 = math.tanh %27 : vector<8x32xf32>
    %29 = vector.extract_strided_slice %14 {offsets = [0, 96], sizes = [8, 32], strides = [1, 1]} : vector<8x128xf32> to vector<8x32xf32>
    %30 = arith.negf %29 : vector<8x32xf32>
    %31 = math.exp %30 : vector<8x32xf32>
    %cst_11 = arith.constant 1.000000e+00 : f32
    %32 = vector.broadcast %cst_11 : f32 to vector<8x32xf32>
    %33 = arith.addf %32, %31 : vector<8x32xf32>
    %34 = arith.divf %32, %33 : vector<8x32xf32>
    %35 = arith.mulf %26, %5 : vector<8x32xf32>
    %36 = arith.mulf %20, %28 : vector<8x32xf32>
    %37 = arith.addf %35, %36 : vector<8x32xf32>
    %38 = math.tanh %37 : vector<8x32xf32>
    %39 = arith.mulf %34, %38 : vector<8x32xf32>
    %40 = arith.index_cast %c0_i32 : i32 to index
    %c0_12 = arith.constant 0 : index
    %c0_13 = arith.constant 0 : index
    %41 = vector.load %arg2[%40, %c0_12, %c0_13] : memref<8x8x1xf32, #tpu.memory_space<vmem>>, vector<1x8x1xf32>
    %42 = vector.shape_cast %41 : vector<1x8x1xf32> to vector<8x1xf32>
    %43 = vector.broadcast %42 : vector<8x1xf32> to vector<8x32xf32>
    %44 = arith.mulf %43, %37 : vector<8x32xf32>
    %cst_14 = arith.constant 1.000000e+00 : f32
    %45 = vector.broadcast %cst_14 : f32 to vector<8x1xf32>
    %46 = arith.subf %45, %42 : vector<8x1xf32>
    %47 = vector.broadcast %46 : vector<8x1xf32> to vector<8x32xf32>
    %48 = arith.mulf %47, %5 : vector<8x32xf32>
    %49 = arith.addf %44, %48 : vector<8x32xf32>
    %50 = vector.broadcast %42 : vector<8x1xf32> to vector<8x32xf32>
    %51 = arith.mulf %50, %39 : vector<8x32xf32>
    %cst_15 = arith.constant 1.000000e+00 : f32
    %52 = vector.broadcast %cst_15 : f32 to vector<8x1xf32>
    %53 = arith.subf %52, %42 : vector<8x1xf32>
    %54 = vector.broadcast %53 : vector<8x1xf32> to vector<8x32xf32>
    %55 = arith.mulf %54, %4 : vector<8x32xf32>
    %56 = arith.addf %51, %55 : vector<8x32xf32>
    %57 = arith.index_cast %c0_i32 : i32 to index
    %c0_16 = arith.constant 0 : index
    %c0_17 = arith.constant 0 : index
    %58 = vector.load %arg4[%57, %c0_16, %c0_17] : memref<8x8x32xf32, #tpu.memory_space<vmem>>, vector<1x8x32xf32>
    %59 = vector.shape_cast %58 : vector<1x8x32xf32> to vector<8x32xf32>
    %60 = vector.shape_cast %51 : vector<8x32xf32> to vector<1x8x32xf32>
    tpu.vector_store %arg4[%57, %c0_16, %c0_17], %60 {strides = array<i32>} : memref<8x8x32xf32, #tpu.memory_space<vmem>>, vector<1x8x32xf32>,
    %c1_i32 = arith.constant 1 : i32
    %61 = vector.extract_strided_slice %56 {offsets = [0, 0], sizes = [4, 32], strides = [1, 1]} : vector<8x32xf32> to vector<4x32xf32>
    %cst_18 = arith.constant dense<0.000000e+00> : vector<4x128xf32>
    %62 = tpu.matmul %61, %1, %cst_18 {dimension_numbers = #tpu.dot_dimension_numbers<[1], [0], [0], [1], [0, 0, 1, 1], [], []>} : vector<4x32xf32>, vector<32x128xf32>, vector<4x128xf32> -> vector<4x128xf32>
    %63 = vector.extract_strided_slice %56 {offsets = [4, 0], sizes = [4, 32], strides = [1, 1]} : vector<8x32xf32> to vector<4x32xf32>
    %cst_19 = arith.constant dense<0.000000e+00> : vector<4x128xf32>
    %64 = tpu.matmul %63, %3, %cst_19 {dimension_numbers = #tpu.dot_dimension_numbers<[1], [0], [0], [1], [0, 0, 1, 1], [], []>} : vector<4x32xf32>, vector<32x128xf32>, vector<4x128xf32> -> vector<4x128xf32>
    %65 = tpu.concatenate %62, %64 in 0 : vector<4x128xf32>, vector<4x128xf32> -> vector<8x128xf32>
    %66 = arith.index_cast %c1_i32 : i32 to index
    %c0_20 = arith.constant 0 : index
    %c0_21 = arith.constant 0 : index
    %67 = vector.load %arg1[%66, %c0_20, %c0_21] : memref<8x8x128xf32, #tpu.memory_space<vmem>>, vector<1x8x128xf32>
    %68 = vector.shape_cast %67 : vector<1x8x128xf32> to vector<8x128xf32>
    %69 = arith.addf %68, %65 : vector<8x128xf32>
    %70 = vector.extract_strided_slice %69 {offsets = [0, 0], sizes = [8, 32], strides = [1, 1]} : vector<8x128xf32> to vector<8x32xf32>
    %71 = arith.negf %70 : vector<8x32xf32>
    %72 = math.exp %71 : vector<8x32xf32>
    %cst_22 = arith.constant 1.000000e+00 : f32
    %73 = vector.broadcast %cst_22 : f32 to vector<8x32xf32>
    %74 = arith.addf %73, %72 : vector<8x32xf32>
    %75 = arith.divf %73, %74 : vector<8x32xf32>
    %76 = vector.extract_strided_slice %69 {offsets = [0, 32], sizes = [8, 32], strides = [1, 1]} : vector<8x128xf32> to vector<8x32xf32>
    %77 = arith.negf %76 : vector<8x32xf32>
    %78 = math.exp %77 : vector<8x32xf32>
    %cst_23 = arith.constant 1.000000e+00 : f32
    %79 = vector.broadcast %cst_23 : f32 to vector<8x32xf32>
    %80 = arith.addf %79, %78 : vector<8x32xf32>
    %81 = arith.divf %79, %80 : vector<8x32xf32>
    %82 = vector.extract_strided_slice %69 {offsets = [0, 64], sizes = [8, 32], strides = [1, 1]} : vector<8x128xf32> to vector<8x32xf32>
    %83 = math.tanh %82 : vector<8x32xf32>
    %84 = vector.extract_strided_slice %69 {offsets = [0, 96], sizes = [8, 32], strides = [1, 1]} : vector<8x128xf32> to vector<8x32xf32>
    %85 = arith.negf %84 : vector<8x32xf32>
    %86 = math.exp %85 : vector<8x32xf32>
    %cst_24 = arith.constant 1.000000e+00 : f32
    %87 = vector.broadcast %cst_24 : f32 to vector<8x32xf32>
    %88 = arith.addf %87, %86 : vector<8x32xf32>
    %89 = arith.divf %87, %88 : vector<8x32xf32>
    %90 = arith.mulf %81, %49 : vector<8x32xf32>
    %91 = arith.mulf %75, %83 : vector<8x32xf32>
    %92 = arith.addf %90, %91 : vector<8x32xf32>
    %93 = math.tanh %92 : vector<8x32xf32>
    %94 = arith.mulf %89, %93 : vector<8x32xf32>
    %95 = arith.index_cast %c1_i32 : i32 to index
    %c0_25 = arith.constant 0 : index
    %c0_26 = arith.constant 0 : index
    %96 = vector.load %arg2[%95, %c0_25, %c0_26] : memref<8x8x1xf32, #tpu.memory_space<vmem>>, vector<1x8x1xf32>
    %97 = vector.shape_cast %96 : vector<1x8x1xf32> to vector<8x1xf32>
    %98 = vector.broadcast %97 : vector<8x1xf32> to vector<8x32xf32>
    %99 = arith.mulf %98, %92 : vector<8x32xf32>
    %cst_27 = arith.constant 1.000000e+00 : f32
    %100 = vector.broadcast %cst_27 : f32 to vector<8x1xf32>
    %101 = arith.subf %100, %97 : vector<8x1xf32>
    %102 = vector.broadcast %101 : vector<8x1xf32> to vector<8x32xf32>
    %103 = arith.mulf %102, %49 : vector<8x32xf32>
    %104 = arith.addf %99, %103 : vector<8x32xf32>
    %105 = vector.broadcast %97 : vector<8x1xf32> to vector<8x32xf32>
    %106 = arith.mulf %105, %94 : vector<8x32xf32>
    %cst_28 = arith.constant 1.000000e+00 : f32
    %107 = vector.broadcast %cst_28 : f32 to vector<8x1xf32>
    %108 = arith.subf %107, %97 : vector<8x1xf32>
    %109 = vector.broadcast %108 : vector<8x1xf32> to vector<8x32xf32>
    %110 = arith.mulf %109, %56 : vector<8x32xf32>
    %111 = arith.addf %106, %110 : vector<8x32xf32>
    %112 = arith.index_cast %c1_i32 : i32 to index
    %c0_29 = arith.constant 0 : index
    %c0_30 = arith.constant 0 : index
    %113 = vector.load %arg4[%112, %c0_29, %c0_30] : memref<8x8x32xf32, #tpu.memory_space<vmem>>, vector<1x8x32xf32>
    %114 = vector.shape_cast %113 : vector<1x8x32xf32> to vector<8x32xf32>
    %115 = vector.shape_cast %106 : vector<8x32xf32> to vector<1x8x32xf32>
    tpu.vector_store %arg4[%112, %c0_29, %c0_30], %115 {strides = array<i32>} : memref<8x8x32xf32, #tpu.memory_space<vmem>>, vector<1x8x32xf32>,
    %c2_i32 = arith.constant 2 : i32
    %116 = vector.extract_strided_slice %111 {offsets = [0, 0], sizes = [4, 32], strides = [1, 1]} : vector<8x32xf32> to vector<4x32xf32>
    %cst_31 = arith.constant dense<0.000000e+00> : vector<4x128xf32>
    %117 = tpu.matmul %116, %1, %cst_31 {dimension_numbers = #tpu.dot_dimension_numbers<[1], [0], [0], [1], [0, 0, 1, 1], [], []>} : vector<4x32xf32>, vector<32x128xf32>, vector<4x128xf32> -> vector<4x128xf32>
    %118 = vector.extract_strided_slice %111 {offsets = [4, 0], sizes = [4, 32], strides = [1, 1]} : vector<8x32xf32> to vector<4x32xf32>
    %cst_32 = arith.constant dense<0.000000e+00> : vector<4x128xf32>
    %119 = tpu.matmul %118, %3, %cst_32 {dimension_numbers = #tpu.dot_dimension_numbers<[1], [0], [0], [1], [0, 0, 1, 1], [], []>} : vector<4x32xf32>, vector<32x128xf32>, vector<4x128xf32> -> vector<4x128xf32>
    %120 = tpu.concatenate %117, %119 in 0 : vector<4x128xf32>, vector<4x128xf32> -> vector<8x128xf32>
    %121 = arith.index_cast %c2_i32 : i32 to index
    %c0_33 = arith.constant 0 : index
    %c0_34 = arith.constant 0 : index
    %122 = vector.load %arg1[%121, %c0_33, %c0_34] : memref<8x8x128xf32, #tpu.memory_space<vmem>>, vector<1x8x128xf32>
    %123 = vector.shape_cast %122 : vector<1x8x128xf32> to vector<8x128xf32>
    %124 = arith.addf %123, %120 : vector<8x128xf32>
    %125 = vector.extract_strided_slice %124 {offsets = [0, 0], sizes = [8, 32], strides = [1, 1]} : vector<8x128xf32> to vector<8x32xf32>
    %126 = arith.negf %125 : vector<8x32xf32>
    %127 = math.exp %126 : vector<8x32xf32>
    %cst_35 = arith.constant 1.000000e+00 : f32
    %128 = vector.broadcast %cst_35 : f32 to vector<8x32xf32>
    %129 = arith.addf %128, %127 : vector<8x32xf32>
    %130 = arith.divf %128, %129 : vector<8x32xf32>
    %131 = vector.extract_strided_slice %124 {offsets = [0, 32], sizes = [8, 32], strides = [1, 1]} : vector<8x128xf32> to vector<8x32xf32>
    %132 = arith.negf %131 : vector<8x32xf32>
    %133 = math.exp %132 : vector<8x32xf32>
    %cst_36 = arith.constant 1.000000e+00 : f32
    %134 = vector.broadcast %cst_36 : f32 to vector<8x32xf32>
    %135 = arith.addf %134, %133 : vector<8x32xf32>
    %136 = arith.divf %134, %135 : vector<8x32xf32>
    %137 = vector.extract_strided_slice %124 {offsets = [0, 64], sizes = [8, 32], strides = [1, 1]} : vector<8x128xf32> to vector<8x32xf32>
    %138 = math.tanh %137 : vector<8x32xf32>
    %139 = vector.extract_strided_slice %124 {offsets = [0, 96], sizes = [8, 32], strides = [1, 1]} : vector<8x128xf32> to vector<8x32xf32>
    %140 = arith.negf %139 : vector<8x32xf32>
    %141 = math.exp %140 : vector<8x32xf32>
    %cst_37 = arith.constant 1.000000e+00 : f32
    %142 = vector.broadcast %cst_37 : f32 to vector<8x32xf32>
    %143 = arith.addf %142, %141 : vector<8x32xf32>
    %144 = arith.divf %142, %143 : vector<8x32xf32>
    %145 = arith.mulf %136, %104 : vector<8x32xf32>
    %146 = arith.mulf %130, %138 : vector<8x32xf32>
    %147 = arith.addf %145, %146 : vector<8x32xf32>
    %148 = math.tanh %147 : vector<8x32xf32>
    %149 = arith.mulf %144, %148 : vector<8x32xf32>
    %150 = arith.index_cast %c2_i32 : i32 to index
    %c0_38 = arith.constant 0 : index
    %c0_39 = arith.constant 0 : index
    %151 = vector.load %arg2[%150, %c0_38, %c0_39] : memref<8x8x1xf32, #tpu.memory_space<vmem>>, vector<1x8x1xf32>
    %152 = vector.shape_cast %151 : vector<1x8x1xf32> to vector<8x1xf32>
    %153 = vector.broadcast %152 : vector<8x1xf32> to vector<8x32xf32>
    %154 = arith.mulf %153, %147 : vector<8x32xf32>
    %cst_40 = arith.constant 1.000000e+00 : f32
    %155 = vector.broadcast %cst_40 : f32 to vector<8x1xf32>
    %156 = arith.subf %155, %152 : vector<8x1xf32>
    %157 = vector.broadcast %156 : vector<8x1xf32> to vector<8x32xf32>
    %158 = arith.mulf %157, %104 : vector<8x32xf32>
    %159 = arith.addf %154, %158 : vector<8x32xf32>
    %160 = vector.broadcast %152 : vector<8x1xf32> to vector<8x32xf32>
    %161 = arith.mulf %160, %149 : vector<8x32xf32>
    %cst_41 = arith.constant 1.000000e+00 : f32
    %162 = vector.broadcast %cst_41 : f32 to vector<8x1xf32>
    %163 = arith.subf %162, %152 : vector<8x1xf32>
    %164 = vector.broadcast %163 : vector<8x1xf32> to vector<8x32xf32>
    %165 = arith.mulf %164, %111 : vector<8x32xf32>
    %166 = arith.addf %161, %165 : vector<8x32xf32>
    %167 = arith.index_cast %c2_i32 : i32 to index
    %c0_42 = arith.constant 0 : index
    %c0_43 = arith.constant 0 : index
    %168 = vector.load %arg4[%167, %c0_42, %c0_43] : memref<8x8x32xf32, #tpu.memory_space<vmem>>, vector<1x8x32xf32>
    %169 = vector.shape_cast %168 : vector<1x8x32xf32> to vector<8x32xf32>
    %170 = vector.shape_cast %161 : vector<8x32xf32> to vector<1x8x32xf32>
    tpu.vector_store %arg4[%167, %c0_42, %c0_43], %170 {strides = array<i32>} : memref<8x8x32xf32, #tpu.memory_space<vmem>>, vector<1x8x32xf32>,
    %c3_i32 = arith.constant 3 : i32
    %171 = vector.extract_strided_slice %166 {offsets = [0, 0], sizes = [4, 32], strides = [1, 1]} : vector<8x32xf32> to vector<4x32xf32>
    %cst_44 = arith.constant dense<0.000000e+00> : vector<4x128xf32>
    %172 = tpu.matmul %171, %1, %cst_44 {dimension_numbers = #tpu.dot_dimension_numbers<[1], [0], [0], [1], [0, 0, 1, 1], [], []>} : vector<4x32xf32>, vector<32x128xf32>, vector<4x128xf32> -> vector<4x128xf32>
    %173 = vector.extract_strided_slice %166 {offsets = [4, 0], sizes = [4, 32], strides = [1, 1]} : vector<8x32xf32> to vector<4x32xf32>
    %cst_45 = arith.constant dense<0.000000e+00> : vector<4x128xf32>
    %174 = tpu.matmul %173, %3, %cst_45 {dimension_numbers = #tpu.dot_dimension_numbers<[1], [0], [0], [1], [0, 0, 1, 1], [], []>} : vector<4x32xf32>, vector<32x128xf32>, vector<4x128xf32> -> vector<4x128xf32>
    %175 = tpu.concatenate %172, %174 in 0 : vector<4x128xf32>, vector<4x128xf32> -> vector<8x128xf32>
    %176 = arith.index_cast %c3_i32 : i32 to index
    %c0_46 = arith.constant 0 : index
    %c0_47 = arith.constant 0 : index
    %177 = vector.load %arg1[%176, %c0_46, %c0_47] : memref<8x8x128xf32, #tpu.memory_space<vmem>>, vector<1x8x128xf32>
    %178 = vector.shape_cast %177 : vector<1x8x128xf32> to vector<8x128xf32>
    %179 = arith.addf %178, %175 : vector<8x128xf32>
    %180 = vector.extract_strided_slice %179 {offsets = [0, 0], sizes = [8, 32], strides = [1, 1]} : vector<8x128xf32> to vector<8x32xf32>
    %181 = arith.negf %180 : vector<8x32xf32>
    %182 = math.exp %181 : vector<8x32xf32>
    %cst_48 = arith.constant 1.000000e+00 : f32
    %183 = vector.broadcast %cst_48 : f32 to vector<8x32xf32>
    %184 = arith.addf %183, %182 : vector<8x32xf32>
    %185 = arith.divf %183, %184 : vector<8x32xf32>
    %186 = vector.extract_strided_slice %179 {offsets = [0, 32], sizes = [8, 32], strides = [1, 1]} : vector<8x128xf32> to vector<8x32xf32>
    %187 = arith.negf %186 : vector<8x32xf32>
    %188 = math.exp %187 : vector<8x32xf32>
    %cst_49 = arith.constant 1.000000e+00 : f32
    %189 = vector.broadcast %cst_49 : f32 to vector<8x32xf32>
    %190 = arith.addf %189, %188 : vector<8x32xf32>
    %191 = arith.divf %189, %190 : vector<8x32xf32>
    %192 = vector.extract_strided_slice %179 {offsets = [0, 64], sizes = [8, 32], strides = [1, 1]} : vector<8x128xf32> to vector<8x32xf32>
    %193 = math.tanh %192 : vector<8x32xf32>
    %194 = vector.extract_strided_slice %179 {offsets = [0, 96], sizes = [8, 32], strides = [1, 1]} : vector<8x128xf32> to vector<8x32xf32>
    %195 = arith.negf %194 : vector<8x32xf32>
    %196 = math.exp %195 : vector<8x32xf32>
    %cst_50 = arith.constant 1.000000e+00 : f32
    %197 = vector.broadcast %cst_50 : f32 to vector<8x32xf32>
    %198 = arith.addf %197, %196 : vector<8x32xf32>
    %199 = arith.divf %197, %198 : vector<8x32xf32>
    %200 = arith.mulf %191, %159 : vector<8x32xf32>
    %201 = arith.mulf %185, %193 : vector<8x32xf32>
    %202 = arith.addf %200, %201 : vector<8x32xf32>
    %203 = math.tanh %202 : vector<8x32xf32>
    %204 = arith.mulf %199, %203 : vector<8x32xf32>
    %205 = arith.index_cast %c3_i32 : i32 to index
    %c0_51 = arith.constant 0 : index
    %c0_52 = arith.constant 0 : index
    %206 = vector.load %arg2[%205, %c0_51, %c0_52] : memref<8x8x1xf32, #tpu.memory_space<vmem>>, vector<1x8x1xf32>
    %207 = vector.shape_cast %206 : vector<1x8x1xf32> to vector<8x1xf32>
    %208 = vector.broadcast %207 : vector<8x1xf32> to vector<8x32xf32>
    %209 = arith.mulf %208, %202 : vector<8x32xf32>
    %cst_53 = arith.constant 1.000000e+00 : f32
    %210 = vector.broadcast %cst_53 : f32 to vector<8x1xf32>
    %211 = arith.subf %210, %207 : vector<8x1xf32>
    %212 = vector.broadcast %211 : vector<8x1xf32> to vector<8x32xf32>
    %213 = arith.mulf %212, %159 : vector<8x32xf32>
    %214 = arith.addf %209, %213 : vector<8x32xf32>
    %215 = vector.broadcast %207 : vector<8x1xf32> to vector<8x32xf32>
    %216 = arith.mulf %215, %204 : vector<8x32xf32>
    %cst_54 = arith.constant 1.000000e+00 : f32
    %217 = vector.broadcast %cst_54 : f32 to vector<8x1xf32>
    %218 = arith.subf %217, %207 : vector<8x1xf32>
    %219 = vector.broadcast %218 : vector<8x1xf32> to vector<8x32xf32>
    %220 = arith.mulf %219, %166 : vector<8x32xf32>
    %221 = arith.addf %216, %220 : vector<8x32xf32>
    %222 = arith.index_cast %c3_i32 : i32 to index
    %c0_55 = arith.constant 0 : index
    %c0_56 = arith.constant 0 : index
    %223 = vector.load %arg4[%222, %c0_55, %c0_56] : memref<8x8x32xf32, #tpu.memory_space<vmem>>, vector<1x8x32xf32>
    %224 = vector.shape_cast %223 : vector<1x8x32xf32> to vector<8x32xf32>
    %225 = vector.shape_cast %216 : vector<8x32xf32> to vector<1x8x32xf32>
    tpu.vector_store %arg4[%222, %c0_55, %c0_56], %225 {strides = array<i32>} : memref<8x8x32xf32, #tpu.memory_space<vmem>>, vector<1x8x32xf32>,
    %c4_i32 = arith.constant 4 : i32
    %226 = vector.extract_strided_slice %221 {offsets = [0, 0], sizes = [4, 32], strides = [1, 1]} : vector<8x32xf32> to vector<4x32xf32>
    %cst_57 = arith.constant dense<0.000000e+00> : vector<4x128xf32>
    %227 = tpu.matmul %226, %1, %cst_57 {dimension_numbers = #tpu.dot_dimension_numbers<[1], [0], [0], [1], [0, 0, 1, 1], [], []>} : vector<4x32xf32>, vector<32x128xf32>, vector<4x128xf32> -> vector<4x128xf32>
    %228 = vector.extract_strided_slice %221 {offsets = [4, 0], sizes = [4, 32], strides = [1, 1]} : vector<8x32xf32> to vector<4x32xf32>
    %cst_58 = arith.constant dense<0.000000e+00> : vector<4x128xf32>
    %229 = tpu.matmul %228, %3, %cst_58 {dimension_numbers = #tpu.dot_dimension_numbers<[1], [0], [0], [1], [0, 0, 1, 1], [], []>} : vector<4x32xf32>, vector<32x128xf32>, vector<4x128xf32> -> vector<4x128xf32>
    %230 = tpu.concatenate %227, %229 in 0 : vector<4x128xf32>, vector<4x128xf32> -> vector<8x128xf32>
    %231 = arith.index_cast %c4_i32 : i32 to index
    %c0_59 = arith.constant 0 : index
    %c0_60 = arith.constant 0 : index
    %232 = vector.load %arg1[%231, %c0_59, %c0_60] : memref<8x8x128xf32, #tpu.memory_space<vmem>>, vector<1x8x128xf32>
    %233 = vector.shape_cast %232 : vector<1x8x128xf32> to vector<8x128xf32>
    %234 = arith.addf %233, %230 : vector<8x128xf32>
    %235 = vector.extract_strided_slice %234 {offsets = [0, 0], sizes = [8, 32], strides = [1, 1]} : vector<8x128xf32> to vector<8x32xf32>
    %236 = arith.negf %235 : vector<8x32xf32>
    %237 = math.exp %236 : vector<8x32xf32>
    %cst_61 = arith.constant 1.000000e+00 : f32
    %238 = vector.broadcast %cst_61 : f32 to vector<8x32xf32>
    %239 = arith.addf %238, %237 : vector<8x32xf32>
    %240 = arith.divf %238, %239 : vector<8x32xf32>
    %241 = vector.extract_strided_slice %234 {offsets = [0, 32], sizes = [8, 32], strides = [1, 1]} : vector<8x128xf32> to vector<8x32xf32>
    %242 = arith.negf %241 : vector<8x32xf32>
    %243 = math.exp %242 : vector<8x32xf32>
    %cst_62 = arith.constant 1.000000e+00 : f32
    %244 = vector.broadcast %cst_62 : f32 to vector<8x32xf32>
    %245 = arith.addf %244, %243 : vector<8x32xf32>
    %246 = arith.divf %244, %245 : vector<8x32xf32>
    %247 = vector.extract_strided_slice %234 {offsets = [0, 64], sizes = [8, 32], strides = [1, 1]} : vector<8x128xf32> to vector<8x32xf32>
    %248 = math.tanh %247 : vector<8x32xf32>
    %249 = vector.extract_strided_slice %234 {offsets = [0, 96], sizes = [8, 32], strides = [1, 1]} : vector<8x128xf32> to vector<8x32xf32>
    %250 = arith.negf %249 : vector<8x32xf32>
    %251 = math.exp %250 : vector<8x32xf32>
    %cst_63 = arith.constant 1.000000e+00 : f32
    %252 = vector.broadcast %cst_63 : f32 to vector<8x32xf32>
    %253 = arith.addf %252, %251 : vector<8x32xf32>
    %254 = arith.divf %252, %253 : vector<8x32xf32>
    %255 = arith.mulf %246, %214 : vector<8x32xf32>
    %256 = arith.mulf %240, %248 : vector<8x32xf32>
    %257 = arith.addf %255, %256 : vector<8x32xf32>
    %258 = math.tanh %257 : vector<8x32xf32>
    %259 = arith.mulf %254, %258 : vector<8x32xf32>
    %260 = arith.index_cast %c4_i32 : i32 to index
    %c0_64 = arith.constant 0 : index
    %c0_65 = arith.constant 0 : index
    %261 = vector.load %arg2[%260, %c0_64, %c0_65] : memref<8x8x1xf32, #tpu.memory_space<vmem>>, vector<1x8x1xf32>
    %262 = vector.shape_cast %261 : vector<1x8x1xf32> to vector<8x1xf32>
    %263 = vector.broadcast %262 : vector<8x1xf32> to vector<8x32xf32>
    %264 = arith.mulf %263, %257 : vector<8x32xf32>
    %cst_66 = arith.constant 1.000000e+00 : f32
    %265 = vector.broadcast %cst_66 : f32 to vector<8x1xf32>
    %266 = arith.subf %265, %262 : vector<8x1xf32>
    %267 = vector.broadcast %266 : vector<8x1xf32> to vector<8x32xf32>
    %268 = arith.mulf %267, %214 : vector<8x32xf32>
    %269 = arith.addf %264, %268 : vector<8x32xf32>
    %270 = vector.broadcast %262 : vector<8x1xf32> to vector<8x32xf32>
    %271 = arith.mulf %270, %259 : vector<8x32xf32>
    %cst_67 = arith.constant 1.000000e+00 : f32
    %272 = vector.broadcast %cst_67 : f32 to vector<8x1xf32>
    %273 = arith.subf %272, %262 : vector<8x1xf32>
    %274 = vector.broadcast %273 : vector<8x1xf32> to vector<8x32xf32>
    %275 = arith.mulf %274, %221 : vector<8x32xf32>
    %276 = arith.addf %271, %275 : vector<8x32xf32>
    %277 = arith.index_cast %c4_i32 : i32 to index
    %c0_68 = arith.constant 0 : index
    %c0_69 = arith.constant 0 : index
    %278 = vector.load %arg4[%277, %c0_68, %c0_69] : memref<8x8x32xf32, #tpu.memory_space<vmem>>, vector<1x8x32xf32>
    %279 = vector.shape_cast %278 : vector<1x8x32xf32> to vector<8x32xf32>
    %280 = vector.shape_cast %271 : vector<8x32xf32> to vector<1x8x32xf32>
    tpu.vector_store %arg4[%277, %c0_68, %c0_69], %280 {strides = array<i32>} : memref<8x8x32xf32, #tpu.memory_space<vmem>>, vector<1x8x32xf32>,
    %c5_i32 = arith.constant 5 : i32
    %281 = vector.extract_strided_slice %276 {offsets = [0, 0], sizes = [4, 32], strides = [1, 1]} : vector<8x32xf32> to vector<4x32xf32>
    %cst_70 = arith.constant dense<0.000000e+00> : vector<4x128xf32>
    %282 = tpu.matmul %281, %1, %cst_70 {dimension_numbers = #tpu.dot_dimension_numbers<[1], [0], [0], [1], [0, 0, 1, 1], [], []>} : vector<4x32xf32>, vector<32x128xf32>, vector<4x128xf32> -> vector<4x128xf32>
    %283 = vector.extract_strided_slice %276 {offsets = [4, 0], sizes = [4, 32], strides = [1, 1]} : vector<8x32xf32> to vector<4x32xf32>
    %cst_71 = arith.constant dense<0.000000e+00> : vector<4x128xf32>
    %284 = tpu.matmul %283, %3, %cst_71 {dimension_numbers = #tpu.dot_dimension_numbers<[1], [0], [0], [1], [0, 0, 1, 1], [], []>} : vector<4x32xf32>, vector<32x128xf32>, vector<4x128xf32> -> vector<4x128xf32>
    %285 = tpu.concatenate %282, %284 in 0 : vector<4x128xf32>, vector<4x128xf32> -> vector<8x128xf32>
    %286 = arith.index_cast %c5_i32 : i32 to index
    %c0_72 = arith.constant 0 : index
    %c0_73 = arith.constant 0 : index
    %287 = vector.load %arg1[%286, %c0_72, %c0_73] : memref<8x8x128xf32, #tpu.memory_space<vmem>>, vector<1x8x128xf32>
    %288 = vector.shape_cast %287 : vector<1x8x128xf32> to vector<8x128xf32>
    %289 = arith.addf %288, %285 : vector<8x128xf32>
    %290 = vector.extract_strided_slice %289 {offsets = [0, 0], sizes = [8, 32], strides = [1, 1]} : vector<8x128xf32> to vector<8x32xf32>
    %291 = arith.negf %290 : vector<8x32xf32>
    %292 = math.exp %291 : vector<8x32xf32>
    %cst_74 = arith.constant 1.000000e+00 : f32
    %293 = vector.broadcast %cst_74 : f32 to vector<8x32xf32>
    %294 = arith.addf %293, %292 : vector<8x32xf32>
    %295 = arith.divf %293, %294 : vector<8x32xf32>
    %296 = vector.extract_strided_slice %289 {offsets = [0, 32], sizes = [8, 32], strides = [1, 1]} : vector<8x128xf32> to vector<8x32xf32>
    %297 = arith.negf %296 : vector<8x32xf32>
    %298 = math.exp %297 : vector<8x32xf32>
    %cst_75 = arith.constant 1.000000e+00 : f32
    %299 = vector.broadcast %cst_75 : f32 to vector<8x32xf32>
    %300 = arith.addf %299, %298 : vector<8x32xf32>
    %301 = arith.divf %299, %300 : vector<8x32xf32>
    %302 = vector.extract_strided_slice %289 {offsets = [0, 64], sizes = [8, 32], strides = [1, 1]} : vector<8x128xf32> to vector<8x32xf32>
    %303 = math.tanh %302 : vector<8x32xf32>
    %304 = vector.extract_strided_slice %289 {offsets = [0, 96], sizes = [8, 32], strides = [1, 1]} : vector<8x128xf32> to vector<8x32xf32>
    %305 = arith.negf %304 : vector<8x32xf32>
    %306 = math.exp %305 : vector<8x32xf32>
    %cst_76 = arith.constant 1.000000e+00 : f32
    %307 = vector.broadcast %cst_76 : f32 to vector<8x32xf32>
    %308 = arith.addf %307, %306 : vector<8x32xf32>
    %309 = arith.divf %307, %308 : vector<8x32xf32>
    %310 = arith.mulf %301, %269 : vector<8x32xf32>
    %311 = arith.mulf %295, %303 : vector<8x32xf32>
    %312 = arith.addf %310, %311 : vector<8x32xf32>
    %313 = math.tanh %312 : vector<8x32xf32>
    %314 = arith.mulf %309, %313 : vector<8x32xf32>
    %315 = arith.index_cast %c5_i32 : i32 to index
    %c0_77 = arith.constant 0 : index
    %c0_78 = arith.constant 0 : index
    %316 = vector.load %arg2[%315, %c0_77, %c0_78] : memref<8x8x1xf32, #tpu.memory_space<vmem>>, vector<1x8x1xf32>
    %317 = vector.shape_cast %316 : vector<1x8x1xf32> to vector<8x1xf32>
    %318 = vector.broadcast %317 : vector<8x1xf32> to vector<8x32xf32>
    %319 = arith.mulf %318, %312 : vector<8x32xf32>
    %cst_79 = arith.constant 1.000000e+00 : f32
    %320 = vector.broadcast %cst_79 : f32 to vector<8x1xf32>
    %321 = arith.subf %320, %317 : vector<8x1xf32>
    %322 = vector.broadcast %321 : vector<8x1xf32> to vector<8x32xf32>
    %323 = arith.mulf %322, %269 : vector<8x32xf32>
    %324 = arith.addf %319, %323 : vector<8x32xf32>
    %325 = vector.broadcast %317 : vector<8x1xf32> to vector<8x32xf32>
    %326 = arith.mulf %325, %314 : vector<8x32xf32>
    %cst_80 = arith.constant 1.000000e+00 : f32
    %327 = vector.broadcast %cst_80 : f32 to vector<8x1xf32>
    %328 = arith.subf %327, %317 : vector<8x1xf32>
    %329 = vector.broadcast %328 : vector<8x1xf32> to vector<8x32xf32>
    %330 = arith.mulf %329, %276 : vector<8x32xf32>
    %331 = arith.addf %326, %330 : vector<8x32xf32>
    %332 = arith.index_cast %c5_i32 : i32 to index
    %c0_81 = arith.constant 0 : index
    %c0_82 = arith.constant 0 : index
    %333 = vector.load %arg4[%332, %c0_81, %c0_82] : memref<8x8x32xf32, #tpu.memory_space<vmem>>, vector<1x8x32xf32>
    %334 = vector.shape_cast %333 : vector<1x8x32xf32> to vector<8x32xf32>
    %335 = vector.shape_cast %326 : vector<8x32xf32> to vector<1x8x32xf32>
    tpu.vector_store %arg4[%332, %c0_81, %c0_82], %335 {strides = array<i32>} : memref<8x8x32xf32, #tpu.memory_space<vmem>>, vector<1x8x32xf32>,
    %c6_i32 = arith.constant 6 : i32
    %336 = vector.extract_strided_slice %331 {offsets = [0, 0], sizes = [4, 32], strides = [1, 1]} : vector<8x32xf32> to vector<4x32xf32>
    %cst_83 = arith.constant dense<0.000000e+00> : vector<4x128xf32>
    %337 = tpu.matmul %336, %1, %cst_83 {dimension_numbers = #tpu.dot_dimension_numbers<[1], [0], [0], [1], [0, 0, 1, 1], [], []>} : vector<4x32xf32>, vector<32x128xf32>, vector<4x128xf32> -> vector<4x128xf32>
    %338 = vector.extract_strided_slice %331 {offsets = [4, 0], sizes = [4, 32], strides = [1, 1]} : vector<8x32xf32> to vector<4x32xf32>
    %cst_84 = arith.constant dense<0.000000e+00> : vector<4x128xf32>
    %339 = tpu.matmul %338, %3, %cst_84 {dimension_numbers = #tpu.dot_dimension_numbers<[1], [0], [0], [1], [0, 0, 1, 1], [], []>} : vector<4x32xf32>, vector<32x128xf32>, vector<4x128xf32> -> vector<4x128xf32>
    %340 = tpu.concatenate %337, %339 in 0 : vector<4x128xf32>, vector<4x128xf32> -> vector<8x128xf32>
    %341 = arith.index_cast %c6_i32 : i32 to index
    %c0_85 = arith.constant 0 : index
    %c0_86 = arith.constant 0 : index
    %342 = vector.load %arg1[%341, %c0_85, %c0_86] : memref<8x8x128xf32, #tpu.memory_space<vmem>>, vector<1x8x128xf32>
    %343 = vector.shape_cast %342 : vector<1x8x128xf32> to vector<8x128xf32>
    %344 = arith.addf %343, %340 : vector<8x128xf32>
    %345 = vector.extract_strided_slice %344 {offsets = [0, 0], sizes = [8, 32], strides = [1, 1]} : vector<8x128xf32> to vector<8x32xf32>
    %346 = arith.negf %345 : vector<8x32xf32>
    %347 = math.exp %346 : vector<8x32xf32>
    %cst_87 = arith.constant 1.000000e+00 : f32
    %348 = vector.broadcast %cst_87 : f32 to vector<8x32xf32>
    %349 = arith.addf %348, %347 : vector<8x32xf32>
    %350 = arith.divf %348, %349 : vector<8x32xf32>
    %351 = vector.extract_strided_slice %344 {offsets = [0, 32], sizes = [8, 32], strides = [1, 1]} : vector<8x128xf32> to vector<8x32xf32>
    %352 = arith.negf %351 : vector<8x32xf32>
    %353 = math.exp %352 : vector<8x32xf32>
    %cst_88 = arith.constant 1.000000e+00 : f32
    %354 = vector.broadcast %cst_88 : f32 to vector<8x32xf32>
    %355 = arith.addf %354, %353 : vector<8x32xf32>
    %356 = arith.divf %354, %355 : vector<8x32xf32>
    %357 = vector.extract_strided_slice %344 {offsets = [0, 64], sizes = [8, 32], strides = [1, 1]} : vector<8x128xf32> to vector<8x32xf32>
    %358 = math.tanh %357 : vector<8x32xf32>
    %359 = vector.extract_strided_slice %344 {offsets = [0, 96], sizes = [8, 32], strides = [1, 1]} : vector<8x128xf32> to vector<8x32xf32>
    %360 = arith.negf %359 : vector<8x32xf32>
    %361 = math.exp %360 : vector<8x32xf32>
    %cst_89 = arith.constant 1.000000e+00 : f32
    %362 = vector.broadcast %cst_89 : f32 to vector<8x32xf32>
    %363 = arith.addf %362, %361 : vector<8x32xf32>
    %364 = arith.divf %362, %363 : vector<8x32xf32>
    %365 = arith.mulf %356, %324 : vector<8x32xf32>
    %366 = arith.mulf %350, %358 : vector<8x32xf32>
    %367 = arith.addf %365, %366 : vector<8x32xf32>
    %368 = math.tanh %367 : vector<8x32xf32>
    %369 = arith.mulf %364, %368 : vector<8x32xf32>
    %370 = arith.index_cast %c6_i32 : i32 to index
    %c0_90 = arith.constant 0 : index
    %c0_91 = arith.constant 0 : index
    %371 = vector.load %arg2[%370, %c0_90, %c0_91] : memref<8x8x1xf32, #tpu.memory_space<vmem>>, vector<1x8x1xf32>
    %372 = vector.shape_cast %371 : vector<1x8x1xf32> to vector<8x1xf32>
    %373 = vector.broadcast %372 : vector<8x1xf32> to vector<8x32xf32>
    %374 = arith.mulf %373, %367 : vector<8x32xf32>
    %cst_92 = arith.constant 1.000000e+00 : f32
    %375 = vector.broadcast %cst_92 : f32 to vector<8x1xf32>
    %376 = arith.subf %375, %372 : vector<8x1xf32>
    %377 = vector.broadcast %376 : vector<8x1xf32> to vector<8x32xf32>
    %378 = arith.mulf %377, %324 : vector<8x32xf32>
    %379 = arith.addf %374, %378 : vector<8x32xf32>
    %380 = vector.broadcast %372 : vector<8x1xf32> to vector<8x32xf32>
    %381 = arith.mulf %380, %369 : vector<8x32xf32>
    %cst_93 = arith.constant 1.000000e+00 : f32
    %382 = vector.broadcast %cst_93 : f32 to vector<8x1xf32>
    %383 = arith.subf %382, %372 : vector<8x1xf32>
    %384 = vector.broadcast %383 : vector<8x1xf32> to vector<8x32xf32>
    %385 = arith.mulf %384, %331 : vector<8x32xf32>
    %386 = arith.addf %381, %385 : vector<8x32xf32>
    %387 = arith.index_cast %c6_i32 : i32 to index
    %c0_94 = arith.constant 0 : index
    %c0_95 = arith.constant 0 : index
    %388 = vector.load %arg4[%387, %c0_94, %c0_95] : memref<8x8x32xf32, #tpu.memory_space<vmem>>, vector<1x8x32xf32>
    %389 = vector.shape_cast %388 : vector<1x8x32xf32> to vector<8x32xf32>
    %390 = vector.shape_cast %381 : vector<8x32xf32> to vector<1x8x32xf32>
    tpu.vector_store %arg4[%387, %c0_94, %c0_95], %390 {strides = array<i32>} : memref<8x8x32xf32, #tpu.memory_space<vmem>>, vector<1x8x32xf32>,
    %c7_i32 = arith.constant 7 : i32
    %391 = vector.extract_strided_slice %386 {offsets = [0, 0], sizes = [4, 32], strides = [1, 1]} : vector<8x32xf32> to vector<4x32xf32>
    %cst_96 = arith.constant dense<0.000000e+00> : vector<4x128xf32>
    %392 = tpu.matmul %391, %1, %cst_96 {dimension_numbers = #tpu.dot_dimension_numbers<[1], [0], [0], [1], [0, 0, 1, 1], [], []>} : vector<4x32xf32>, vector<32x128xf32>, vector<4x128xf32> -> vector<4x128xf32>
    %393 = vector.extract_strided_slice %386 {offsets = [4, 0], sizes = [4, 32], strides = [1, 1]} : vector<8x32xf32> to vector<4x32xf32>
    %cst_97 = arith.constant dense<0.000000e+00> : vector<4x128xf32>
    %394 = tpu.matmul %393, %3, %cst_97 {dimension_numbers = #tpu.dot_dimension_numbers<[1], [0], [0], [1], [0, 0, 1, 1], [], []>} : vector<4x32xf32>, vector<32x128xf32>, vector<4x128xf32> -> vector<4x128xf32>
    %395 = tpu.concatenate %392, %394 in 0 : vector<4x128xf32>, vector<4x128xf32> -> vector<8x128xf32>
    %396 = arith.index_cast %c7_i32 : i32 to index
    %c0_98 = arith.constant 0 : index
    %c0_99 = arith.constant 0 : index
    %397 = vector.load %arg1[%396, %c0_98, %c0_99] : memref<8x8x128xf32, #tpu.memory_space<vmem>>, vector<1x8x128xf32>
    %398 = vector.shape_cast %397 : vector<1x8x128xf32> to vector<8x128xf32>
    %399 = arith.addf %398, %395 : vector<8x128xf32>
    %400 = vector.extract_strided_slice %399 {offsets = [0, 0], sizes = [8, 32], strides = [1, 1]} : vector<8x128xf32> to vector<8x32xf32>
    %401 = arith.negf %400 : vector<8x32xf32>
    %402 = math.exp %401 : vector<8x32xf32>
    %cst_100 = arith.constant 1.000000e+00 : f32
    %403 = vector.broadcast %cst_100 : f32 to vector<8x32xf32>
    %404 = arith.addf %403, %402 : vector<8x32xf32>
    %405 = arith.divf %403, %404 : vector<8x32xf32>
    %406 = vector.extract_strided_slice %399 {offsets = [0, 32], sizes = [8, 32], strides = [1, 1]} : vector<8x128xf32> to vector<8x32xf32>
    %407 = arith.negf %406 : vector<8x32xf32>
    %408 = math.exp %407 : vector<8x32xf32>
    %cst_101 = arith.constant 1.000000e+00 : f32
    %409 = vector.broadcast %cst_101 : f32 to vector<8x32xf32>
    %410 = arith.addf %409, %408 : vector<8x32xf32>
    %411 = arith.divf %409, %410 : vector<8x32xf32>
    %412 = vector.extract_strided_slice %399 {offsets = [0, 64], sizes = [8, 32], strides = [1, 1]} : vector<8x128xf32> to vector<8x32xf32>
    %413 = math.tanh %412 : vector<8x32xf32>
    %414 = vector.extract_strided_slice %399 {offsets = [0, 96], sizes = [8, 32], strides = [1, 1]} : vector<8x128xf32> to vector<8x32xf32>
    %415 = arith.negf %414 : vector<8x32xf32>
    %416 = math.exp %415 : vector<8x32xf32>
    %cst_102 = arith.constant 1.000000e+00 : f32
    %417 = vector.broadcast %cst_102 : f32 to vector<8x32xf32>
    %418 = arith.addf %417, %416 : vector<8x32xf32>
    %419 = arith.divf %417, %418 : vector<8x32xf32>
    %420 = arith.mulf %411, %379 : vector<8x32xf32>
    %421 = arith.mulf %405, %413 : vector<8x32xf32>
    %422 = arith.addf %420, %421 : vector<8x32xf32>
    %423 = math.tanh %422 : vector<8x32xf32>
    %424 = arith.mulf %419, %423 : vector<8x32xf32>
    %425 = arith.index_cast %c7_i32 : i32 to index
    %c0_103 = arith.constant 0 : index
    %c0_104 = arith.constant 0 : index
    %426 = vector.load %arg2[%425, %c0_103, %c0_104] : memref<8x8x1xf32, #tpu.memory_space<vmem>>, vector<1x8x1xf32>
    %427 = vector.shape_cast %426 : vector<1x8x1xf32> to vector<8x1xf32>
    %428 = vector.broadcast %427 : vector<8x1xf32> to vector<8x32xf32>
    %429 = arith.mulf %428, %422 : vector<8x32xf32>
    %cst_105 = arith.constant 1.000000e+00 : f32
    %430 = vector.broadcast %cst_105 : f32 to vector<8x1xf32>
    %431 = arith.subf %430, %427 : vector<8x1xf32>
    %432 = vector.broadcast %431 : vector<8x1xf32> to vector<8x32xf32>
    %433 = arith.mulf %432, %379 : vector<8x32xf32>
    %434 = arith.addf %429, %433 : vector<8x32xf32>
    %435 = vector.broadcast %427 : vector<8x1xf32> to vector<8x32xf32>
    %436 = arith.mulf %435, %424 : vector<8x32xf32>
    %cst_106 = arith.constant 1.000000e+00 : f32
    %437 = vector.broadcast %cst_106 : f32 to vector<8x1xf32>
    %438 = arith.subf %437, %427 : vector<8x1xf32>
    %439 = vector.broadcast %438 : vector<8x1xf32> to vector<8x32xf32>
    %440 = arith.mulf %439, %386 : vector<8x32xf32>
    %441 = arith.addf %436, %440 : vector<8x32xf32>
    %442 = arith.index_cast %c7_i32 : i32 to index
    %c0_107 = arith.constant 0 : index
    %c0_108 = arith.constant 0 : index
    %443 = vector.load %arg4[%442, %c0_107, %c0_108] : memref<8x8x32xf32, #tpu.memory_space<vmem>>, vector<1x8x32xf32>
    %444 = vector.shape_cast %443 : vector<1x8x32xf32> to vector<8x32xf32>
    %445 = vector.shape_cast %436 : vector<8x32xf32> to vector<1x8x32xf32>
    tpu.vector_store %arg4[%442, %c0_107, %c0_108], %445 {strides = array<i32>} : memref<8x8x32xf32, #tpu.memory_space<vmem>>, vector<1x8x32xf32>,
    %c8_i32 = arith.constant 8 : i32
    return
  }
  func.func @transform_0(%arg0: i32) -> (i32, i32, i32) {
    %c0_i32 = arith.constant 0 : i32
    %c0_i32_0 = arith.constant 0 : i32
    %c0_i32_1 = arith.constant 0 : i32
    %c0_i32_2 = arith.constant 0 : i32
    return %c0_i32, %c0_i32_0, %c0_i32_1 : i32, i32, i32
  }
  func.func @transform_1(%arg0: i32) -> (i32, i32, i32) {
    %c0_i32 = arith.constant 0 : i32
    %c0_i32_0 = arith.constant 0 : i32
    %c0_i32_1 = arith.constant 0 : i32
    %c0_i32_2 = arith.constant 0 : i32
    return %c0_i32, %c0_i32_0, %c0_i32_1 : i32, i32, i32
  }
  func.func @transform_2(%arg0: i32) -> (i32, i32, i32) {
    %c0_i32 = arith.constant 0 : i32
    %c0_i32_0 = arith.constant 0 : i32
    %c0_i32_1 = arith.constant 0 : i32
    %c0_i32_2 = arith.constant 0 : i32
    return %c0_i32, %c0_i32_0, %c0_i32_1 : i32, i32, i32
  }
  func.func @transform_3(%arg0: i32) -> (i32, i32, i32) {
    %c0_i32 = arith.constant 0 : i32
    %c0_i32_0 = arith.constant 0 : i32
    %c0_i32_1 = arith.constant 0 : i32
    %c0_i32_2 = arith.constant 0 : i32
    return %c0_i32, %c0_i32_0, %c0_i32_1 : i32, i32, i32
  }
}

module attributes {stable_mosaic.version = 11 : i64} {
  func.func @_attn_proj_kernel(%arg0: i32, %arg1: memref<2x8x64xf32, #tpu.memory_space<vmem>>, %arg2: memref<2x8x64xf32, #tpu.memory_space<vmem>>, %arg3: memref<2x8xf32, #tpu.memory_space<vmem>>, %arg4: memref<2x8xf32, #tpu.memory_space<vmem>>, %arg5: memref<256x32xf32, #tpu.memory_space<vmem>>, %arg6: memref<1x32xf32, #tpu.memory_space<vmem>>, %arg7: memref<2x8x32xf32, #tpu.memory_space<vmem>>, %arg8: memref<2x8x32xf32, #tpu.memory_space<vmem>>) attributes {dimension_semantics = [#tpu.dimension_semantics<arbitrary>], iteration_bounds = array<i64: 1>, scalar_prefetch = 0 : i64, scratch_operands = 0 : i64, tpu.core_type = #tpu.core_type<tc>, window_params = [{pipeline_mode = #tpu.pipeline_mode<synchronous>, transform_indices = @transform_0, window_bounds = array<i64: 2, 8, 64>}, {pipeline_mode = #tpu.pipeline_mode<synchronous>, transform_indices = @transform_1, window_bounds = array<i64: 2, 8, 64>}, {pipeline_mode = #tpu.pipeline_mode<synchronous>, transform_indices = @transform_2, window_bounds = array<i64: 2, 8>}, {pipeline_mode = #tpu.pipeline_mode<synchronous>, transform_indices = @transform_3, window_bounds = array<i64: 2, 8>}, {pipeline_mode = #tpu.pipeline_mode<synchronous>, transform_indices = @transform_4, window_bounds = array<i64: 256, 32>}, {pipeline_mode = #tpu.pipeline_mode<synchronous>, transform_indices = @transform_5, window_bounds = array<i64: 1, 32>}, {pipeline_mode = #tpu.pipeline_mode<synchronous>, transform_indices = @transform_6, window_bounds = array<i64: 2, 8, 32>}, {pipeline_mode = #tpu.pipeline_mode<synchronous>, transform_indices = @transform_7, window_bounds = array<i64: 2, 8, 32>}]} {
    %c0 = arith.constant 0 : index
    %c0_0 = arith.constant 0 : index
    %c0_1 = arith.constant 0 : index
    %0 = vector.load %arg1[%c0, %c0_0, %c0_1] : memref<2x8x64xf32, #tpu.memory_space<vmem>>, vector<2x8x64xf32>
    %c0_2 = arith.constant 0 : index
    %c0_3 = arith.constant 0 : index
    %c0_4 = arith.constant 0 : index
    %1 = vector.load %arg2[%c0_2, %c0_3, %c0_4] : memref<2x8x64xf32, #tpu.memory_space<vmem>>, vector<2x8x64xf32>
    %c0_5 = arith.constant 0 : index
    %c0_6 = arith.constant 0 : index
    %2 = vector.load %arg3[%c0_5, %c0_6] : memref<2x8xf32, #tpu.memory_space<vmem>>, vector<2x8xf32>
    %c0_7 = arith.constant 0 : index
    %c0_8 = arith.constant 0 : index
    %3 = vector.load %arg4[%c0_7, %c0_8] : memref<2x8xf32, #tpu.memory_space<vmem>>, vector<2x8xf32>
    "tpu.trace_start"() <{level = 10 : i32, message = "btd,bsd->bts"}> : () -> ()
    %cst = arith.constant dense<0.000000e+00> : vector<2x8x8xf32>
    %4 = tpu.matmul %0, %1, %cst {dimension_numbers = #tpu.dot_dimension_numbers<[2], [2], [1], [1], [0, 0, 0, 1, 1, 1], [0], [0]>} : vector<2x8x64xf32>, vector<2x8x64xf32>, vector<2x8x8xf32> -> vector<2x8x8xf32>
    "tpu.trace_stop"() : () -> ()
    %5 = vector.shape_cast %3 : vector<2x8xf32> to vector<2x1x8xf32>
    %6 = vector.broadcast %5 : vector<2x1x8xf32> to vector<2x8x8xf32>
    %7 = arith.mulf %4, %6 : vector<2x8x8xf32>
    %cst_9 = arith.constant dense<0xFF800000> : vector<2x8xf32>
    %8 = vector.multi_reduction <maximumf>, %7, %cst_9 [2] : vector<2x8x8xf32> to vector<2x8xf32>
    %9 = vector.shape_cast %8 : vector<2x8xf32> to vector<2x8x1xf32>
    %10 = vector.broadcast %9 : vector<2x8x1xf32> to vector<2x8x8xf32>
    %11 = arith.subf %7, %10 : vector<2x8x8xf32>
    %12 = math.exp %11 : vector<2x8x8xf32>
    %13 = vector.broadcast %5 : vector<2x1x8xf32> to vector<2x8x8xf32>
    %14 = arith.mulf %12, %13 : vector<2x8x8xf32>
    %cst_10 = arith.constant dense<0.000000e+00> : vector<2x8xf32>
    %15 = vector.multi_reduction <add>, %14, %cst_10 [2] : vector<2x8x8xf32> to vector<2x8xf32>
    %16 = vector.shape_cast %15 : vector<2x8xf32> to vector<2x8x1xf32>
    %cst_11 = arith.constant 9.99999982E-14 : f32
    %17 = vector.broadcast %cst_11 : f32 to vector<2x8x1xf32>
    %18 = arith.addf %16, %17 : vector<2x8x1xf32>
    %19 = vector.broadcast %18 : vector<2x8x1xf32> to vector<2x8x8xf32>
    %20 = arith.divf %14, %19 : vector<2x8x8xf32>
    %21 = tpu.transpose %4, [0, 2, 1] : vector<2x8x8xf32> -> vector<2x8x8xf32>
    %22 = vector.shape_cast %2 : vector<2x8xf32> to vector<2x1x8xf32>
    %23 = vector.broadcast %22 : vector<2x1x8xf32> to vector<2x8x8xf32>
    %24 = arith.mulf %21, %23 : vector<2x8x8xf32>
    %cst_12 = arith.constant dense<0xFF800000> : vector<2x8xf32>
    %25 = vector.multi_reduction <maximumf>, %24, %cst_12 [2] : vector<2x8x8xf32> to vector<2x8xf32>
    %26 = vector.shape_cast %25 : vector<2x8xf32> to vector<2x8x1xf32>
    %27 = vector.broadcast %26 : vector<2x8x1xf32> to vector<2x8x8xf32>
    %28 = arith.subf %24, %27 : vector<2x8x8xf32>
    %29 = math.exp %28 : vector<2x8x8xf32>
    %30 = vector.broadcast %22 : vector<2x1x8xf32> to vector<2x8x8xf32>
    %31 = arith.mulf %29, %30 : vector<2x8x8xf32>
    %cst_13 = arith.constant dense<0.000000e+00> : vector<2x8xf32>
    %32 = vector.multi_reduction <add>, %31, %cst_13 [2] : vector<2x8x8xf32> to vector<2x8xf32>
    %33 = vector.shape_cast %32 : vector<2x8xf32> to vector<2x8x1xf32>
    %cst_14 = arith.constant 9.99999982E-14 : f32
    %34 = vector.broadcast %cst_14 : f32 to vector<2x8x1xf32>
    %35 = arith.addf %33, %34 : vector<2x8x1xf32>
    %36 = vector.broadcast %35 : vector<2x8x1xf32> to vector<2x8x8xf32>
    %37 = arith.divf %31, %36 : vector<2x8x8xf32>
    "tpu.trace_start"() <{level = 10 : i32, message = "bts,bsd->btd"}> : () -> ()
    %cst_15 = arith.constant dense<0.000000e+00> : vector<2x8x64xf32>
    %38 = tpu.matmul %20, %1, %cst_15 {dimension_numbers = #tpu.dot_dimension_numbers<[2], [1], [1], [2], [0, 0, 0, 1, 1, 2], [0], [0]>} : vector<2x8x8xf32>, vector<2x8x64xf32>, vector<2x8x64xf32> -> vector<2x8x64xf32>
    "tpu.trace_stop"() : () -> ()
    %39 = vector.shape_cast %2 : vector<2x8xf32> to vector<2x8x1xf32>
    %40 = vector.broadcast %39 : vector<2x8x1xf32> to vector<2x8x64xf32>
    %41 = arith.mulf %38, %40 : vector<2x8x64xf32>
    "tpu.trace_start"() <{level = 10 : i32, message = "bst,btd->bsd"}> : () -> ()
    %cst_16 = arith.constant dense<0.000000e+00> : vector<2x8x64xf32>
    %42 = tpu.matmul %37, %0, %cst_16 {dimension_numbers = #tpu.dot_dimension_numbers<[2], [1], [1], [2], [0, 0, 0, 1, 1, 2], [0], [0]>} : vector<2x8x8xf32>, vector<2x8x64xf32>, vector<2x8x64xf32> -> vector<2x8x64xf32>
    "tpu.trace_stop"() : () -> ()
    %43 = vector.shape_cast %3 : vector<2x8xf32> to vector<2x8x1xf32>
    %44 = vector.broadcast %43 : vector<2x8x1xf32> to vector<2x8x64xf32>
    %45 = arith.mulf %42, %44 : vector<2x8x64xf32>
    %c0_17 = arith.constant 0 : index
    %c0_18 = arith.constant 0 : index
    %46 = vector.load %arg5[%c0_17, %c0_18] : memref<256x32xf32, #tpu.memory_space<vmem>>, vector<256x32xf32>
    %c0_19 = arith.constant 0 : index
    %c0_20 = arith.constant 0 : index
    %47 = vector.load %arg6[%c0_19, %c0_20] : memref<1x32xf32, #tpu.memory_space<vmem>>, vector<1x32xf32>
    %48 = arith.subf %0, %41 : vector<2x8x64xf32>
    %49 = arith.mulf %0, %41 : vector<2x8x64xf32>
    %50 = tpu.concatenate %0, %41, %48, %49 in 2 : vector<2x8x64xf32>, vector<2x8x64xf32>, vector<2x8x64xf32>, vector<2x8x64xf32> -> vector<2x8x256xf32>
    "tpu.trace_start"() <{level = 10 : i32, message = "btk,kn->btn"}> : () -> ()
    %cst_21 = arith.constant dense<0.000000e+00> : vector<2x8x32xf32>
    %51 = tpu.matmul %50, %46, %cst_21 {dimension_numbers = #tpu.dot_dimension_numbers<[2], [0], [0, 1], [1], [0, 0, 0, 1, 1, 1], [], []>} : vector<2x8x256xf32>, vector<256x32xf32>, vector<2x8x32xf32> -> vector<2x8x32xf32>
    "tpu.trace_stop"() : () -> ()
    %52 = vector.shape_cast %47 : vector<1x32xf32> to vector<1x1x32xf32>
    %53 = vector.broadcast %52 : vector<1x1x32xf32> to vector<2x8x32xf32>
    %54 = arith.addf %51, %53 : vector<2x8x32xf32>
    %cst_22 = arith.constant 0.000000e+00 : f32
    %55 = vector.broadcast %cst_22 : f32 to vector<2x8x32xf32>
    %56 = arith.maximumf %54, %55 : vector<2x8x32xf32>
    %c0_23 = arith.constant 0 : index
    %c0_24 = arith.constant 0 : index
    %c0_25 = arith.constant 0 : index
    %57 = vector.load %arg7[%c0_23, %c0_24, %c0_25] : memref<2x8x32xf32, #tpu.memory_space<vmem>>, vector<2x8x32xf32>
    tpu.vector_store %arg7[%c0_23, %c0_24, %c0_25], %56 {strides = array<i32>} : memref<2x8x32xf32, #tpu.memory_space<vmem>>, vector<2x8x32xf32>,
    %58 = arith.subf %1, %45 : vector<2x8x64xf32>
    %59 = arith.mulf %1, %45 : vector<2x8x64xf32>
    %60 = tpu.concatenate %1, %45, %58, %59 in 2 : vector<2x8x64xf32>, vector<2x8x64xf32>, vector<2x8x64xf32>, vector<2x8x64xf32> -> vector<2x8x256xf32>
    "tpu.trace_start"() <{level = 10 : i32, message = "btk,kn->btn"}> : () -> ()
    %cst_26 = arith.constant dense<0.000000e+00> : vector<2x8x32xf32>
    %61 = tpu.matmul %60, %46, %cst_26 {dimension_numbers = #tpu.dot_dimension_numbers<[2], [0], [0, 1], [1], [0, 0, 0, 1, 1, 1], [], []>} : vector<2x8x256xf32>, vector<256x32xf32>, vector<2x8x32xf32> -> vector<2x8x32xf32>
    "tpu.trace_stop"() : () -> ()
    %62 = vector.shape_cast %47 : vector<1x32xf32> to vector<1x1x32xf32>
    %63 = vector.broadcast %62 : vector<1x1x32xf32> to vector<2x8x32xf32>
    %64 = arith.addf %61, %63 : vector<2x8x32xf32>
    %cst_27 = arith.constant 0.000000e+00 : f32
    %65 = vector.broadcast %cst_27 : f32 to vector<2x8x32xf32>
    %66 = arith.maximumf %64, %65 : vector<2x8x32xf32>
    %c0_28 = arith.constant 0 : index
    %c0_29 = arith.constant 0 : index
    %c0_30 = arith.constant 0 : index
    %67 = vector.load %arg8[%c0_28, %c0_29, %c0_30] : memref<2x8x32xf32, #tpu.memory_space<vmem>>, vector<2x8x32xf32>
    tpu.vector_store %arg8[%c0_28, %c0_29, %c0_30], %66 {strides = array<i32>} : memref<2x8x32xf32, #tpu.memory_space<vmem>>, vector<2x8x32xf32>,
    return
  }
  func.func @transform_0(%arg0: i32) -> (i32, i32, i32) {
    %c0_i32 = arith.constant 0 : i32
    %c0_i32_0 = arith.constant 0 : i32
    %c0_i32_1 = arith.constant 0 : i32
    %c0_i32_2 = arith.constant 0 : i32
    return %c0_i32, %c0_i32_0, %c0_i32_1 : i32, i32, i32
  }
  func.func @transform_1(%arg0: i32) -> (i32, i32, i32) {
    %c0_i32 = arith.constant 0 : i32
    %c0_i32_0 = arith.constant 0 : i32
    %c0_i32_1 = arith.constant 0 : i32
    %c0_i32_2 = arith.constant 0 : i32
    return %c0_i32, %c0_i32_0, %c0_i32_1 : i32, i32, i32
  }
  func.func @transform_2(%arg0: i32) -> (i32, i32) {
    %c0_i32 = arith.constant 0 : i32
    %c0_i32_0 = arith.constant 0 : i32
    %c0_i32_1 = arith.constant 0 : i32
    return %c0_i32, %c0_i32_0 : i32, i32
  }
  func.func @transform_3(%arg0: i32) -> (i32, i32) {
    %c0_i32 = arith.constant 0 : i32
    %c0_i32_0 = arith.constant 0 : i32
    %c0_i32_1 = arith.constant 0 : i32
    return %c0_i32, %c0_i32_0 : i32, i32
  }
  func.func @transform_4(%arg0: i32) -> (i32, i32) {
    %c0_i32 = arith.constant 0 : i32
    %c0_i32_0 = arith.constant 0 : i32
    %c0_i32_1 = arith.constant 0 : i32
    return %c0_i32, %c0_i32_0 : i32, i32
  }
  func.func @transform_5(%arg0: i32) -> (i32, i32) {
    %c0_i32 = arith.constant 0 : i32
    %c0_i32_0 = arith.constant 0 : i32
    %c0_i32_1 = arith.constant 0 : i32
    return %c0_i32, %c0_i32_0 : i32, i32
  }
  func.func @transform_6(%arg0: i32) -> (i32, i32, i32) {
    %c0_i32 = arith.constant 0 : i32
    %c0_i32_0 = arith.constant 0 : i32
    %c0_i32_1 = arith.constant 0 : i32
    %c0_i32_2 = arith.constant 0 : i32
    return %c0_i32, %c0_i32_0, %c0_i32_1 : i32, i32, i32
  }
  func.func @transform_7(%arg0: i32) -> (i32, i32, i32) {
    %c0_i32 = arith.constant 0 : i32
    %c0_i32_0 = arith.constant 0 : i32
    %c0_i32_1 = arith.constant 0 : i32
    %c0_i32_2 = arith.constant 0 : i32
    return %c0_i32, %c0_i32_0, %c0_i32_1 : i32, i32, i32
  }
}

module attributes {stable_mosaic.version = 11 : i64} {
  func.func @_head_kernel(%arg0: i32, %arg1: memref<2x8x64xf32, #tpu.memory_space<vmem>>, %arg2: memref<2x8x64xf32, #tpu.memory_space<vmem>>, %arg3: memref<2x8xf32, #tpu.memory_space<vmem>>, %arg4: memref<2x8xf32, #tpu.memory_space<vmem>>, %arg5: memref<256x32xf32, #tpu.memory_space<vmem>>, %arg6: memref<1x32xf32, #tpu.memory_space<vmem>>, %arg7: memref<32x2xf32, #tpu.memory_space<vmem>>, %arg8: memref<1x2xf32, #tpu.memory_space<vmem>>, %arg9: memref<2x2xf32, #tpu.memory_space<vmem>>, %arg10: memref<2x2xf32, #tpu.memory_space<vmem>>) attributes {dimension_semantics = [#tpu.dimension_semantics<arbitrary>], iteration_bounds = array<i64: 1>, scalar_prefetch = 0 : i64, scratch_operands = 0 : i64, tpu.core_type = #tpu.core_type<tc>, window_params = [{pipeline_mode = #tpu.pipeline_mode<synchronous>, transform_indices = @transform_0, window_bounds = array<i64: 2, 8, 64>}, {pipeline_mode = #tpu.pipeline_mode<synchronous>, transform_indices = @transform_1, window_bounds = array<i64: 2, 8, 64>}, {pipeline_mode = #tpu.pipeline_mode<synchronous>, transform_indices = @transform_2, window_bounds = array<i64: 2, 8>}, {pipeline_mode = #tpu.pipeline_mode<synchronous>, transform_indices = @transform_3, window_bounds = array<i64: 2, 8>}, {pipeline_mode = #tpu.pipeline_mode<synchronous>, transform_indices = @transform_4, window_bounds = array<i64: 256, 32>}, {pipeline_mode = #tpu.pipeline_mode<synchronous>, transform_indices = @transform_5, window_bounds = array<i64: 1, 32>}, {pipeline_mode = #tpu.pipeline_mode<synchronous>, transform_indices = @transform_6, window_bounds = array<i64: 32, 2>}, {pipeline_mode = #tpu.pipeline_mode<synchronous>, transform_indices = @transform_7, window_bounds = array<i64: 1, 2>}, {pipeline_mode = #tpu.pipeline_mode<synchronous>, transform_indices = @transform_8, window_bounds = array<i64: 2, 2>}, {pipeline_mode = #tpu.pipeline_mode<synchronous>, transform_indices = @transform_9, window_bounds = array<i64: 2, 2>}]} {
    %c0 = arith.constant 0 : index
    %c0_0 = arith.constant 0 : index
    %c0_1 = arith.constant 0 : index
    %0 = vector.load %arg1[%c0, %c0_0, %c0_1] : memref<2x8x64xf32, #tpu.memory_space<vmem>>, vector<2x8x64xf32>
    %c0_2 = arith.constant 0 : index
    %c0_3 = arith.constant 0 : index
    %1 = vector.load %arg3[%c0_2, %c0_3] : memref<2x8xf32, #tpu.memory_space<vmem>>, vector<2x8xf32>
    %2 = vector.shape_cast %1 : vector<2x8xf32> to vector<2x8x1xf32>
    %cst = arith.constant dense<0.000000e+00> : vector<2xf32>
    %3 = vector.multi_reduction <add>, %1, %cst [1] : vector<2x8xf32> to vector<2xf32>
    %4 = vector.shape_cast %3 : vector<2xf32> to vector<2x1xf32>
    %cst_4 = arith.constant 9.99999982E-14 : f32
    %5 = vector.broadcast %cst_4 : f32 to vector<2x1xf32>
    %6 = arith.maximumf %4, %5 : vector<2x1xf32>
    %7 = vector.broadcast %2 : vector<2x8x1xf32> to vector<2x8x64xf32>
    %8 = arith.mulf %0, %7 : vector<2x8x64xf32>
    %cst_5 = arith.constant dense<0.000000e+00> : vector<2x64xf32>
    %9 = vector.multi_reduction <add>, %8, %cst_5 [1] : vector<2x8x64xf32> to vector<2x64xf32>
    %10 = vector.broadcast %6 : vector<2x1xf32> to vector<2x64xf32>
    %11 = arith.divf %9, %10 : vector<2x64xf32>
    %12 = vector.broadcast %2 : vector<2x8x1xf32> to vector<2x8x64xf32>
    %13 = arith.mulf %0, %12 : vector<2x8x64xf32>
    %cst_6 = arith.constant 1.000000e+00 : f32
    %14 = vector.broadcast %cst_6 : f32 to vector<2x8x1xf32>
    %15 = arith.subf %14, %2 : vector<2x8x1xf32>
    %cst_7 = arith.constant -1.000000e+07 : f32
    %16 = vector.broadcast %cst_7 : f32 to vector<2x8x1xf32>
    %17 = arith.mulf %16, %15 : vector<2x8x1xf32>
    %18 = vector.broadcast %17 : vector<2x8x1xf32> to vector<2x8x64xf32>
    %19 = arith.addf %13, %18 : vector<2x8x64xf32>
    %cst_8 = arith.constant dense<0xFF800000> : vector<2x64xf32>
    %20 = vector.multi_reduction <maximumf>, %19, %cst_8 [1] : vector<2x8x64xf32> to vector<2x64xf32>
    %c0_9 = arith.constant 0 : index
    %c0_10 = arith.constant 0 : index
    %c0_11 = arith.constant 0 : index
    %21 = vector.load %arg2[%c0_9, %c0_10, %c0_11] : memref<2x8x64xf32, #tpu.memory_space<vmem>>, vector<2x8x64xf32>
    %c0_12 = arith.constant 0 : index
    %c0_13 = arith.constant 0 : index
    %22 = vector.load %arg4[%c0_12, %c0_13] : memref<2x8xf32, #tpu.memory_space<vmem>>, vector<2x8xf32>
    %23 = vector.shape_cast %22 : vector<2x8xf32> to vector<2x8x1xf32>
    %cst_14 = arith.constant dense<0.000000e+00> : vector<2xf32>
    %24 = vector.multi_reduction <add>, %22, %cst_14 [1] : vector<2x8xf32> to vector<2xf32>
    %25 = vector.shape_cast %24 : vector<2xf32> to vector<2x1xf32>
    %cst_15 = arith.constant 9.99999982E-14 : f32
    %26 = vector.broadcast %cst_15 : f32 to vector<2x1xf32>
    %27 = arith.maximumf %25, %26 : vector<2x1xf32>
    %28 = vector.broadcast %23 : vector<2x8x1xf32> to vector<2x8x64xf32>
    %29 = arith.mulf %21, %28 : vector<2x8x64xf32>
    %cst_16 = arith.constant dense<0.000000e+00> : vector<2x64xf32>
    %30 = vector.multi_reduction <add>, %29, %cst_16 [1] : vector<2x8x64xf32> to vector<2x64xf32>
    %31 = vector.broadcast %27 : vector<2x1xf32> to vector<2x64xf32>
    %32 = arith.divf %30, %31 : vector<2x64xf32>
    %33 = vector.broadcast %23 : vector<2x8x1xf32> to vector<2x8x64xf32>
    %34 = arith.mulf %21, %33 : vector<2x8x64xf32>
    %cst_17 = arith.constant 1.000000e+00 : f32
    %35 = vector.broadcast %cst_17 : f32 to vector<2x8x1xf32>
    %36 = arith.subf %35, %23 : vector<2x8x1xf32>
    %cst_18 = arith.constant -1.000000e+07 : f32
    %37 = vector.broadcast %cst_18 : f32 to vector<2x8x1xf32>
    %38 = arith.mulf %37, %36 : vector<2x8x1xf32>
    %39 = vector.broadcast %38 : vector<2x8x1xf32> to vector<2x8x64xf32>
    %40 = arith.addf %34, %39 : vector<2x8x64xf32>
    %cst_19 = arith.constant dense<0xFF800000> : vector<2x64xf32>
    %41 = vector.multi_reduction <maximumf>, %40, %cst_19 [1] : vector<2x8x64xf32> to vector<2x64xf32>
    %42 = tpu.concatenate %11, %20, %32, %41 in 1 : vector<2x64xf32>, vector<2x64xf32>, vector<2x64xf32>, vector<2x64xf32> -> vector<2x256xf32>
    %c0_20 = arith.constant 0 : index
    %c0_21 = arith.constant 0 : index
    %43 = vector.load %arg5[%c0_20, %c0_21] : memref<256x32xf32, #tpu.memory_space<vmem>>, vector<256x32xf32>
    %cst_22 = arith.constant dense<0.000000e+00> : vector<2x32xf32>
    %44 = tpu.matmul %42, %43, %cst_22 {dimension_numbers = #tpu.dot_dimension_numbers<[1], [0], [0], [1], [0, 0, 1, 1], [], []>} : vector<2x256xf32>, vector<256x32xf32>, vector<2x32xf32> -> vector<2x32xf32>
    %c0_23 = arith.constant 0 : index
    %c0_24 = arith.constant 0 : index
    %45 = vector.load %arg6[%c0_23, %c0_24] : memref<1x32xf32, #tpu.memory_space<vmem>>, vector<1x32xf32>
    %46 = vector.broadcast %45 : vector<1x32xf32> to vector<2x32xf32>
    %47 = arith.addf %44, %46 : vector<2x32xf32>
    %48 = math.tanh %47 : vector<2x32xf32>
    %c0_25 = arith.constant 0 : index
    %c0_26 = arith.constant 0 : index
    %49 = vector.load %arg7[%c0_25, %c0_26] : memref<32x2xf32, #tpu.memory_space<vmem>>, vector<32x2xf32>
    %cst_27 = arith.constant dense<0.000000e+00> : vector<2x2xf32>
    %50 = tpu.matmul %48, %49, %cst_27 {dimension_numbers = #tpu.dot_dimension_numbers<[1], [0], [0], [1], [0, 0, 1, 1], [], []>} : vector<2x32xf32>, vector<32x2xf32>, vector<2x2xf32> -> vector<2x2xf32>
    %c0_28 = arith.constant 0 : index
    %c0_29 = arith.constant 0 : index
    %51 = vector.load %arg8[%c0_28, %c0_29] : memref<1x2xf32, #tpu.memory_space<vmem>>, vector<1x2xf32>
    %52 = vector.broadcast %51 : vector<1x2xf32> to vector<2x2xf32>
    %53 = arith.addf %50, %52 : vector<2x2xf32>
    %c0_30 = arith.constant 0 : index
    %c0_31 = arith.constant 0 : index
    %54 = vector.load %arg9[%c0_30, %c0_31] : memref<2x2xf32, #tpu.memory_space<vmem>>, vector<2x2xf32>
    tpu.vector_store %arg9[%c0_30, %c0_31], %53 {strides = array<i32>} : memref<2x2xf32, #tpu.memory_space<vmem>>, vector<2x2xf32>,
    %cst_32 = arith.constant dense<0xFF800000> : vector<2xf32>
    %55 = vector.multi_reduction <maximumf>, %53, %cst_32 [1] : vector<2x2xf32> to vector<2xf32>
    %cst_33 = arith.constant 0xFF800000 : f32
    %56 = vector.broadcast %cst_33 : f32 to vector<2xf32>
    %57 = arith.maximumf %56, %55 : vector<2xf32>
    %58 = vector.shape_cast %57 : vector<2xf32> to vector<2x1xf32>
    %59 = vector.broadcast %58 : vector<2x1xf32> to vector<2x2xf32>
    %60 = arith.subf %53, %59 : vector<2x2xf32>
    %61 = math.exp %60 : vector<2x2xf32>
    %cst_34 = arith.constant dense<0.000000e+00> : vector<2xf32>
    %62 = vector.multi_reduction <add>, %61, %cst_34 [1] : vector<2x2xf32> to vector<2xf32>
    %63 = vector.shape_cast %62 : vector<2xf32> to vector<2x1xf32>
    %64 = vector.broadcast %63 : vector<2x1xf32> to vector<2x2xf32>
    %65 = arith.divf %61, %64 : vector<2x2xf32>
    %c0_35 = arith.constant 0 : index
    %c0_36 = arith.constant 0 : index
    %66 = vector.load %arg10[%c0_35, %c0_36] : memref<2x2xf32, #tpu.memory_space<vmem>>, vector<2x2xf32>
    tpu.vector_store %arg10[%c0_35, %c0_36], %65 {strides = array<i32>} : memref<2x2xf32, #tpu.memory_space<vmem>>, vector<2x2xf32>,
    return
  }
  func.func @transform_0(%arg0: i32) -> (i32, i32, i32) {
    %c0_i32 = arith.constant 0 : i32
    %c0_i32_0 = arith.constant 0 : i32
    %c0_i32_1 = arith.constant 0 : i32
    %c0_i32_2 = arith.constant 0 : i32
    return %c0_i32, %c0_i32_0, %c0_i32_1 : i32, i32, i32
  }
  func.func @transform_1(%arg0: i32) -> (i32, i32, i32) {
    %c0_i32 = arith.constant 0 : i32
    %c0_i32_0 = arith.constant 0 : i32
    %c0_i32_1 = arith.constant 0 : i32
    %c0_i32_2 = arith.constant 0 : i32
    return %c0_i32, %c0_i32_0, %c0_i32_1 : i32, i32, i32
  }
  func.func @transform_2(%arg0: i32) -> (i32, i32) {
    %c0_i32 = arith.constant 0 : i32
    %c0_i32_0 = arith.constant 0 : i32
    %c0_i32_1 = arith.constant 0 : i32
    return %c0_i32, %c0_i32_0 : i32, i32
  }
  func.func @transform_3(%arg0: i32) -> (i32, i32) {
    %c0_i32 = arith.constant 0 : i32
    %c0_i32_0 = arith.constant 0 : i32
    %c0_i32_1 = arith.constant 0 : i32
    return %c0_i32, %c0_i32_0 : i32, i32
  }
  func.func @transform_4(%arg0: i32) -> (i32, i32) {
    %c0_i32 = arith.constant 0 : i32
    %c0_i32_0 = arith.constant 0 : i32
    %c0_i32_1 = arith.constant 0 : i32
    return %c0_i32, %c0_i32_0 : i32, i32
  }
  func.func @transform_5(%arg0: i32) -> (i32, i32) {
    %c0_i32 = arith.constant 0 : i32
    %c0_i32_0 = arith.constant 0 : i32
    %c0_i32_1 = arith.constant 0 : i32
    return %c0_i32, %c0_i32_0 : i32, i32
  }
  func.func @transform_6(%arg0: i32) -> (i32, i32) {
    %c0_i32 = arith.constant 0 : i32
    %c0_i32_0 = arith.constant 0 : i32
    %c0_i32_1 = arith.constant 0 : i32
    return %c0_i32, %c0_i32_0 : i32, i32
  }
  func.func @transform_7(%arg0: i32) -> (i32, i32) {
    %c0_i32 = arith.constant 0 : i32
    %c0_i32_0 = arith.constant 0 : i32
    %c0_i32_1 = arith.constant 0 : i32
    return %c0_i32, %c0_i32_0 : i32, i32
  }
  func.func @transform_8(%arg0: i32) -> (i32, i32) {
    %c0_i32 = arith.constant 0 : i32
    %c0_i32_0 = arith.constant 0 : i32
    %c0_i32_1 = arith.constant 0 : i32
    return %c0_i32, %c0_i32_0 : i32, i32
  }
  func.func @transform_9(%arg0: i32) -> (i32, i32) {
    %c0_i32 = arith.constant 0 : i32
    %c0_i32_0 = arith.constant 0 : i32
    %c0_i32_1 = arith.constant 0 : i32
    return %c0_i32, %c0_i32_0 : i32, i32
  }
}

</mosaic_0001>

<bundles_post_ra>
// kernel: esim_forward.6
= control target key start
LH: loop header
LB: loop body
LE: loop exit
PB: predicated region body
PF: predicated region fallthrough
CT: control target
= control target key end

     0   :  { %vm32_vm0 = vcmask 261120   ;;  %s222_s1 = inlined_call_operand.vmem [shape: f32[32,256], index: 1, kind: input, shape index: {}]   ;;  %s223_s0 = inlined_call_operand.vmem [shape: f32[32,32], index: 0, kind: input, shape index: {}]   ;;  %s224_s2 = inlined_call_operand.vmem [shape: f32[1,256], index: 2, kind: input, shape index: {}]   ;;  %s225_s3 = inlined_call_operand.vmem [shape: f32[32,256], index: 3, kind: output, shape index: {}]  }
   0x1   :  { %v24_v0 = vld [vmem:[%s222_s1 + $0x30] sm:$0xff]  ;;  %v25_v1 = vld [vmem:[%s222_s1 + $0x38] sm:$0xff]  ;;  %v22_v2 = vld [vmem:[%s222_s1 + $0x20] sm:$0xff] }
   0x2   :  { %123 = vmatpush.msra.mxu2 %v24_v0  ;;  %127 = vmatpush.msra.mxu3 %v25_v1  ;;  %v23_v3 = vld [vmem:[%s222_s1 + $0x28] sm:$0xff]  ;;  %v20_v4 = vld [vmem:[%s222_s1 + $0x10] sm:$0xff]  ;;  %v21_v5 = vld [vmem:[%s222_s1 + $0x18] sm:$0xff] }
   0x3   :  { %57 = vmatpush.msra.mxu0 %v24_v0  ;;  %86 = vmatpush.msra.mxu1 %v25_v1  ;;  %v18_v6 = vld [vmem:[%s222_s1] sm:$0xff]  ;;  %v19_v7 = vld [vmem:[%s222_s1 + $0x8] sm:$0xff]  ;;  %v16_v8 = vld [vmem:[%s223_s0 + $0x10] sm:$0xff] }
   0x4   :  { %124 = vmatpush.msra.mxu2 %v22_v2  ;;  %128 = vmatpush.msra.mxu3 %v23_v3  ;;  %v14_v9 = vld [vmem:[%s223_s0] sm:$0xff]  ;;  %v17_v10 = vld [vmem:[%s223_s0 + $0x18] sm:$0xff]  ;;  %v15_v11 = vld [vmem:[%s223_s0 + $0x8] sm:$0xff] }
   0x5   :  { %58 = vmatpush.msra.mxu0 %v22_v2  ;;  %87 = vmatpush.msra.mxu1 %v23_v3  ;;  %v26_v12 = vld [vmem:[%s224_s2] sm:$0x3] }
   0x6   :  { %125 = vmatpush.msra.mxu2 %v20_v4  ;;  %129 = vmatpush.msra.mxu3 %v21_v5  ;;  %v28_v13 = vperm.slane %v26_v12, 0  ;;  %v29_v14 = vperm.slane %v26_v12, 1 }
   0x7   :  { %59 = vmatpush.msra.mxu0 %v20_v4  ;;  %88 = vmatpush.msra.mxu1 %v21_v5 }
   0x8   :  { %126 = vmatpush.msra.mxu2 %v18_v6  ;;  %130 = vmatpush.msra.mxu3 %v19_v7 }
   0x9   :  { %117 = vmatmul.msk.f32.vlgmr.msra.gmra.mxu2 %vm32_vm0, %v16_v8  ;;  %121 = vmatmul.msk.f32.vlgmr.msra.gmra.mxu3 %vm32_vm0, %v16_v8 }
   0xa   :  { %60 = vmatpush.msra.mxu0 %v18_v6  ;;  %89 = vmatpush.msra.mxu1 %v19_v7 }
   0xb   :  { %115 = vmatmul.msk.f32.vlgmr.msra.gmra.mxu0 %vm32_vm0, %v14_v9  ;;  %119 = vmatmul.msk.f32.vlgmr.msra.gmra.mxu1 %vm32_vm0, %v14_v9 }
  0x11   :  { %118 = vmatmul.msk.f32.gmra.mxu2 %vm32_vm0, %v17_v10  ;;  %122 = vmatmul.msk.f32.gmra.mxu3 %vm32_vm0, %v17_v10 }
  0x13   :  { %116 = vmatmul.msk.f32.gmra.mxu0 %vm32_vm0, %v15_v11  ;;  %120 = vmatmul.msk.f32.gmra.mxu1 %vm32_vm0, %v15_v11 }
  0x88   :  { %v62_v15 = vpop.f32.mrf.mxu0  ;;  %v91_v16 = vpop.f32.mrf.mxu1 }
  0x89   :  { %v63_v17 = vadd.f32 %v62_v15, %v28_v13  ;;  %v92_v18 = vadd.f32 %v91_v16, %v29_v14 }
  0x8b   :  { %103 = vst [vmem:[%s225_s3] sm:$0xff] %v63_v17 }
  0x8c   :  { %v68_v19 = vpop.f32.mrf.mxu2  ;;  %104 = vst [vmem:[%s225_s3 + $0x8] sm:$0xff] %v92_v18  ;;  %v97_v20 = vpop.f32.mrf.mxu3 }
  0x8d   :  { %v69_v21 = vadd.f32 %v68_v19, %v28_v13  ;;  %v98_v22 = vadd.f32 %v97_v20, %v29_v14 }
  0x8f   :  { %107 = vst [vmem:[%s225_s3 + $0x20] sm:$0xff] %v69_v21 }
  0x90   :  { %108 = vst [vmem:[%s225_s3 + $0x28] sm:$0xff] %v98_v22  ;;  %v65_v23 = vpop.f32.mrf.mxu0  ;;  %v94_v24 = vpop.f32.mrf.mxu1 }
  0x91   :  { %v66_v25 = vadd.f32 %v65_v23, %v28_v13  ;;  %v95_v26 = vadd.f32 %v94_v24, %v29_v14 }
  0x93   :  { %105 = vst [vmem:[%s225_s3 + $0x10] sm:$0xff] %v66_v25 }
  0x94   :  { %v71_v27 = vpop.f32.mrf.mxu2  ;;  %106 = vst [vmem:[%s225_s3 + $0x18] sm:$0xff] %v95_v26  ;;  %v100_v28 = vpop.f32.mrf.mxu3 }
  0x95   :  { %v72_v29 = vadd.f32 %v71_v27, %v28_v13  ;;  %v101_v30 = vadd.f32 %v100_v28, %v29_v14 }
  0x97   :  { %109 = vst [vmem:[%s225_s3 + $0x30] sm:$0xff] %v72_v29 }
  0x98   :  { %110 = vst [vmem:[%s225_s3 + $0x38] sm:$0xff] %v101_v30 }

// kernel: esim_forward.11
= control target key start
LH: loop header
LB: loop body
LE: loop exit
PB: predicated region body
PF: predicated region fallthrough
CT: control target
= control target key end

     0   :  { %15 = vsyncpa [#allocation3], 0  ;;  %vm50_vm0 = vcmask 58368   ;;  %v37_v1 = vlaneseq  ;;  %s825_s0 = inlined_call_operand.vmem [shape: f32[2,8,64], index: 0, kind: input, shape index: {}]   ;;  %s826_s1 = inlined_call_operand.vmem [shape: f32[2,8,64], index: 1, kind: input, shape index: {}]   ;;  %s827_s2 = inlined_call_operand.vmem [shape: f32[2,8], index: 2, kind: input, shape index: {}]   ;;  %s828_s3 = inlined_call_operand.vmem [shape: f32[2,8], index: 3, kind: input, shape index: {}]   ;;  %s829_s4 = inlined_call_operand.vmem [shape: f32[256,32], index: 4, kind: input, shape index: {}]   ;;  %s830_s5 = inlined_call_operand.vmem [shape: f32[1,32], index: 5, kind: input, shape index: {}]   ;;  %s831_s6 = inlined_call_operand.vmem [shape: f32[32,2], index: 6, kind: input, shape index: {}]   ;;  %s832_s7 = inlined_call_operand.vmem [shape: f32[1,2], index: 7, kind: input, shape index: {}]   ;;  %s833_s8 = inlined_call_operand.hbm [shape: f32[2,2], index: 8, kind: output, shape index: {0}]   ;;  %s834_s9 = inlined_call_operand.hbm [shape: f32[2,2], index: 9, kind: output, shape index: {1}]  }
   0x1   :  { %v35_v0 = vld [vmem:[%s827_s2] sm:$0x3] }
   0x2   :  { %v51_v2 = vsel %vm50_vm0, %v35_v0, 0.0  ;;  %v38_v3 = vshrl.u32 %v37_v1, 7 }
   0x3   :  { %52 = vadd.xlane.f32.xlu2 %v51_v2 }
   0x4   :  { %16 = vsyncpa [#allocation5], 0  ;;  %415 = vset.pattern.permute.xlu1 %v38_v3  ;;  %414 = vset.pattern.permute.xlu0 %v38_v3  ;;  %v128_v4 = vld [vmem:[%s828_s3] sm:$0x3]  ;;  %v36_v7 = vperm.slane %v35_v0, 0  ;;  %v43_v9 = vperm.slane %v35_v0, 1 }
   0x5   :  { %v143_v5 = vsel %vm50_vm0, %v128_v4, 0.0  ;;  %v129_v6 = vperm.slane %v128_v4, 0  ;;  %v136_v8 = vperm.slane %v128_v4, 1  ;;  %v126_v13 = vld [vmem:[%s826_s1] sm:$0xff]  ;;  %vm57_vm1 = vcmask 523264   ;;  %v257_v23 = vld [vmem:[%s829_s4 + $0x78] sm:$0xff] }
   0x6   :  { %v33_v14 = vld [vmem:[%s825_s0] sm:$0xff]  ;;  %v273_v24 = vld [vmem:[%s829_s4 + $0xf8] sm:$0xff]  ;;  %v256_v25 = vld [vmem:[%s829_s4 + $0x70] sm:$0xff]  ;;  %278 = vmatpush.msra.mxu0 %v257_v23  ;;  %vm220_vm9 = vcmask 1041409   ;;  %s489_s25 = smov 64   ;;  %s490_s20 = smov [#allocation2]  }
   0x7   :  { %298 = vmatpush.msra.mxu1 %v273_v24  ;;  %v272_v30 = vld [vmem:[%s829_s4 + $0xf0] sm:$0xff]  ;;  %v255_v37 = vld [vmem:[%s829_s4 + $0x68] sm:$0xff]  ;;  %v254_v44 = vld [vmem:[%s829_s4 + $0x60] sm:$0xff]  ;;  %s383_s21 = sshll.u32 %s490_s20, 4  ;;  %s491_s22 = smov [#allocation4]   ;;  %s384_s21 = int_to_ptr.vmem [resolvable:$true] %s383_s21 }
   0x8   :  { %v271_v38 = vld [vmem:[%s829_s4 + $0xe8] sm:$0xff]  ;;  %279 = vmatpush.msra.mxu0 %v256_v25  ;;  %v270_v45 = vld [vmem:[%s829_s4 + $0xe0] sm:$0xff]  ;;  %v253_v55 = vld [vmem:[%s829_s4 + $0x58] sm:$0xff] }
   0x9   :  { %299 = vmatpush.msra.mxu1 %v272_v30  ;;  %v127_v51 = vld [vmem:[%s826_s1 + $0x8] sm:$0xff]  ;;  %v269_v62 = vld [vmem:[%s829_s4 + $0xd8] sm:$0xff]  ;;  %v252_v3 = vld [vmem:[%s829_s4 + $0x50] sm:$0xff] }
   0xa   :  { %280 = vmatpush.msra.mxu0 %v255_v37  ;;  %v34_v54 = vld [vmem:[%s825_s0 + $0x8] sm:$0xff] }
   0xb   :  { %144 = vadd.xlane.f32.xlu2 %v143_v5  ;;  %300 = vmatpush.msra.mxu1 %v271_v38  ;;  %v266_v38 = vld [vmem:[%s829_s4 + $0xc0] sm:$0xff] }
   0xc   :  { %134 = vperm.xlu1 %415, %v129_v6   ;;  %41 = vperm.xlu0 %414, %v36_v7  }
   0xd   :  { %281 = vmatpush.msra.mxu0 %v254_v44  ;;  %301 = vmatpush.msra.mxu1 %v270_v45 }
   0xf   :  { %282 = vmatpush.msra.mxu0 %v253_v55  ;;  %302 = vmatpush.msra.mxu1 %v269_v62  ;;  %v248_v55 = vld [vmem:[%s829_s4 + $0x30] sm:$0xff] }
  0x11   :  { %283 = vmatpush.msra.mxu0 %v252_v3 }
  0x14   :  { %141 = vperm.xlu1 %415, %v136_v8   ;;  %48 = vperm.xlu0 %414, %v43_v9   ;;  %v268_v8 = vld [vmem:[%s829_s4 + $0xd0] sm:$0xff] }
  0x15   :  { %303 = vmatpush.msra.mxu1 %v268_v8 }
  0x76   :  { %v53_v10 = vpop.xlane.xlu2 %52 }
  0x77   :  { %v548_v11 = vmax.f32 %v53_v10, 1e-13 }
  0x79   :  { %v551_v12 = vrot.slane %v548_v11, 1  ;;  %423 = vrcp.f32 %v548_v11  ;;  %v87_v26 = vand.u32 2147483648, %v548_v11  ;;  %v85_v31 = vand.u32 2147483647, %v548_v11 }
  0x7a   :  { %vm81_vm2 = vweird.f32 %v548_v11 }
  0x7b   :  { %425 = vrcp.f32 %v551_v12  ;;  %v102_v32 = vand.u32 2147483648, %v551_v12  ;;  %v607_v46 = vor.u32 1.1754944e-38, %v87_v26  ;;  %v100_v47 = vand.u32 2147483647, %v551_v12 }
  0x7c   :  { %vm96_vm3 = vweird.f32 %v551_v12  ;;  %vm645_vm6 = vcmp.eq.f32.partialorder %v85_v31, 8.507059e+37 }
  0x7d   :  { %v614_v52 = vor.u32 1.1754944e-38, %v102_v32  ;;  %vm654_vm7 = vcmp.eq.f32.partialorder %v100_v47, 8.507059e+37 }
  0x7e   :  { %v145_v15 = vpop.xlane.xlu2 %144  ;;  %v135_v18 = vpop.permute.xlu1 %134 }
  0x7f   :  { %v561_v16 = vpop.eup %423  ;;  %v563_v17 = vmax.f32 %v145_v15, 1e-13  ;;  %v42_v19 = vpop.permute.xlu0 %41  ;;  %v147_v20 = vmul.f32 %v135_v18, %v126_v13  ;;  %v197_v21 = vsub.f32 1.0, %v135_v18  ;;  %v251_v18 = vld [vmem:[%s829_s4 + $0x48] sm:$0xff] }
  0x80   :  { %v55_v22 = vmul.f32 %v42_v19, %v33_v14  ;;  %v106_v29 = vsub.f32 1.0, %v42_v19  ;;  %v587_v33 = vmul.f32 %v561_v16, %v548_v11  ;;  %vm82_vm4 = vweird.f32 %v561_v16  ;;  %284 = vmatpush.msra.mxu0 %v251_v18  ;;  %v262_v18 = vld [vmem:[%s829_s4 + $0xa0] sm:$0xff] }
  0x81   :  { %v575_v27 = vpop.eup %425  ;;  %v578_v28 = vrot.slane %v563_v17, 1  ;;  %v149_v34 = vsel %vm57_vm1, %v147_v20, 0.0  ;;  %v199_v35 = vmul.f32 -10000000.0, %v197_v21  ;;  %427 = vrcp.f32 %v563_v17  ;;  %vm686_vm8 = vmor %vm81_vm2, %vm82_vm4 }
  0x82   :  { %v58_v36 = vsel %vm57_vm1, %v55_v22, 0.0  ;;  %v150_v39 = vrot.slane %v149_v34, 4  ;;  %v108_v41 = vmul.f32 -10000000.0, %v106_v29  ;;  %v92_v42 = vmul.f32 %v575_v27, %v551_v12  ;;  %v247_v12 = vld [vmem:[%s829_s4 + $0x28] sm:$0xff] }
  0x83   :  { %v59_v40 = vrot.slane %v58_v36, 4  ;;  %v201_v43 = vadd.f32 %v199_v35, %v147_v20  ;;  %429 = vrcp.f32 %v578_v28  ;;  %v78_v56 = vsub.f32 1.0, %v587_v33  ;;  %v250_v33 = vld [vmem:[%s829_s4 + $0x40] sm:$0xff] }
  0x84   :  { %v151_v48 = vadd.f32 %v150_v39, %v149_v34  ;;  %v110_v50 = vadd.f32 %v108_v41, %v55_v22  ;;  %v93_v63 = vsub.f32 1.0, %v92_v42  ;;  %vm97_vm5 = vweird.f32 %v575_v27  ;;  %v267_v22 = vld [vmem:[%s829_s4 + $0xc8] sm:$0xff]  ;;  %285 = vmatpush.msra.mxu0 %v250_v33 }
  0x85   :  { %v60_v49 = vadd.f32 %v59_v40, %v58_v36  ;;  %v203_v53 = vsel %vm57_vm1, %v201_v43, -inf  ;;  %v79_v23 = vmul.f32 %v561_v16, %v78_v56  ;;  %304 = vmatpush.msra.mxu1 %v267_v22  ;;  %v249_v43 = vld [vmem:[%s829_s4 + $0x38] sm:$0xff]  ;;  %vm699_vm10 = vmor %vm96_vm3, %vm97_vm5  ;;  %vm172_vm11 = vweird.f32 %v563_v17 }
  0x86   :  { %v204_v57 = vrot.slane %v203_v53, 4  ;;  %v112_v59 = vsel %vm57_vm1, %v110_v50, -inf  ;;  %v142_v60 = vpop.permute.xlu1 %141  ;;  %v152_v4 = vrot.slane %v151_v48, 2  ;;  %v94_v24 = vmul.f32 %v575_v27, %v93_v63  ;;  %286 = vmatpush.msra.mxu0 %v249_v43 }
  0x87   :  { %v61_v58 = vrot.slane %v60_v49, 2  ;;  %v49_v61 = vpop.permute.xlu0 %48  ;;  %v113_v0 = vrot.slane %v112_v59, 4  ;;  %v148_v1 = vmul.f32 %v142_v60, %v127_v51  ;;  %v198_v2 = vsub.f32 1.0, %v142_v60  ;;  %v639_v9 = vpop.eup %427  ;;  %305 = vmatpush.msra.mxu1 %v266_v38  ;;  %v264_v60 = vld [vmem:[%s829_s4 + $0xb0] sm:$0xff] }
  0x88   :  { %v205_v5 = vmax.f32 %v203_v53, %v204_v57  ;;  %v56_v7 = vmul.f32 %v49_v61, %v34_v54  ;;  %v107_v15 = vsub.f32 1.0, %v49_v61  ;;  %v168_v34 = vmul.f32 %v639_v9, %v563_v17  ;;  %287 = vmatpush.msra.mxu0 %v248_v55 }
  0x89   :  { %v634_v6 = vadd.f32 %v61_v58, %v60_v49  ;;  %v114_v10 = vmax.f32 %v112_v59, %v113_v0  ;;  %v156_v13 = vsel %vm57_vm1, %v148_v1, 0.0  ;;  %v200_v14 = vmul.f32 -10000000.0, %v198_v2  ;;  %v658_v26 = vpop.eup %429 }
  0x8a   :  { %v206_v20 = vrot.slane %v205_v5, 2  ;;  %v157_v21 = vrot.slane %v156_v13, 4  ;;  %v65_v31 = vsel %vm57_vm1, %v56_v7, 0.0  ;;  %v109_v32 = vmul.f32 -10000000.0, %v107_v15  ;;  %288 = vmatpush.msra.mxu0 %v247_v12  ;;  %v242_v12 = vld [vmem:[%s829_s4] sm:$0xff] }
  0x8b   :  { %v115_v29 = vrot.slane %v114_v10, 2  ;;  %v202_v30 = vadd.f32 %v200_v14, %v148_v1  ;;  %v666_v35 = vadd.f32 %v152_v4, %v151_v48  ;;  %v63_v39 = vrot.slane %v634_v6, 1  ;;  %v265_v48 = vld [vmem:[%s829_s4 + $0xb8] sm:$0xff]  ;;  %v263_v4 = vld [vmem:[%s829_s4 + $0xa8] sm:$0xff] }
  0x8c   :  { %v207_v36 = vmax.f32 %v205_v5, %v206_v20  ;;  %v158_v37 = vadd.f32 %v157_v21, %v156_v13  ;;  %v66_v41 = vrot.slane %v65_v31, 4  ;;  %v111_v42 = vadd.f32 %v109_v32, %v56_v7  ;;  %306 = vmatpush.msra.mxu1 %v265_v48  ;;  %v245_v21 = vld [vmem:[%s829_s4 + $0x18] sm:$0xff] }
  0x8d   :  { %v210_v40 = vsel %vm57_vm1, %v202_v30, -inf  ;;  %v676_v44 = vmax.f32 %v114_v10, %v115_v29  ;;  %v80_v49 = vadd.f32 %v561_v16, %v79_v23  ;;  %v95_v56 = vadd.f32 %v575_v27, %v94_v24 }
  0x8e   :  { %v159_v45 = vrot.slane %v158_v37, 2  ;;  %v211_v47 = vrot.slane %v210_v40, 4  ;;  %v208_v51 = vrot.slane %v207_v36, 1  ;;  %v67_v53 = vadd.f32 %v66_v41, %v65_v31  ;;  %307 = vmatpush.msra.mxu1 %v264_v60 }
  0x8f   :  { %v119_v54 = vsel %vm57_vm1, %v111_v42, -inf  ;;  %v154_v61 = vrot.slane %v666_v35, 1  ;;  %v84_v63 = vsel %vm686_vm8, %v561_v16, %v80_v49  ;;  %v176_v0 = vand.u32 2147483647, %v563_v17  ;;  %v246_v16 = vld [vmem:[%s829_s4 + $0x20] sm:$0xff] }
  0x90   :  { %v160_v57 = vadd.f32 %v159_v45, %v158_v37  ;;  %v212_v58 = vmax.f32 %v210_v40, %v211_v47  ;;  %v120_v59 = vrot.slane %v119_v54, 4  ;;  %v68_v62 = vrot.slane %v67_v53, 2  ;;  %308 = vmatpush.msra.mxu1 %v263_v4  ;;  %289 = vmatpush.msra.mxu0 %v246_v16  ;;  %v321_v4 = vld [vmem:[%s831_s6 + $0x10] sm:$0xff] }
  0x91   :  { %v64_v1 = vadd.f32 %v63_v39, %v634_v6  ;;  %v99_v5 = vsel %vm699_vm10, %v575_v27, %v95_v56  ;;  %v117_v7 = vrot.slane %v676_v44, 1  ;;  %v209_v10 = vmax.f32 %v207_v36, %v208_v51 }
  0x92   :  { %v213_v2 = vrot.slane %v212_v58, 2  ;;  %v121_v3 = vmax.f32 %v119_v54, %v120_v59  ;;  %v69_v8 = vadd.f32 %v68_v62, %v67_v53  ;;  %v169_v6 = vsub.f32 1.0, %v168_v34  ;;  %309 = vmatpush.msra.mxu1 %v262_v18  ;;  %290 = vmatpush.msra.mxu0 %v245_v21  ;;  %v260_v34 = vld [vmem:[%s829_s4 + $0x90] sm:$0xff]  ;;  %v243_v62 = vld [vmem:[%s829_s4 + $0x8] sm:$0xff] }
  0x93   :  { %v161_v13 = vrot.slane %v160_v57, 1  ;;  %v89_v27 = vsel %vm645_vm6, %v607_v46, %v84_v63  ;;  %v104_v22 = vsel %vm654_vm7, %v614_v52, %v99_v5  ;;  %vm173_vm12 = vweird.f32 %v639_v9  ;;  %v261_v46 = vld [vmem:[%s829_s4 + $0x98] sm:$0xff]  ;;  %v244_v52 = vld [vmem:[%s829_s4 + $0x10] sm:$0xff]  ;;  %v320_v5 = vld [vmem:[%s831_s6 + $0x8] sm:$0xff] }
  0x94   :  { %v214_v14 = vmax.f32 %v212_v58, %v213_v2  ;;  %v122_v15 = vrot.slane %v121_v3, 2  ;;  %v70_v20 = vrot.slane %v69_v8, 1  ;;  %v170_v23 = vmul.f32 %v639_v9, %v169_v6  ;;  %310 = vmatpush.msra.mxu1 %v261_v46  ;;  %vm761_vm15 = vmor %vm172_vm11, %vm173_vm12  ;;  %291 = vmatpush.msra.mxu0 %v244_v52 }
  0x95   :  { %v178_v19 = vand.u32 2147483648, %v563_v17  ;;  %v183_v30 = vmul.f32 %v658_v26, %v578_v28  ;;  %vm187_vm13 = vweird.f32 %v578_v28  ;;  %vm188_vm14 = vweird.f32 %v658_v26 }
  0x96   :  { %v215_v24 = vrot.slane %v214_v14, 1  ;;  %v123_v29 = vmax.f32 %v121_v3, %v122_v15  ;;  %v71_v31 = vadd.f32 %v70_v20, %v69_v8  ;;  %v171_v25 = vadd.f32 %v639_v9, %v170_v23  ;;  %311 = vmatpush.msra.mxu1 %v260_v34  ;;  %vm189_vm2 = vmor %vm187_vm13, %vm188_vm14  ;;  %292 = vmatpush.msra.mxu0 %v243_v62  ;;  %v322_v3 = vld [vmem:[%s831_s6 + $0x18] sm:$0xff]  ;;  %v421_v8 = vld [vmem:[%s830_s5] ss:$0 sm:$0xff] }
  0x97   :  { %v184_v36 = vsub.f32 1.0, %v183_v30  ;;  %v191_v37 = vand.u32 2147483647, %v578_v28  ;;  %v118_v38 = vmax.f32 %v676_v44, %v117_v7  ;;  %v90_v39 = vmul.f32 %v89_v27, %v64_v1  ;;  %343 = vmatpush.msra.mxu2 %v322_v3  ;;  %v319_v7 = vld [vmem:[%s831_s6] sm:$0xff] }
  0x98   :  { %v124_v32 = vrot.slane %v123_v29, 1  ;;  %v216_v33 = vmax.f32 %v214_v14, %v215_v24  ;;  %v105_v40 = vmul.f32 %v104_v22, %v71_v31  ;;  %v193_v42 = vand.u32 2147483648, %v578_v28  ;;  %293 = vmatpush.msra.mxu0 %v242_v12  ;;  %v422_v15 = vld [vmem:[%s832_s7] ss:$0 sm:$0xff]  ;;  %s385_s7 = sshll.u32 %s833_s8, 4  ;;  %s394_s8 = sshll.u32 %s491_s22, 4  ;;  %s386_s7 = int_to_ptr.hbm [resolvable:$true] %s385_s7  ;;  %s395_s8 = int_to_ptr.vmem [resolvable:$true] %s394_s8 }
  0x99   :  { %v162_v43 = vadd.f32 %v161_v13, %v160_v57  ;;  %v185_v44 = vmul.f32 %v658_v26, %v184_v36  ;;  %vm177_vm0 = vcmp.eq.f32.partialorder %v176_v0, 8.507059e+37  ;;  %v179_v49 = vor.u32 1.1754944e-38, %v178_v19  ;;  %344 = vmatpush.msra.mxu2 %v321_v4 }
  0x9a   :  { %v125_v45 = vmax.f32 %v123_v29, %v124_v32  ;;  %v236_v47 = vsel %vm220_vm9, %v216_v33, %v209_v10  ;;  %v219_v48 = vrot.slane %v105_v40, 7  ;;  %v194_v17 = vor.u32 1.1754944e-38, %v193_v42 }
  0x9b   :  { %v175_v51 = vsel %vm761_vm15, %v639_v9, %v171_v25  ;;  %v186_v53 = vadd.f32 %v658_v26, %v185_v44  ;;  %vm192_vm3 = vcmp.eq.f32.partialorder %v191_v37, 8.507059e+37  ;;  %v155_v57 = vadd.f32 %v154_v61, %v666_v35  ;;  %v258_v35 = vld [vmem:[%s829_s4 + $0x80] sm:$0xff]  ;;  %345 = vmatpush.msra.mxu2 %v320_v5 }
  0x9c   :  { %v225_v50 = vsel %vm220_vm9, %v125_v45, %v118_v38  ;;  %v221_v55 = vsel %vm220_vm9, %v219_v48, %v90_v39  ;;  %v180_v11 = vsel %vm177_vm0, %v179_v49, %v175_v51  ;;  %vm351_vm4 = vcmask 9216  }
  0x9d   :  { %v416_v54 = vpack.i.bf16 %v236_v47, %v225_v50  ;;  %v190_v56 = vsel %vm189_vm2, %v658_v26, %v186_v53  ;;  %v181_v59 = vmul.f32 %v180_v11, %v155_v57  ;;  %v259_v26 = vld [vmem:[%s829_s4 + $0x88] sm:$0xff]  ;;  %346 = vmatpush.msra.mxu2 %v319_v7 }
  0x9e   :  { %v195_v28 = vsel %vm192_vm3, %v194_v17, %v190_v56  ;;  %312 = vmatpush.msra.mxu1 %v259_v26 }
  0x9f   :  { %417 = vrot.lane.b32.xlu0 %v416_v54, %s489_s25  ;;  %v196_v58 = vmul.f32 %v195_v28, %v162_v43  ;;  %s396_s25 = sshll.u32 %s834_s9, 4  ;;  %s397_s25 = int_to_ptr.hbm [resolvable:$true] %s396_s25 }
  0xa0   :  { %313 = vmatpush.msra.mxu1 %v258_v35 }
  0xa1   :  { %v231_v60 = vrot.slane %v196_v58, 7 }
  0xa3   :  { %v232_v9 = vsel %vm220_vm9, %v231_v60, %v181_v59 }
 0x111   :  { %v418_v61 = vpop.permute.xlu0 %417 }
 0x112   :  { %v420_v63 = vunpack.i.h.bf16 %v418_v61  ;;  %v419_v0 = vunpack.i.l.bf16 %v418_v61 }
 0x114   :  { %v240_v1 = vsel %vm57_vm1, %v221_v55, %v419_v0  ;;  %v241_v2 = vsel %vm57_vm1, %v232_v9, %v420_v63  ;;  %vm327_vm1 = vcmask 261120  }
 0x115   :  { %294 = vmatmul.f32.vlgmr.msra.gmra.mxu0 %v240_v1  ;;  %314 = vmatmul.f32.vlgmr.msra.gmra.mxu1 %v241_v2 }
 0x192   :  { %v295_v10 = vpop.f32.mrf.mxu0  ;;  %v315_v6 = vpop.f32.mrf.mxu1 }
 0x193   :  { %v296_v16 = vadd.f32 %v421_v8, %v295_v10 }
 0x195   :  { %v316_v13 = vadd.f32 %v315_v6, %v296_v16 }
 0x197   :  { %431 = vtanh.f32 %v316_v13 }
 0x19d   :  { %v432_v14 = vpop.eup %431 }
 0x19e   :  { %410 = vmatmul.msk.f32.vlgmr.msra.gmra.mxu2 %vm327_vm1, %v432_v14 }
 0x221   :  { %v348_v18 = vpop.f32.mrf.mxu2 }
 0x222   :  { %v349_v27 = vadd.f32 %v422_v15, %v348_v18 }
 0x224   :  { %v353_v20 = vsel %vm351_vm4, %v349_v27, -inf  ;;  %352 = vst.msk [vmem:[#allocation2] sm:$0x3] %vm351_vm4, %v349_v27 }
 0x225   :  { %354 = vmax.xlane.f32.xlu1 %v353_v20  ;;  %388 = dma.vmem_to_hbm [thread:$0]  %s384_s21, 32, %s386_s7, [#allocation3]  }
 0x298   :  { %v355_v21 = vpop.xlane.xlu1 %354 }
 0x299   :  { %v356_v22 = vsub.f32 %v349_v27, %v355_v21 }
 0x29b   :  { %v357_v23 = vmul.f32 1.442695, %v356_v22 }
 0x29d   :  { %433 = vpow2.f32 %v357_v23 }
 0x2a3   :  { %v434_v24 = vpop.eup %433 }
 0x2a4   :  { %v359_v29 = vsel %vm351_vm4, %v434_v24, 0.0 }
 0x2a5   :  { %360 = vadd.xlane.f32.xlu2 %v359_v29 }
 0x318   :  { %v361_v46 = vpop.xlane.xlu2 %360 }
 0x319   :  { %435 = vrcp.f32 %v361_v46  ;;  %v373_v52 = vand.u32 2147483648, %v361_v46  ;;  %v371_v32 = vand.u32 2147483647, %v361_v46  ;;  %vm367_vm6 = vweird.f32 %v361_v46 }
 0x31b   :  { %v374_v34 = vor.u32 1.1754944e-38, %v373_v52  ;;  %vm372_vm8 = vcmp.eq.f32.partialorder %v371_v32, 8.507059e+37 }
 0x31f   :  { %v436_v19 = vpop.eup %435 }
 0x320   :  { %v363_v30 = vmul.f32 %v436_v19, %v361_v46  ;;  %vm368_vm5 = vweird.f32 %v436_v19 }
 0x321   :  { %vm369_vm7 = vmor %vm367_vm6, %vm368_vm5 }
 0x322   :  { %v364_v31 = vsub.f32 1.0, %v363_v30 }
 0x324   :  { %v365_v25 = vmul.f32 %v436_v19, %v364_v31 }
 0x326   :  { %v366_v33 = vadd.f32 %v436_v19, %v365_v25 }
 0x328   :  { %v370_v36 = vsel %vm369_vm7, %v436_v19, %v366_v33 }
 0x329   :  { %v375_v37 = vsel %vm372_vm8, %v374_v34, %v370_v36 }
 0x32a   :  { %v376_v38 = vmul.f32 %v434_v24, %v375_v37 }
 0x32c   :  { %377 = vst.msk [vmem:[#allocation4] sm:$0x3] %vm351_vm4, %v376_v38 }
 0x32d   :  { %399 = dma.vmem_to_hbm [thread:$0]  %s395_s8, 32, %s397_s25, [#allocation5]  }
 0x32e   :  { %485 = dma.done.wait [#allocation3], 32  }
 0x32f   :  { %486 = vsyncadd [#allocation3], 4294967264 }
 0x330   :  { %487 = dma.done.wait [#allocation5], 32  }
 0x331   :  { %488 = vsyncadd [#allocation5], 4294967264 }
 0x332   :  { %408 = vsyncpa [#allocation3], 1 }
 0x333   :  { %409 = vsyncpa [#allocation5], 1 }

// kernel: esim_forward.8
= control target key start
LH: loop header
LB: loop body
LE: loop exit
PB: predicated region body
PF: predicated region fallthrough
CT: control target
= control target key end

     0   :  { %vm31_vm0 = vcmask 523264   ;;  %vm92_vm1 = vcmask 64512   ;;  %v316_v60 = vlaneseq  ;;  %s908_s1 = inlined_call_operand.vmem [shape: f32[2,8,64], index: 1, kind: input, shape index: {}]   ;;  %s909_s0 = inlined_call_operand.vmem [shape: f32[2,8,64], index: 0, kind: input, shape index: {}]   ;;  %s910_s3 = inlined_call_operand.vmem [shape: f32[2,8], index: 3, kind: input, shape index: {}]   ;;  %s911_s2 = inlined_call_operand.vmem [shape: f32[2,8], index: 2, kind: input, shape index: {}]   ;;  %s912_s4 = inlined_call_operand.vmem [shape: f32[256,32], index: 4, kind: input, shape index: {}]   ;;  %s913_s5 = inlined_call_operand.vmem [shape: f32[1,32], index: 5, kind: input, shape index: {}]   ;;  %s914_s6 = inlined_call_operand.vmem [shape: f32[2,8,32], index: 6, kind: output, shape index: {0}]   ;;  %s915_s7 = inlined_call_operand.vmem [shape: f32[2,8,32], index: 7, kind: output, shape index: {1}]  }
   0x1   :  { %v680_v0 = vld [vmem:[%s908_s1] sm:$0xff]  ;;  %v685_v1 = vld [vmem:[%s908_s1 + $0x8] sm:$0xff] }
   0x2   :  { %586 = vmatpush.xpose.msk.msra.mxu0 %vm31_vm0, %v680_v0  ;;  %v692_v2 = vld [vmem:[%s909_s0] sm:$0xff]  ;;  %588 = vmatpush.xpose.msk.msra.mxu1 %vm31_vm0, %v685_v1  ;;  %v699_v3 = vld [vmem:[%s909_s0 + $0x8] sm:$0xff]  ;;  %v317_v63 = vshrl.u32 %v316_v60, 7  ;;  %s636_s0 = smov 64  }
   0x3   :  { %287 = vmatpush.msra.mxu2 %v680_v0  ;;  %310 = vmatpush.msra.mxu3 %v685_v1  ;;  %v712_v4 = vld [vmem:[%s910_s3] sm:$0x3] }
   0x4   :  { %v715_v5 = vperm.slane %v712_v4, 0  ;;  %v85_v6 = vrot.slane %v712_v4, 1  ;;  %v727_v26 = vld [vmem:[%s911_s2] sm:$0x3]  ;;  %597 = vset.pattern.permute.xlu1 %v317_v63  ;;  %596 = vset.pattern.permute.xlu2 %v317_v63 }
   0x5   :  { %349 = vmatpush.msrb.mxu2 %v692_v2  ;;  %372 = vmatpush.msrb.mxu3 %v699_v3  ;;  %v730_v27 = vperm.slane %v727_v26, 0  ;;  %v210_v30 = vrot.slane %v727_v26, 1 }
   0x6   :  { %587 = vmatmul.msk.f32.vlgmr.msra.gmra.mxu0 %vm31_vm0, %v692_v2  ;;  %589 = vmatmul.msk.f32.vlgmr.msra.gmra.mxu1 %vm31_vm0, %v699_v3  ;;  %v87_v9 = vperm.slane %v85_v6, 0 }
   0x7   :  { %v212_v32 = vperm.slane %v210_v30, 0  ;;  %v424_v30 = vld [vmem:[%s912_s4 + $0xf8] sm:$0xff] }
   0x8   :  { %476 = vmatpush.msrb.mxu1 %v424_v30 }
  0x83   :  { %v55_v7 = vpop.f32.mrf.mxu0  ;;  %v81_v10 = vpop.f32.mrf.mxu1 }
  0x84   :  { %145 = vxpose.xlu0.b32.start.end [1/1] (short) (narrow) %v55_v7, 8  ;;  %v90_v8 = vmul.f32 %v715_v5, %v55_v7  ;;  %v91_v12 = vmul.f32 %v87_v9, %v81_v10 }
  0x86   :  { %v93_v11 = vsel %vm92_vm1, %v90_v8, -inf  ;;  %v96_v13 = vsel %vm92_vm1, %v91_v12, -inf }
  0x87   :  { %94 = vmax.xlane.f32.xlu1 %v93_v11 }
  0x8c   :  { %177 = vxpose.xlu0.b32.start.end [1/1] (short) (narrow) %v81_v10, 8 }
  0x8f   :  { %97 = vmax.xlane.f32.xlu1 %v96_v13 }
  0xf3   :  { %618 = vset.pattern.permute.xlu0 %v317_v63  ;;  %v416_v63 = vld [vmem:[%s912_s4 + $0xb8] sm:$0xff] }
  0xfa   :  { %v95_v14 = vpop.xlane.xlu1 %94 }
  0xfb   :  { %v99_v15 = vsub.f32 %v90_v8, %v95_v14 }
  0xfd   :  { %v101_v16 = vmul.f32 1.442695, %v99_v15 }
  0xff   :  { %620 = vpow2.f32 %v101_v16 }
 0x102   :  { %v98_v17 = vpop.xlane.xlu1 %97 }
 0x103   :  { %v100_v18 = vsub.f32 %v91_v12, %v98_v17 }
 0x105   :  { %v621_v19 = vpop.eup %620  ;;  %v103_v20 = vmul.f32 1.442695, %v100_v18  ;;  %v384_v18 = vperm.slane %v712_v4, 1 }
 0x106   :  { %v105_v21 = vmul.f32 %v621_v19, %v715_v5  ;;  %v322_v19 = vperm.slane %v727_v26, 1  ;;  %v408_v26 = vld [vmem:[%s912_s4 + $0x78] sm:$0xff] }
 0x107   :  { %622 = vpow2.f32 %v103_v20  ;;  %453 = vmatpush.msrb.mxu0 %v408_v26 }
 0x108   :  { %v107_v22 = vsel %vm92_vm1, %v105_v21, 0.0 }
 0x109   :  { %108 = vadd.xlane.f32.xlu0 %v107_v22 }
 0x10d   :  { %v623_v23 = vpop.eup %622 }
 0x10e   :  { %v106_v24 = vmul.f32 %v623_v23, %v87_v9 }
 0x110   :  { %v110_v25 = vsel %vm92_vm1, %v106_v24, 0.0 }
 0x111   :  { %111 = vadd.xlane.f32.xlu1 %v110_v25 }
 0x128   :  { %v161_v28 = vpop.trf.xlu0 }
 0x129   :  { %v215_v29 = vmul.f32 %v730_v27, %v161_v28 }
 0x12b   :  { %v217_v31 = vsel %vm92_vm1, %v215_v29, -inf }
 0x12c   :  { %218 = vmax.xlane.f32.xlu2 %v217_v31  ;;  %v407_v31 = vld [vmem:[%s912_s4 + $0x70] sm:$0xff] }
 0x12d   :  { %454 = vmatpush.msrb.mxu0 %v407_v31 }
 0x130   :  { %v193_v33 = vpop.trf.xlu0 }
 0x131   :  { %v216_v34 = vmul.f32 %v212_v32, %v193_v33  ;;  %v423_v33 = vld [vmem:[%s912_s4 + $0xf0] sm:$0xff] }
 0x132   :  { %477 = vmatpush.msrb.mxu1 %v423_v33 }
 0x133   :  { %v220_v35 = vsel %vm92_vm1, %v216_v34, -inf }
 0x134   :  { %221 = vmax.xlane.f32.xlu2 %v220_v35 }
 0x17c   :  { %v109_v36 = vpop.xlane.xlu0 %108 }
 0x17d   :  { %v113_v37 = vadd.f32 1e-13, %v109_v36  ;;  %v406_v36 = vld [vmem:[%s912_s4 + $0x68] sm:$0xff] }
 0x17e   :  { %455 = vmatpush.msrb.mxu0 %v406_v36 }
 0x17f   :  { %624 = vrcp.f32 %v113_v37  ;;  %v126_v43 = vand.u32 2147483648, %v113_v37  ;;  %v124_v45 = vand.u32 2147483647, %v113_v37  ;;  %vm120_vm3 = vweird.f32 %v113_v37 }
 0x181   :  { %v127_v48 = vor.u32 1.1754944e-38, %v126_v43  ;;  %vm125_vm5 = vcmp.eq.f32.partialorder %v124_v45, 8.507059e+37 }
 0x184   :  { %v112_v38 = vpop.xlane.xlu1 %111 }
 0x185   :  { %v625_v39 = vpop.eup %624  ;;  %v114_v40 = vadd.f32 1e-13, %v112_v38 }
 0x186   :  { %v116_v41 = vmul.f32 %v625_v39, %v113_v37  ;;  %vm121_vm2 = vweird.f32 %v625_v39  ;;  %v422_v37 = vld [vmem:[%s912_s4 + $0xe8] sm:$0xff] }
 0x187   :  { %626 = vrcp.f32 %v114_v40  ;;  %vm122_vm4 = vmor %vm120_vm3, %vm121_vm2  ;;  %v141_v54 = vand.u32 2147483648, %v114_v40  ;;  %v139_v56 = vand.u32 2147483647, %v114_v40  ;;  %vm135_vm7 = vweird.f32 %v114_v40  ;;  %478 = vmatpush.msrb.mxu1 %v422_v37 }
 0x188   :  { %v117_v42 = vsub.f32 1.0, %v116_v41  ;;  %v405_v41 = vld [vmem:[%s912_s4 + $0x60] sm:$0xff] }
 0x189   :  { %v142_v58 = vor.u32 1.1754944e-38, %v141_v54  ;;  %vm140_vm9 = vcmp.eq.f32.partialorder %v139_v56, 8.507059e+37  ;;  %456 = vmatpush.msrb.mxu0 %v405_v41 }
 0x18a   :  { %v118_v44 = vmul.f32 %v625_v39, %v117_v42 }
 0x18c   :  { %v119_v46 = vadd.f32 %v625_v39, %v118_v44  ;;  %v421_v44 = vld [vmem:[%s912_s4 + $0xe0] sm:$0xff] }
 0x18d   :  { %v627_v47 = vpop.eup %626  ;;  %479 = vmatpush.msrb.mxu1 %v421_v44 }
 0x18e   :  { %v131_v49 = vmul.f32 %v627_v47, %v114_v40  ;;  %v123_v50 = vsel %vm122_vm4, %v625_v39, %v119_v46  ;;  %vm136_vm6 = vweird.f32 %v627_v47  ;;  %v404_v46 = vld [vmem:[%s912_s4 + $0x58] sm:$0xff] }
 0x18f   :  { %v128_v51 = vsel %vm125_vm5, %v127_v48, %v123_v50  ;;  %vm137_vm8 = vmor %vm135_vm7, %vm136_vm6  ;;  %v403_v50 = vld [vmem:[%s912_s4 + $0x50] sm:$0xff]  ;;  %457 = vmatpush.msrb.mxu0 %v404_v46 }
 0x190   :  { %v132_v52 = vsub.f32 1.0, %v131_v49  ;;  %v129_v53 = vmul.f32 %v128_v51, %v105_v21  ;;  %v420_v49 = vld [vmem:[%s912_s4 + $0xd8] sm:$0xff] }
 0x191   :  { %480 = vmatpush.msrb.mxu1 %v420_v49  ;;  %458 = vmatpush.msrb.mxu0 %v403_v50 }
 0x192   :  { %590 = vmatmul.msk.f32.vlgmr.msra.gmra.mxu2 %vm92_vm1, %v129_v53  ;;  %v133_v55 = vmul.f32 %v627_v47, %v132_v52  ;;  %v419_v53 = vld [vmem:[%s912_s4 + $0xd0] sm:$0xff] }
 0x193   :  { %528 = vmatpush.msra.mxu2 %v408_v26  ;;  %481 = vmatpush.msrb.mxu1 %v419_v53 }
 0x194   :  { %v134_v57 = vadd.f32 %v627_v47, %v133_v55  ;;  %v402_v55 = vld [vmem:[%s912_s4 + $0x48] sm:$0xff] }
 0x195   :  { %529 = vmatpush.msra.mxu2 %v407_v31  ;;  %459 = vmatpush.msrb.mxu0 %v402_v55 }
 0x196   :  { %v138_v59 = vsel %vm137_vm8, %v627_v47, %v134_v57  ;;  %v418_v57 = vld [vmem:[%s912_s4 + $0xc8] sm:$0xff] }
 0x197   :  { %v143_v61 = vsel %vm140_vm9, %v142_v58, %v138_v59  ;;  %530 = vmatpush.msra.mxu2 %v406_v36  ;;  %v401_v59 = vld [vmem:[%s912_s4 + $0x40] sm:$0xff]  ;;  %482 = vmatpush.msrb.mxu1 %v418_v57 }
 0x198   :  { %v144_v62 = vmul.f32 %v143_v61, %v106_v24  ;;  %v417_v61 = vld [vmem:[%s912_s4 + $0xc0] sm:$0xff]  ;;  %460 = vmatpush.msrb.mxu0 %v401_v59 }
 0x199   :  { %531 = vmatpush.msra.mxu2 %v405_v41  ;;  %483 = vmatpush.msrb.mxu1 %v417_v61 }
 0x19a   :  { %591 = vmatmul.msk.f32.vlgmr.msra.gmra.mxu3 %vm92_vm1, %v144_v62  ;;  %v400_v62 = vld [vmem:[%s912_s4 + $0x38] sm:$0xff] }
 0x19b   :  { %551 = vmatpush.msra.mxu3 %v424_v30  ;;  %532 = vmatpush.msra.mxu2 %v404_v46 }
 0x19c   :  { %461 = vmatpush.msrb.mxu0 %v400_v62  ;;  %484 = vmatpush.msrb.mxu1 %v416_v63 }
 0x19d   :  { %552 = vmatpush.msra.mxu3 %v423_v33  ;;  %533 = vmatpush.msra.mxu2 %v403_v50 }
 0x19f   :  { %v219_v6 = vpop.xlane.xlu2 %218  ;;  %553 = vmatpush.msra.mxu3 %v422_v37  ;;  %534 = vmatpush.msra.mxu2 %v402_v55 }
 0x1a0   :  { %v223_v7 = vsub.f32 %v215_v29, %v219_v6  ;;  %v399_v6 = vld [vmem:[%s912_s4 + $0x30] sm:$0xff] }
 0x1a1   :  { %554 = vmatpush.msra.mxu3 %v421_v44  ;;  %535 = vmatpush.msra.mxu2 %v401_v59 }
 0x1a2   :  { %v225_v8 = vmul.f32 1.442695, %v223_v7  ;;  %462 = vmatpush.msrb.mxu0 %v399_v6 }
 0x1a3   :  { %555 = vmatpush.msra.mxu3 %v420_v49  ;;  %536 = vmatpush.msra.mxu2 %v400_v62 }
 0x1a4   :  { %628 = vpow2.f32 %v225_v8 }
 0x1a5   :  { %556 = vmatpush.msra.mxu3 %v419_v53  ;;  %537 = vmatpush.msra.mxu2 %v399_v6 }
 0x1a7   :  { %v222_v9 = vpop.xlane.xlu2 %221  ;;  %557 = vmatpush.msra.mxu3 %v418_v57 }
 0x1a8   :  { %v224_v10 = vsub.f32 %v216_v34, %v222_v9  ;;  %v415_v9 = vld [vmem:[%s912_s4 + $0xb0] sm:$0xff] }
 0x1a9   :  { %558 = vmatpush.msra.mxu3 %v417_v61  ;;  %485 = vmatpush.msrb.mxu1 %v415_v9 }
 0x1aa   :  { %v629_v11 = vpop.eup %628  ;;  %v227_v12 = vmul.f32 1.442695, %v224_v10 }
 0x1ab   :  { %v229_v13 = vmul.f32 %v629_v11, %v730_v27  ;;  %v398_v11 = vld [vmem:[%s912_s4 + $0x28] sm:$0xff]  ;;  %559 = vmatpush.msra.mxu3 %v416_v63 }
 0x1ac   :  { %630 = vpow2.f32 %v227_v12  ;;  %463 = vmatpush.msrb.mxu0 %v398_v11  ;;  %538 = vmatpush.msra.mxu2 %v398_v11 }
 0x1ad   :  { %v231_v14 = vsel %vm92_vm1, %v229_v13, 0.0  ;;  %560 = vmatpush.msra.mxu3 %v415_v9 }
 0x1ae   :  { %232 = vadd.xlane.f32.xlu2 %v231_v14 }
 0x1b2   :  { %v631_v15 = vpop.eup %630 }
 0x1b3   :  { %v740_v16 = vmul.f32 %v631_v15, %v212_v32  ;;  %v397_v15 = vld [vmem:[%s912_s4 + $0x20] sm:$0xff] }
 0x1b4   :  { %464 = vmatpush.msrb.mxu0 %v397_v15  ;;  %539 = vmatpush.msra.mxu2 %v397_v15 }
 0x1b5   :  { %v234_v17 = vsel %vm92_vm1, %v740_v16, 0.0 }
 0x1b6   :  { %235 = vadd.xlane.f32.xlu1 %v234_v17  ;;  %v413_v17 = vld [vmem:[%s912_s4 + $0xa0] sm:$0xff] }
 0x1c6   :  { %382 = vperm.xlu2 %596, %v715_v5  }
 0x1ce   :  { %389 = vperm.xlu2 %596, %v384_v18  }
 0x1cf   :  { %320 = vperm.xlu1 %597, %v730_v27  }
 0x1d6   :  { %327 = vperm.xlu2 %596, %v322_v19  }
 0x215   :  { %v289_v7 = vpop.f32.mrf.mxu2 }
 0x221   :  { %v233_v20 = vpop.xlane.xlu2 %232 }
 0x222   :  { %v237_v21 = vadd.f32 1e-13, %v233_v20  ;;  %v396_v20 = vld [vmem:[%s912_s4 + $0x18] sm:$0xff] }
 0x223   :  { %465 = vmatpush.msrb.mxu0 %v396_v20  ;;  %540 = vmatpush.msra.mxu2 %v396_v20 }
 0x224   :  { %632 = vrcp.f32 %v237_v21  ;;  %v250_v5 = vand.u32 2147483648, %v237_v21  ;;  %v248_v27 = vand.u32 2147483647, %v237_v21  ;;  %vm244_vm11 = vweird.f32 %v237_v21 }
 0x226   :  { %v251_v35 = vor.u32 1.1754944e-38, %v250_v5  ;;  %vm249_vm13 = vcmp.eq.f32.partialorder %v248_v27, 8.507059e+37  ;;  %v410_v5 = vld [vmem:[%s912_s4 + $0x88] sm:$0xff]  ;;  %v409_v27 = vld [vmem:[%s912_s4 + $0x80] sm:$0xff] }
 0x229   :  { %v236_v22 = vpop.xlane.xlu1 %235  ;;  %v751_v4 = vpop.permute.xlu2 %382 }
 0x22a   :  { %v633_v23 = vpop.eup %632  ;;  %v748_v24 = vadd.f32 1e-13, %v236_v22  ;;  %v395_v22 = vld [vmem:[%s912_s4 + $0x10] sm:$0xff] }
 0x22b   :  { %v240_v25 = vmul.f32 %v633_v23, %v237_v21  ;;  %vm245_vm10 = vweird.f32 %v633_v23  ;;  %v412_v21 = vld [vmem:[%s912_s4 + $0x98] sm:$0xff]  ;;  %466 = vmatpush.msrb.mxu0 %v395_v22  ;;  %541 = vmatpush.msra.mxu2 %v395_v22 }
 0x22c   :  { %634 = vrcp.f32 %v748_v24  ;;  %vm246_vm12 = vmor %vm244_vm11, %vm245_vm10  ;;  %v265_v45 = vand.u32 2147483648, %v748_v24  ;;  %v263_v48 = vand.u32 2147483647, %v748_v24  ;;  %vm259_vm15 = vweird.f32 %v748_v24 }
 0x22d   :  { %v241_v28 = vsub.f32 1.0, %v240_v25 }
 0x22e   :  { %v266_v54 = vor.u32 1.1754944e-38, %v265_v45  ;;  %vm264_vm3 = vcmp.eq.f32.partialorder %v263_v48, 8.507059e+37 }
 0x22f   :  { %v242_v29 = vmul.f32 %v633_v23, %v241_v28  ;;  %v394_v28 = vld [vmem:[%s912_s4 + $0x8] sm:$0xff] }
 0x230   :  { %467 = vmatpush.msrb.mxu0 %v394_v28  ;;  %542 = vmatpush.msra.mxu2 %v394_v28 }
 0x231   :  { %v243_v32 = vadd.f32 %v633_v23, %v242_v29  ;;  %v791_v51 = vpop.permute.xlu2 %389  ;;  %v393_v29 = vld [vmem:[%s912_s4] sm:$0xff] }
 0x232   :  { %v635_v34 = vpop.eup %634  ;;  %468 = vmatpush.msrb.mxu0 %v393_v29  ;;  %543 = vmatpush.msra.mxu2 %v393_v29 }
 0x233   :  { %v255_v38 = vmul.f32 %v635_v34, %v748_v24  ;;  %v247_v39 = vsel %vm246_vm12, %v633_v23, %v243_v32  ;;  %vm260_vm14 = vweird.f32 %v635_v34  ;;  %v411_v23 = vld [vmem:[%s912_s4 + $0x90] sm:$0xff] }
 0x234   :  { %v252_v40 = vsel %vm249_vm13, %v251_v35, %v247_v39  ;;  %vm261_vm2 = vmor %vm259_vm15, %vm260_vm14 }
 0x235   :  { %v256_v42 = vsub.f32 1.0, %v255_v38  ;;  %v253_v43 = vmul.f32 %v252_v40, %v229_v13  ;;  %v414_v13 = vld [vmem:[%s912_s4 + $0xa8] sm:$0xff] }
 0x236   :  { %486 = vmatpush.msrb.mxu1 %v414_v13  ;;  %561 = vmatpush.msra.mxu3 %v414_v13 }
 0x237   :  { %v257_v47 = vmul.f32 %v635_v34, %v256_v42  ;;  %592 = vmatmul.msk.f32.vlgmr.msrb.gmra.mxu2 %vm92_vm1, %v253_v43 }
 0x238   :  { %487 = vmatpush.msrb.mxu1 %v413_v17  ;;  %562 = vmatpush.msra.mxu3 %v413_v17 }
 0x239   :  { %v258_v52 = vadd.f32 %v635_v34, %v257_v47  ;;  %v328_v12 = vpop.permute.xlu2 %327 }
 0x23a   :  { %488 = vmatpush.msrb.mxu1 %v412_v21  ;;  %563 = vmatpush.msra.mxu3 %v412_v21 }
 0x23b   :  { %v262_v56 = vsel %vm261_vm2, %v635_v34, %v258_v52 }
 0x23c   :  { %v267_v58 = vsel %vm264_vm3, %v266_v54, %v262_v56  ;;  %489 = vmatpush.msrb.mxu1 %v411_v23  ;;  %564 = vmatpush.msra.mxu3 %v411_v23 }
 0x23d   :  { %v268_v60 = vmul.f32 %v267_v58, %v740_v16  ;;  %v312_v16 = vpop.f32.mrf.mxu3 }
 0x23e   :  { %v330_v18 = vmul.f32 %v328_v12, %v312_v16  ;;  %490 = vmatpush.msrb.mxu1 %v410_v5  ;;  %565 = vmatpush.msra.mxu3 %v410_v5 }
 0x23f   :  { %593 = vmatmul.msk.f32.vlgmr.msrb.gmra.mxu3 %vm92_vm1, %v268_v60  ;;  %vm501_vm1 = vcmask 261120  }
 0x240   :  { %v429_v24 = vmul.f32 %v330_v18, %v699_v3  ;;  %491 = vmatpush.msrb.mxu1 %v409_v27  ;;  %566 = vmatpush.msra.mxu3 %v409_v27  ;;  %v427_v38 = vsub.f32 %v699_v3, %v330_v18 }
 0x241   :  { %v321_v8 = vpop.permute.xlu1 %320 }
 0x242   :  { %v822_v10 = vmul.f32 %v321_v8, %v289_v7  ;;  %v613_v25 = vpack.i.bf16 %v429_v24, %v330_v18 }
 0x244   :  { %v428_v14 = vmul.f32 %v822_v10, %v692_v2  ;;  %v426_v30 = vsub.f32 %v692_v2, %v822_v10 }
 0x246   :  { %v598_v19 = vpack.i.bf16 %v428_v14, %v822_v10 }
 0x248   :  { %599 = vrot.lane.b32.xlu2 %v598_v19, %s636_s0 }
 0x250   :  { %614 = vrot.lane.b32.xlu2 %v613_v25, %s636_s0 }
 0x2a2   :  { %v600_v26 = vpop.permute.xlu2 %599 }
 0x2a3   :  { %v602_v31 = vunpack.i.h.bf16 %v600_v26  ;;  %v601_v32 = vunpack.i.l.bf16 %v600_v26 }
 0x2a5   :  { %v446_v33 = vsel %vm31_vm0, %v692_v2, %v601_v32  ;;  %v448_v34 = vsel %vm31_vm0, %v426_v30, %v602_v31 }
 0x2a6   :  { %469 = vmatmul.f32.vlgmr.msrb.gmra.mxu0 %v446_v33  ;;  %492 = vmatmul.f32.vlgmr.msrb.gmra.mxu1 %v448_v34 }
 0x2aa   :  { %v615_v35 = vpop.permute.xlu2 %614 }
 0x2ab   :  { %v617_v36 = vunpack.i.h.bf16 %v615_v35  ;;  %v616_v37 = vunpack.i.l.bf16 %v615_v35 }
 0x2ad   :  { %v447_v39 = vsel %vm31_vm0, %v699_v3, %v616_v37  ;;  %v449_v40 = vsel %vm31_vm0, %v427_v38, %v617_v36  ;;  %v619_v3 = vld [vmem:[%s913_s5] ss:$0 sm:$0xff] }
 0x2ae   :  { %472 = vmatmul.f32.gmra.mxu0 %v447_v39  ;;  %495 = vmatmul.f32.gmra.mxu1 %v449_v40 }
 0x2ba   :  { %v351_v41 = vpop.f32.mrf.mxu2 }
 0x2bb   :  { %v391_v42 = vmul.f32 %v751_v4, %v351_v41 }
 0x2bd   :  { %v506_v2 = vmul.f32 %v391_v42, %v680_v0  ;;  %v504_v58 = vsub.f32 %v680_v0, %v391_v42 }
 0x2bf   :  { %v603_v43 = vpack.i.bf16 %v506_v2, %v391_v42 }
 0x2c1   :  { %604 = vrot.lane.b32.xlu1 %v603_v43, %s636_s0 }
 0x2c2   :  { %v374_v44 = vpop.f32.mrf.mxu3 }
 0x2c3   :  { %v392_v45 = vmul.f32 %v791_v51, %v374_v44 }
 0x2c5   :  { %v507_v46 = vmul.f32 %v392_v45, %v685_v1  ;;  %v505_v8 = vsub.f32 %v685_v1, %v392_v45 }
 0x2c7   :  { %v608_v47 = vpack.i.bf16 %v507_v46, %v392_v45 }
 0x2c9   :  { %609 = vrot.lane.b32.xlu1 %v608_v47, %s636_s0 }
 0x323   :  { %v470_v48 = vpop.f32.mrf.mxu0  ;;  %v493_v49 = vpop.f32.mrf.mxu1 }
 0x324   :  { %v471_v4 = vadd.f32 %v619_v3, %v470_v48 }
 0x326   :  { %v494_v50 = vadd.f32 %v493_v49, %v471_v4 }
 0x328   :  { %v499_v52 = vmax.f32 %v494_v50, 0.0 }
 0x32a   :  { %502 = vst.msk [vmem:[%s914_s6] sm:$0xff] %vm501_vm1, %v499_v52 }
 0x32b   :  { %v473_v51 = vpop.f32.mrf.mxu0  ;;  %v496_v54 = vpop.f32.mrf.mxu1 }
 0x32c   :  { %v474_v53 = vadd.f32 %v619_v3, %v473_v51 }
 0x32e   :  { %v497_v55 = vadd.f32 %v496_v54, %v474_v53 }
 0x330   :  { %v500_v56 = vmax.f32 %v497_v55, 0.0 }
 0x332   :  { %503 = vst.msk [vmem:[%s914_s6 + $0x8] sm:$0xff] %vm501_vm1, %v500_v56 }
 0x333   :  { %v605_v57 = vpop.permute.xlu1 %604 }
 0x334   :  { %v607_v59 = vunpack.i.h.bf16 %v605_v57  ;;  %v606_v60 = vunpack.i.l.bf16 %v605_v57 }
 0x336   :  { %v524_v61 = vsel %vm31_vm0, %v680_v0, %v606_v60  ;;  %v526_v62 = vsel %vm31_vm0, %v504_v58, %v607_v59 }
 0x337   :  { %544 = vmatmul.f32.vlgmr.msra.gmra.mxu2 %v524_v61  ;;  %567 = vmatmul.f32.vlgmr.msra.gmra.mxu3 %v526_v62 }
 0x33b   :  { %v610_v63 = vpop.permute.xlu1 %609 }
 0x33c   :  { %v612_v6 = vunpack.i.h.bf16 %v610_v63  ;;  %v611_v7 = vunpack.i.l.bf16 %v610_v63 }
 0x33e   :  { %v525_v9 = vsel %vm31_vm0, %v685_v1, %v611_v7  ;;  %v527_v10 = vsel %vm31_vm0, %v505_v8, %v612_v6 }
 0x33f   :  { %547 = vmatmul.f32.gmra.mxu2 %v525_v9  ;;  %570 = vmatmul.f32.gmra.mxu3 %v527_v10 }
 0x3ba   :  { %v545_v11 = vpop.f32.mrf.mxu2  ;;  %v568_v12 = vpop.f32.mrf.mxu3 }
 0x3bb   :  { %v546_v13 = vadd.f32 %v619_v3, %v545_v11 }
 0x3bd   :  { %v569_v0 = vadd.f32 %v568_v12, %v546_v13 }
 0x3bf   :  { %v574_v14 = vmax.f32 %v569_v0, 0.0 }
 0x3c1   :  { %576 = vst.msk [vmem:[%s915_s7] sm:$0xff] %vm501_vm1, %v574_v14 }
 0x3c2   :  { %v548_v15 = vpop.f32.mrf.mxu2  ;;  %v571_v17 = vpop.f32.mrf.mxu3 }
 0x3c3   :  { %v549_v16 = vadd.f32 %v619_v3, %v548_v15 }
 0x3c5   :  { %v572_v18 = vadd.f32 %v571_v17, %v549_v16 }
 0x3c7   :  { %v575_v19 = vmax.f32 %v572_v18, 0.0 }
 0x3c9   :  { %577 = vst.msk [vmem:[%s915_s7 + $0x8] sm:$0xff] %vm501_vm1, %v575_v19 }

// kernel: esim_forward.7
= control target key start
LH: loop header
LB: loop body
LE: loop exit
PB: predicated region body
PF: predicated region fallthrough
CT: control target
= control target key end

     0   :  { %v1077_v8 = vmov 0.0   ;;  %vm70_vm0 = vcmask 1043456   ;;  %s1078_s29 = smov 64   ;;  %s1079_s30 = smov 32   ;;  %v1080_v31 = vmov 0   ;;  %vm23_vm5 = vcmask 261120   ;;  %s1412_s2 = inlined_call_operand.vmem [shape: f32[2,32,128], index: 2, kind: input, shape index: {}]   ;;  %s1413_s0 = inlined_call_operand.vmem [shape: f32[8,8,128], index: 0, kind: input, shape index: {}]   ;;  %s1414_s1 = inlined_call_operand.vmem [shape: f32[8,8,1], index: 1, kind: input, shape index: {}]   ;;  %s1415_s3 = inlined_call_operand.vmem [shape: f32[8,8,32], index: 3, kind: output, shape index: {}]  }
   0x1   :  { %v1104_v0 = vld [vmem:[%s1412_s2 + $0x38] sm:$0xff]  ;;  %v1114_v2 = vld [vmem:[%s1412_s2 + $0x30] sm:$0xff]  ;;  %v1126_v4 = vld [vmem:[%s1412_s2 + $0x28] sm:$0xff]  ;;  %1010 = vset.pattern.permute.xlu1 %v1080_v31  ;;  %1011 = vset.pattern.permute.xlu2 %v1080_v31 }
   0x2   :  { %v1109_v1 = vld [vmem:[%s1412_s2 + $0x18] sm:$0xff]  ;;  %59 = vmatpush.msra.mxu1 %v1104_v0  ;;  %v1121_v3 = vld [vmem:[%s1412_s2 + $0x10] sm:$0xff]  ;;  %v1131_v5 = vld [vmem:[%s1412_s2 + $0x8] sm:$0xff]  ;;  %175 = vmatpush.msra.mxu3 %v1104_v0 }
   0x3   :  { %39 = vmatpush.msra.mxu0 %v1109_v1  ;;  %150 = vmatpush.msra.mxu2 %v1109_v1  ;;  %v1140_v6 = vld [vmem:[%s1412_s2 + $0x20] sm:$0xff]  ;;  %v966_v50 = vld [vmem:[%s1413_s0 + $0x8] sm:$0xff] }
   0x4   :  { %60 = vmatpush.msra.mxu1 %v1114_v2  ;;  %v1145_v7 = vld [vmem:[%s1412_s2] sm:$0xff]  ;;  %176 = vmatpush.msra.mxu3 %v1114_v2  ;;  %v968_v55 = vld [vmem:[%s1414_s1 + $0x8] sm:$0xff] }
   0x5   :  { %40 = vmatpush.msra.mxu0 %v1121_v3  ;;  %151 = vmatpush.msra.mxu2 %v1121_v3  ;;  %v72_v12 = vld [vmem:[%s1413_s0] sm:$0xff] }
   0x6   :  { %61 = vmatpush.msra.mxu1 %v1126_v4  ;;  %177 = vmatpush.msra.mxu3 %v1126_v4  ;;  %v111_v32 = vld [vmem:[%s1414_s1] sm:$0xff] }
   0x7   :  { %41 = vmatpush.msra.mxu0 %v1131_v5  ;;  %152 = vmatpush.msra.mxu2 %v1131_v5  ;;  %v118_v33 = vsub.f32 1.0, %v111_v32 }
   0x8   :  { %62 = vmatpush.msra.mxu1 %v1140_v6  ;;  %178 = vmatpush.msra.mxu3 %v1140_v6 }
   0x9   :  { %42 = vmatpush.msra.mxu0 %v1145_v7  ;;  %63 = vmatmul.f32.vlgmr.msra.gmra.mxu1 %v1077_v8 }
   0xa   :  { %43 = vmatmul.f32.vlgmr.msra.gmra.mxu0 %v1077_v8  ;;  %153 = vmatpush.msra.mxu2 %v1145_v7 }
   0xb   :  { %269 = vmatpush.msrb.mxu0 %v1109_v1  ;;  %294 = vmatpush.msrb.mxu1 %v1104_v0 }
   0xc   :  { %388 = vmatpush.msrb.mxu2 %v1109_v1  ;;  %413 = vmatpush.msrb.mxu3 %v1104_v0 }
   0xd   :  { %270 = vmatpush.msrb.mxu0 %v1121_v3  ;;  %295 = vmatpush.msrb.mxu1 %v1114_v2 }
   0xe   :  { %389 = vmatpush.msrb.mxu2 %v1121_v3  ;;  %414 = vmatpush.msrb.mxu3 %v1114_v2 }
   0xf   :  { %271 = vmatpush.msrb.mxu0 %v1131_v5  ;;  %296 = vmatpush.msrb.mxu1 %v1126_v4 }
  0x10   :  { %390 = vmatpush.msrb.mxu2 %v1131_v5  ;;  %415 = vmatpush.msrb.mxu3 %v1126_v4 }
  0x11   :  { %272 = vmatpush.msrb.mxu0 %v1145_v7  ;;  %297 = vmatpush.msrb.mxu1 %v1140_v6 }
  0x12   :  { %391 = vmatpush.msrb.mxu2 %v1145_v7  ;;  %416 = vmatpush.msrb.mxu3 %v1140_v6 }
  0x13   :  { %507 = vmatpush.msra.mxu0 %v1109_v1  ;;  %532 = vmatpush.msra.mxu1 %v1104_v0 }
  0x14   :  { %1012 = vset.pattern.permute.xlu0 %v1080_v31  ;;  %121 = vperm.xlu2 %1011, %v118_v33  }
  0x15   :  { %508 = vmatpush.msra.mxu0 %v1121_v3  ;;  %533 = vmatpush.msra.mxu1 %v1114_v2 }
  0x17   :  { %509 = vmatpush.msra.mxu0 %v1131_v5  ;;  %534 = vmatpush.msra.mxu1 %v1126_v4 }
  0x19   :  { %510 = vmatpush.msra.mxu0 %v1145_v7  ;;  %535 = vmatpush.msra.mxu1 %v1140_v6 }
  0x6e   :  { %v122_v39 = vpop.permute.xlu2 %121 }
  0x6f   :  { %v124_v41 = vmul.f32 0.0, %v122_v39  ;;  %v974_v39 = vld [vmem:[%s1414_s1 + $0x10] sm:$0xff] }
  0x86   :  { %v64_v9 = vpop.f32.mrf.mxu1 }
  0x87   :  { %v44_v10 = vpop.f32.mrf.mxu0  ;;  %v68_v11 = vrot.slane %v64_v9, 4 }
  0x89   :  { %v71_v13 = vsel %vm70_vm0, %v44_v10, %v68_v11 }
  0x8a   :  { %v73_v14 = vadd.f32 %v72_v12, %v71_v13 }
  0x8c   :  { %1013 = vtanh.f32 %v73_v14  ;;  %v963_v16 = vmul.f32 -1.442695, %v73_v14 }
  0x8e   :  { %1015 = vpow2.f32 %v963_v16 }
  0x92   :  { %v1014_v15 = vpop.eup %1013 }
  0x93   :  { %96 = vrot.lane.b32.xlu0 %v1014_v15, %s1078_s29  ;;  %v235_v15 = vsub.f32 1.0, %v968_v55 }
  0x94   :  { %v1016_v17 = vpop.eup %1015 }
  0x95   :  { %v77_v18 = vadd.f32 1.0, %v1016_v17 }
  0x97   :  { %1017 = vrcp.f32 %v77_v18  ;;  %v89_v24 = vand.u32 2147483648, %v77_v18  ;;  %vm83_vm2 = vweird.f32 %v77_v18  ;;  %v87_v25 = vand.u32 2147483647, %v77_v18 }
  0x99   :  { %v90_v27 = vor.u32 1.1754944e-38, %v89_v24  ;;  %vm88_vm4 = vcmp.eq.f32.partialorder %v87_v25, 8.507059e+37 }
  0x9d   :  { %v1018_v19 = vpop.eup %1017 }
  0x9e   :  { %v79_v20 = vmul.f32 %v1018_v19, %v77_v18  ;;  %vm84_vm1 = vweird.f32 %v1018_v19 }
  0x9f   :  { %vm85_vm3 = vmor %vm83_vm2, %vm84_vm1 }
  0xa0   :  { %v80_v21 = vsub.f32 1.0, %v79_v20 }
  0xa2   :  { %v81_v22 = vmul.f32 %v1018_v19, %v80_v21 }
  0xa4   :  { %v82_v23 = vadd.f32 %v1018_v19, %v81_v22 }
  0xa6   :  { %v86_v26 = vsel %vm85_vm3, %v1018_v19, %v82_v23 }
  0xa7   :  { %v91_v29 = vsel %vm88_vm4, %v90_v27, %v86_v26 }
  0xa8   :  { %v94_v34 = vmul.f32 0.0, %v91_v29 }
 0x105   :  { %v97_v28 = vpop.permute.xlu0 %96 }
 0x106   :  { %v99_v30 = vmul.f32 %v97_v28, %v91_v29 }
 0x108   :  { %101 = vrot.lane.b32.xlu0 %v99_v30, %s1079_s30 }
 0x17a   :  { %v102_v35 = vpop.permute.xlu0 %101 }
 0x17b   :  { %v1190_v36 = vadd.f32 %v102_v35, %v94_v34  ;;  %v972_v34 = vld [vmem:[%s1413_s0 + $0x10] sm:$0xff] }
 0x17d   :  { %1019 = vtanh.f32 %v1190_v36 }
 0x183   :  { %v1020_v37 = vpop.eup %1019 }
 0x184   :  { %107 = vrot.lane.b32.xlu1 %v1020_v37, %s1078_s29 }
 0x18c   :  { %114 = vperm.xlu1 %1010, %v111_v32  }
 0x1f6   :  { %v108_v38 = vpop.permute.xlu1 %107 }
 0x1f7   :  { %v110_v40 = vmul.f32 %v108_v38, %v91_v29 }
 0x1fe   :  { %v115_v42 = vpop.permute.xlu1 %114 }
 0x1ff   :  { %v1194_v43 = vmul.f32 %v115_v42, %v110_v40  ;;  %v117_v16 = vmul.f32 %v115_v42, %v1190_v36 }
 0x201   :  { %v1197_v44 = vadd.f32 %v1194_v43, %v124_v41  ;;  %v1223_v17 = vadd.f32 %v124_v41, %v117_v16 }
 0x203   :  { %134 = vrot.lane.b32.xlu0 %v1197_v44, %s1079_s30  ;;  %v158_v45 = vrot.slane %v1197_v44, 4 }
 0x205   :  { %159 = vrot.lane.b32.xlu2 %v158_v45, %s1079_s30 }
 0x25f   :  { %v160_v46 = vpop.permute.xlu2 %159 }
 0x260   :  { %965 = vmatmul.msk.f32.vlgmr.msra.gmra.mxu3 %vm23_vm5, %v160_v46 }
 0x261   :  { %651 = vmatpush.msra.mxu3 %v1104_v0 }
 0x263   :  { %652 = vmatpush.msra.mxu3 %v1114_v2 }
 0x265   :  { %653 = vmatpush.msra.mxu3 %v1126_v4 }
 0x267   :  { %654 = vmatpush.msra.mxu3 %v1140_v6 }
 0x275   :  { %v135_v47 = vpop.permute.xlu0 %134 }
 0x276   :  { %964 = vmatmul.msk.f32.vlgmr.msra.gmra.mxu2 %vm23_vm5, %v135_v47 }
 0x277   :  { %626 = vmatpush.msra.mxu2 %v1109_v1 }
 0x279   :  { %627 = vmatpush.msra.mxu2 %v1121_v3 }
 0x27b   :  { %628 = vmatpush.msra.mxu2 %v1131_v5 }
 0x27d   :  { %629 = vmatpush.msra.mxu2 %v1145_v7 }
 0x2e3   :  { %v180_v48 = vpop.f32.mrf.mxu3 }
 0x2e4   :  { %v184_v49 = vrot.slane %v180_v48, 4 }
 0x2f9   :  { %v155_v51 = vpop.f32.mrf.mxu2 }
 0x2fa   :  { %v186_v52 = vsel %vm70_vm0, %v155_v51, %v184_v49 }
 0x2fb   :  { %v189_v53 = vadd.f32 %v966_v50, %v186_v52 }
 0x2fd   :  { %1021 = vtanh.f32 %v189_v53  ;;  %v967_v56 = vmul.f32 -1.442695, %v189_v53 }
 0x2ff   :  { %1023 = vpow2.f32 %v967_v56  ;;  %v354_v56 = vsub.f32 1.0, %v974_v39 }
 0x303   :  { %v1022_v54 = vpop.eup %1021 }
 0x304   :  { %212 = vrot.lane.b32.xlu1 %v1022_v54, %s1078_s29 }
 0x305   :  { %v1024_v57 = vpop.eup %1023 }
 0x306   :  { %v193_v58 = vadd.f32 1.0, %v1024_v57 }
 0x308   :  { %1025 = vrcp.f32 %v193_v58  ;;  %v205_v8 = vand.u32 2147483648, %v193_v58  ;;  %vm199_vm7 = vweird.f32 %v193_v58  ;;  %v203_v9 = vand.u32 2147483647, %v193_v58 }
 0x30a   :  { %v206_v11 = vor.u32 1.1754944e-38, %v205_v8  ;;  %vm204_vm9 = vcmp.eq.f32.partialorder %v203_v9, 8.507059e+37 }
 0x30c   :  { %231 = vperm.xlu1 %1010, %v968_v55  }
 0x30e   :  { %v1026_v59 = vpop.eup %1025 }
 0x30f   :  { %v195_v60 = vmul.f32 %v1026_v59, %v193_v58  ;;  %vm200_vm6 = vweird.f32 %v1026_v59 }
 0x310   :  { %vm201_vm8 = vmor %vm199_vm7, %vm200_vm6 }
 0x311   :  { %v196_v61 = vsub.f32 1.0, %v195_v60 }
 0x313   :  { %v197_v62 = vmul.f32 %v1026_v59, %v196_v61 }
 0x315   :  { %v198_v63 = vadd.f32 %v1026_v59, %v197_v62 }
 0x317   :  { %v202_v10 = vsel %vm201_vm8, %v1026_v59, %v198_v63 }
 0x318   :  { %v207_v13 = vsel %vm204_vm9, %v206_v11, %v202_v10 }
 0x319   :  { %v210_v18 = vmul.f32 %v207_v13, %v1223_v17 }
 0x376   :  { %v213_v12 = vpop.permute.xlu1 %212 }
 0x377   :  { %v215_v14 = vmul.f32 %v213_v12, %v207_v13 }
 0x379   :  { %217 = vrot.lane.b32.xlu2 %v215_v14, %s1079_s30 }
 0x37e   :  { %v232_v25 = vpop.permute.xlu1 %231 }
 0x381   :  { %238 = vperm.xlu2 %1011, %v235_v15  }
 0x3d3   :  { %v218_v19 = vpop.permute.xlu2 %217 }
 0x3d4   :  { %v220_v20 = vadd.f32 %v218_v19, %v210_v18 }
 0x3d6   :  { %1027 = vtanh.f32 %v220_v20  ;;  %v234_v58 = vmul.f32 %v232_v25, %v220_v20 }
 0x3db   :  { %v239_v22 = vpop.permute.xlu2 %238 }
 0x3dc   :  { %v1028_v21 = vpop.eup %1027  ;;  %v244_v26 = vmul.f32 %v239_v22, %v1197_v44  ;;  %v241_v57 = vmul.f32 %v239_v22, %v1223_v17 }
 0x3dd   :  { %223 = vrot.lane.b32.xlu0 %v1028_v21, %s1078_s29 }
 0x3de   :  { %v1257_v59 = vadd.f32 %v241_v57, %v234_v58 }
 0x44f   :  { %v224_v23 = vpop.permute.xlu0 %223 }
 0x450   :  { %v226_v24 = vmul.f32 %v224_v23, %v207_v13 }
 0x452   :  { %v1228_v27 = vmul.f32 %v232_v25, %v226_v24 }
 0x454   :  { %v1231_v28 = vadd.f32 %v244_v26, %v1228_v27 }
 0x456   :  { %253 = vrot.lane.b32.xlu1 %v1231_v28, %s1079_s30  ;;  %v277_v29 = vrot.slane %v1231_v28, 4 }
 0x458   :  { %278 = vrot.lane.b32.xlu0 %v277_v29, %s1079_s30 }
 0x4c8   :  { %v254_v30 = vpop.permute.xlu1 %253 }
 0x4c9   :  { %970 = vmatmul.msk.f32.vlgmr.msrb.gmra.mxu0 %vm23_vm5, %v254_v30 }
 0x4ca   :  { %v279_v31 = vpop.permute.xlu0 %278  ;;  %745 = vmatpush.msrb.mxu0 %v1109_v1 }
 0x4cb   :  { %971 = vmatmul.msk.f32.vlgmr.msrb.gmra.mxu1 %vm23_vm5, %v279_v31 }
 0x4cc   :  { %770 = vmatpush.msrb.mxu1 %v1104_v0  ;;  %746 = vmatpush.msrb.mxu0 %v1121_v3 }
 0x4ce   :  { %771 = vmatpush.msrb.mxu1 %v1114_v2  ;;  %747 = vmatpush.msrb.mxu0 %v1131_v5 }
 0x4d0   :  { %772 = vmatpush.msrb.mxu1 %v1126_v4  ;;  %748 = vmatpush.msrb.mxu0 %v1145_v7 }
 0x4d2   :  { %773 = vmatpush.msrb.mxu1 %v1140_v6 }
 0x546   :  { %v274_v35 = vpop.f32.mrf.mxu0 }
 0x548   :  { %v299_v32 = vpop.f32.mrf.mxu1 }
 0x549   :  { %v303_v33 = vrot.slane %v299_v32, 4 }
 0x54b   :  { %v305_v36 = vsel %vm70_vm0, %v274_v35, %v303_v33 }
 0x54c   :  { %v308_v37 = vadd.f32 %v972_v34, %v305_v36 }
 0x54e   :  { %1029 = vtanh.f32 %v308_v37  ;;  %v973_v40 = vmul.f32 -1.442695, %v308_v37 }
 0x550   :  { %1031 = vpow2.f32 %v973_v40 }
 0x554   :  { %v1030_v38 = vpop.eup %1029 }
 0x555   :  { %331 = vrot.lane.b32.xlu2 %v1030_v38, %s1078_s29 }
 0x556   :  { %v1032_v41 = vpop.eup %1031 }
 0x557   :  { %v312_v42 = vadd.f32 1.0, %v1032_v41 }
 0x559   :  { %1033 = vrcp.f32 %v312_v42  ;;  %v324_v49 = vand.u32 2147483648, %v312_v42  ;;  %vm318_vm11 = vweird.f32 %v312_v42  ;;  %v322_v50 = vand.u32 2147483647, %v312_v42 }
 0x55b   :  { %v325_v52 = vor.u32 1.1754944e-38, %v324_v49  ;;  %vm323_vm13 = vcmp.eq.f32.partialorder %v322_v50, 8.507059e+37 }
 0x55d   :  { %350 = vperm.xlu2 %1011, %v974_v39  }
 0x55f   :  { %v1034_v44 = vpop.eup %1033 }
 0x560   :  { %v314_v45 = vmul.f32 %v1034_v44, %v312_v42  ;;  %vm319_vm10 = vweird.f32 %v1034_v44 }
 0x561   :  { %vm320_vm12 = vmor %vm318_vm11, %vm319_vm10 }
 0x562   :  { %v315_v46 = vsub.f32 1.0, %v314_v45 }
 0x564   :  { %v316_v47 = vmul.f32 %v1034_v44, %v315_v46 }
 0x566   :  { %v317_v48 = vadd.f32 %v1034_v44, %v316_v47 }
 0x568   :  { %v321_v51 = vsel %vm320_vm12, %v1034_v44, %v317_v48 }
 0x569   :  { %v326_v54 = vsel %vm323_vm13, %v325_v52, %v321_v51 }
 0x56a   :  { %v329_v60 = vmul.f32 %v326_v54, %v1257_v59 }
 0x5af   :  { %v332_v53 = vpop.permute.xlu2 %331 }
 0x5b0   :  { %v334_v55 = vmul.f32 %v332_v53, %v326_v54 }
 0x5b2   :  { %336 = vrot.lane.b32.xlu0 %v334_v55, %s1079_s30  ;;  %v984_v55 = vld [vmem:[%s1413_s0 + $0x20] sm:$0xff] }
 0x5b7   :  { %v351_v11 = vpop.permute.xlu2 %350 }
 0x5ba   :  { %357 = vperm.xlu0 %1012, %v354_v56  }
 0x624   :  { %v337_v61 = vpop.permute.xlu0 %336 }
 0x625   :  { %v339_v62 = vadd.f32 %v337_v61, %v329_v60  ;;  %v986_v60 = vld [vmem:[%s1414_s1 + $0x20] sm:$0xff] }
 0x627   :  { %1035 = vtanh.f32 %v339_v62  ;;  %v353_v36 = vmul.f32 %v351_v11, %v339_v62 }
 0x62c   :  { %v358_v8 = vpop.permute.xlu0 %357 }
 0x62d   :  { %v1036_v63 = vpop.eup %1035  ;;  %v363_v12 = vmul.f32 %v358_v8, %v1231_v28  ;;  %v360_v35 = vmul.f32 %v358_v8, %v1257_v59 }
 0x62e   :  { %342 = vrot.lane.b32.xlu1 %v1036_v63, %s1078_s29 }
 0x62f   :  { %v361_v37 = vadd.f32 %v360_v35, %v353_v36 }
 0x6a0   :  { %v343_v9 = vpop.permute.xlu1 %342 }
 0x6a1   :  { %v345_v10 = vmul.f32 %v343_v9, %v326_v54 }
 0x6a3   :  { %v1262_v13 = vmul.f32 %v351_v11, %v345_v10 }
 0x6a5   :  { %v1265_v14 = vadd.f32 %v363_v12, %v1262_v13 }
 0x6a7   :  { %372 = vrot.lane.b32.xlu2 %v1265_v14, %s1079_s30  ;;  %v396_v15 = vrot.slane %v1265_v14, 4 }
 0x6a9   :  { %397 = vrot.lane.b32.xlu1 %v396_v15, %s1079_s30 }
 0x701   :  { %v373_v16 = vpop.permute.xlu2 %372 }
 0x702   :  { %976 = vmatmul.msk.f32.vlgmr.msrb.gmra.mxu2 %vm23_vm5, %v373_v16 }
 0x703   :  { %864 = vmatpush.msrb.mxu2 %v1109_v1  ;;  %v978_v1 = vld [vmem:[%s1413_s0 + $0x18] sm:$0xff] }
 0x705   :  { %865 = vmatpush.msrb.mxu2 %v1121_v3 }
 0x707   :  { %866 = vmatpush.msrb.mxu2 %v1131_v5 }
 0x709   :  { %867 = vmatpush.msrb.mxu2 %v1145_v7 }
 0x71b   :  { %v398_v17 = vpop.permute.xlu1 %397 }
 0x71c   :  { %977 = vmatmul.msk.f32.vlgmr.msrb.gmra.mxu3 %vm23_vm5, %v398_v17 }
 0x71d   :  { %889 = vmatpush.msrb.mxu3 %v1104_v0  ;;  %v980_v0 = vld [vmem:[%s1414_s1 + $0x18] sm:$0xff] }
 0x71e   :  { %v473_v34 = vsub.f32 1.0, %v980_v0 }
 0x71f   :  { %890 = vmatpush.msrb.mxu3 %v1114_v2 }
 0x721   :  { %891 = vmatpush.msrb.mxu3 %v1126_v4 }
 0x723   :  { %892 = vmatpush.msrb.mxu3 %v1140_v6 }
 0x785   :  { %v393_v3 = vpop.f32.mrf.mxu2 }
 0x79f   :  { %v418_v18 = vpop.f32.mrf.mxu3 }
 0x7a0   :  { %v422_v19 = vrot.slane %v418_v18, 4 }
 0x7a2   :  { %v424_v5 = vsel %vm70_vm0, %v393_v3, %v422_v19  ;;  %v592_v3 = vsub.f32 1.0, %v986_v60 }
 0x7a3   :  { %v427_v7 = vadd.f32 %v978_v1, %v424_v5 }
 0x7a5   :  { %1037 = vtanh.f32 %v427_v7  ;;  %v979_v2 = vmul.f32 -1.442695, %v427_v7 }
 0x7a7   :  { %1039 = vpow2.f32 %v979_v2 }
 0x7ab   :  { %v1038_v20 = vpop.eup %1037 }
 0x7ac   :  { %450 = vrot.lane.b32.xlu1 %v1038_v20, %s1078_s29 }
 0x7ad   :  { %v1040_v4 = vpop.eup %1039 }
 0x7ae   :  { %v431_v6 = vadd.f32 1.0, %v1040_v4 }
 0x7b0   :  { %1041 = vrcp.f32 %v431_v6  ;;  %v443_v26 = vand.u32 2147483648, %v431_v6  ;;  %vm437_vm15 = vweird.f32 %v431_v6  ;;  %v441_v28 = vand.u32 2147483647, %v431_v6 }
 0x7b2   :  { %v444_v30 = vor.u32 1.1754944e-38, %v443_v26  ;;  %vm442_vm2 = vcmp.eq.f32.partialorder %v441_v28, 8.507059e+37 }
 0x7b4   :  { %469 = vperm.xlu1 %1010, %v980_v0  }
 0x7b6   :  { %v1042_v21 = vpop.eup %1041 }
 0x7b7   :  { %v433_v22 = vmul.f32 %v1042_v21, %v431_v6  ;;  %vm438_vm14 = vweird.f32 %v1042_v21 }
 0x7b8   :  { %vm439_vm1 = vmor %vm437_vm15, %vm438_vm14 }
 0x7b9   :  { %v434_v23 = vsub.f32 1.0, %v433_v22 }
 0x7bb   :  { %v435_v24 = vmul.f32 %v1042_v21, %v434_v23 }
 0x7bd   :  { %v436_v25 = vadd.f32 %v1042_v21, %v435_v24 }
 0x7bf   :  { %v440_v29 = vsel %vm439_vm1, %v1042_v21, %v436_v25 }
 0x7c0   :  { %v445_v32 = vsel %vm442_vm2, %v444_v30, %v440_v29 }
 0x7c1   :  { %v448_v38 = vmul.f32 %v445_v32, %v361_v37 }
 0x81e   :  { %v451_v31 = vpop.permute.xlu1 %450 }
 0x81f   :  { %v453_v33 = vmul.f32 %v451_v31, %v445_v32 }
 0x821   :  { %455 = vrot.lane.b32.xlu2 %v453_v33, %s1079_s30 }
 0x826   :  { %v470_v46 = vpop.permute.xlu1 %469 }
 0x829   :  { %476 = vperm.xlu2 %1011, %v473_v34   ;;  %v990_v34 = vld [vmem:[%s1413_s0 + $0x28] sm:$0xff] }
 0x87b   :  { %v456_v39 = vpop.permute.xlu2 %455 }
 0x87c   :  { %v458_v40 = vadd.f32 %v456_v39, %v448_v38  ;;  %v992_v39 = vld [vmem:[%s1414_s1 + $0x28] sm:$0xff] }
 0x87e   :  { %1043 = vtanh.f32 %v458_v40  ;;  %v472_v7 = vmul.f32 %v470_v46, %v458_v40 }
 0x883   :  { %v477_v42 = vpop.permute.xlu2 %476 }
 0x884   :  { %v1044_v41 = vpop.eup %1043  ;;  %v482_v47 = vmul.f32 %v477_v42, %v1265_v14  ;;  %v479_v5 = vmul.f32 %v477_v42, %v361_v37 }
 0x885   :  { %461 = vrot.lane.b32.xlu0 %v1044_v41, %s1078_s29 }
 0x886   :  { %v480_v20 = vadd.f32 %v479_v5, %v472_v7  ;;  %v996_v5 = vld [vmem:[%s1413_s0 + $0x30] sm:$0xff] }
 0x8f7   :  { %v462_v44 = vpop.permute.xlu0 %461 }
 0x8f8   :  { %v464_v45 = vmul.f32 %v462_v44, %v445_v32 }
 0x8fa   :  { %v1293_v48 = vmul.f32 %v470_v46, %v464_v45 }
 0x8fc   :  { %v483_v49 = vadd.f32 %v482_v47, %v1293_v48 }
 0x8fe   :  { %491 = vrot.lane.b32.xlu1 %v483_v49, %s1079_s30  ;;  %v515_v50 = vrot.slane %v483_v49, 4 }
 0x900   :  { %516 = vrot.lane.b32.xlu0 %v515_v50, %s1079_s30 }
 0x970   :  { %v492_v51 = vpop.permute.xlu1 %491 }
 0x971   :  { %982 = vmatmul.msk.f32.vlgmr.msra.gmra.mxu0 %vm23_vm5, %v492_v51 }
 0x972   :  { %v517_v52 = vpop.permute.xlu0 %516 }
 0x973   :  { %983 = vmatmul.msk.f32.vlgmr.msra.gmra.mxu1 %vm23_vm5, %v517_v52 }
 0x9ee   :  { %v512_v56 = vpop.f32.mrf.mxu0 }
 0x9f0   :  { %v537_v53 = vpop.f32.mrf.mxu1 }
 0x9f1   :  { %v541_v54 = vrot.slane %v537_v53, 4 }
 0x9f3   :  { %v543_v57 = vsel %vm70_vm0, %v512_v56, %v541_v54 }
 0x9f4   :  { %v546_v58 = vadd.f32 %v984_v55, %v543_v57  ;;  %v711_v57 = vsub.f32 1.0, %v992_v39 }
 0x9f6   :  { %1045 = vtanh.f32 %v546_v58  ;;  %v985_v61 = vmul.f32 -1.442695, %v546_v58 }
 0x9f8   :  { %1047 = vpow2.f32 %v985_v61 }
 0x9fc   :  { %v1046_v59 = vpop.eup %1045 }
 0x9fd   :  { %569 = vrot.lane.b32.xlu2 %v1046_v59, %s1078_s29 }
 0x9fe   :  { %v1048_v62 = vpop.eup %1047 }
 0x9ff   :  { %v550_v63 = vadd.f32 1.0, %v1048_v62 }
 0xa01   :  { %1049 = vrcp.f32 %v550_v63  ;;  %v562_v14 = vand.u32 2147483648, %v550_v63  ;;  %vm556_vm4 = vweird.f32 %v550_v63  ;;  %v560_v15 = vand.u32 2147483647, %v550_v63 }
 0xa03   :  { %v563_v17 = vor.u32 1.1754944e-38, %v562_v14  ;;  %vm561_vm7 = vcmp.eq.f32.partialorder %v560_v15, 8.507059e+37 }
 0xa05   :  { %588 = vperm.xlu2 %1011, %v986_v60  }
 0xa07   :  { %v1050_v8 = vpop.eup %1049 }
 0xa08   :  { %v552_v9 = vmul.f32 %v1050_v8, %v550_v63  ;;  %vm557_vm3 = vweird.f32 %v1050_v8 }
 0xa09   :  { %vm558_vm6 = vmor %vm556_vm4, %vm557_vm3 }
 0xa0a   :  { %v553_v10 = vsub.f32 1.0, %v552_v9 }
 0xa0c   :  { %v554_v11 = vmul.f32 %v1050_v8, %v553_v10 }
 0xa0e   :  { %v555_v12 = vadd.f32 %v1050_v8, %v554_v11 }
 0xa10   :  { %v559_v16 = vsel %vm558_vm6, %v1050_v8, %v555_v12 }
 0xa11   :  { %v564_v19 = vsel %vm561_vm7, %v563_v17, %v559_v16 }
 0xa12   :  { %v567_v0 = vmul.f32 %v564_v19, %v480_v20 }
 0xa57   :  { %v570_v18 = vpop.permute.xlu2 %569 }
 0xa58   :  { %v572_v1 = vmul.f32 %v570_v18, %v564_v19 }
 0xa5a   :  { %574 = vrot.lane.b32.xlu0 %v572_v1, %s1079_s30 }
 0xa5f   :  { %v589_v24 = vpop.permute.xlu2 %588 }
 0xa62   :  { %595 = vperm.xlu0 %1012, %v592_v3  }
 0xacc   :  { %v575_v2 = vpop.permute.xlu0 %574 }
 0xacd   :  { %v577_v4 = vadd.f32 %v575_v2, %v567_v0 }
 0xacf   :  { %1051 = vtanh.f32 %v577_v4  ;;  %v591_v59 = vmul.f32 %v589_v24, %v577_v4  ;;  %v998_v4 = vld [vmem:[%s1414_s1 + $0x30] sm:$0xff] }
 0xad4   :  { %v596_v21 = vpop.permute.xlu0 %595 }
 0xad5   :  { %v1052_v6 = vpop.eup %1051  ;;  %v601_v25 = vmul.f32 %v596_v21, %v483_v49  ;;  %v598_v58 = vmul.f32 %v596_v21, %v480_v20 }
 0xad6   :  { %580 = vrot.lane.b32.xlu1 %v1052_v6, %s1078_s29 }
 0xad7   :  { %v599_v60 = vadd.f32 %v598_v58, %v591_v59  ;;  %v1002_v59 = vld [vmem:[%s1413_s0 + $0x38] sm:$0xff] }
 0xb48   :  { %v581_v22 = vpop.permute.xlu1 %580 }
 0xb49   :  { %v583_v23 = vmul.f32 %v581_v22, %v564_v19 }
 0xb4b   :  { %v1310_v26 = vmul.f32 %v589_v24, %v583_v23 }
 0xb4d   :  { %v602_v28 = vadd.f32 %v601_v25, %v1310_v26 }
 0xb4f   :  { %610 = vrot.lane.b32.xlu2 %v602_v28, %s1079_s30  ;;  %v634_v29 = vrot.slane %v602_v28, 4 }
 0xb51   :  { %635 = vrot.lane.b32.xlu1 %v634_v29, %s1079_s30 }
 0xba9   :  { %v611_v30 = vpop.permute.xlu2 %610 }
 0xbaa   :  { %988 = vmatmul.msk.f32.vlgmr.msra.gmra.mxu2 %vm23_vm5, %v611_v30 }
 0xbc3   :  { %v636_v31 = vpop.permute.xlu1 %635 }
 0xbc4   :  { %989 = vmatmul.msk.f32.vlgmr.msra.gmra.mxu3 %vm23_vm5, %v636_v31 }
 0xc2d   :  { %v631_v35 = vpop.f32.mrf.mxu2 }
 0xc47   :  { %v656_v32 = vpop.f32.mrf.mxu3 }
 0xc48   :  { %v660_v33 = vrot.slane %v656_v32, 4 }
 0xc4a   :  { %v662_v36 = vsel %vm70_vm0, %v631_v35, %v660_v33 }
 0xc4b   :  { %v665_v37 = vadd.f32 %v990_v34, %v662_v36 }
 0xc4d   :  { %1053 = vtanh.f32 %v665_v37  ;;  %v991_v40 = vmul.f32 -1.442695, %v665_v37  ;;  %v830_v37 = vsub.f32 1.0, %v998_v4 }
 0xc4f   :  { %1055 = vpow2.f32 %v991_v40 }
 0xc53   :  { %v1054_v38 = vpop.eup %1053 }
 0xc54   :  { %688 = vrot.lane.b32.xlu0 %v1054_v38, %s1078_s29 }
 0xc55   :  { %v1056_v41 = vpop.eup %1055 }
 0xc56   :  { %v669_v42 = vadd.f32 1.0, %v1056_v41 }
 0xc58   :  { %1057 = vrcp.f32 %v669_v42  ;;  %v681_v50 = vand.u32 2147483648, %v669_v42  ;;  %vm675_vm9 = vweird.f32 %v669_v42  ;;  %v679_v51 = vand.u32 2147483647, %v669_v42 }
 0xc5a   :  { %v682_v53 = vor.u32 1.1754944e-38, %v681_v50  ;;  %vm680_vm11 = vcmp.eq.f32.partialorder %v679_v51, 8.507059e+37 }
 0xc5c   :  { %707 = vperm.xlu0 %1012, %v992_v39  }
 0xc5e   :  { %v1058_v44 = vpop.eup %1057 }
 0xc5f   :  { %v671_v45 = vmul.f32 %v1058_v44, %v669_v42  ;;  %vm676_vm8 = vweird.f32 %v1058_v44 }
 0xc60   :  { %vm677_vm10 = vmor %vm675_vm9, %vm676_vm8 }
 0xc61   :  { %v672_v46 = vsub.f32 1.0, %v671_v45 }
 0xc63   :  { %v673_v47 = vmul.f32 %v1058_v44, %v672_v46 }
 0xc65   :  { %v674_v49 = vadd.f32 %v1058_v44, %v673_v47 }
 0xc67   :  { %v678_v52 = vsel %vm677_vm10, %v1058_v44, %v674_v49 }
 0xc68   :  { %v683_v55 = vsel %vm680_vm11, %v682_v53, %v678_v52 }
 0xc69   :  { %v686_v61 = vmul.f32 %v683_v55, %v599_v60 }
 0xcc6   :  { %v689_v54 = vpop.permute.xlu0 %688 }
 0xcc7   :  { %v691_v56 = vmul.f32 %v689_v54, %v683_v55 }
 0xcc9   :  { %693 = vrot.lane.b32.xlu1 %v691_v56, %s1079_s30 }
 0xcce   :  { %v708_v12 = vpop.permute.xlu0 %707 }
 0xcd1   :  { %714 = vperm.xlu1 %1010, %v711_v57  }
 0xd3b   :  { %v694_v62 = vpop.permute.xlu1 %693 }
 0xd3c   :  { %v696_v63 = vadd.f32 %v694_v62, %v686_v61 }
 0xd3e   :  { %1059 = vtanh.f32 %v696_v63  ;;  %v710_v39 = vmul.f32 %v708_v12, %v696_v63 }
 0xd43   :  { %v715_v9 = vpop.permute.xlu1 %714 }
 0xd44   :  { %v1060_v8 = vpop.eup %1059  ;;  %v720_v14 = vmul.f32 %v715_v9, %v602_v28  ;;  %v717_v38 = vmul.f32 %v715_v9, %v599_v60 }
 0xd45   :  { %699 = vrot.lane.b32.xlu2 %v1060_v8, %s1078_s29  ;;  %v1004_v8 = vld [vmem:[%s1414_s1 + $0x38] sm:$0xff] }
 0xd46   :  { %v1343_v40 = vadd.f32 %v717_v38, %v710_v39 }
 0xd9f   :  { %v700_v10 = vpop.permute.xlu2 %699 }
 0xda0   :  { %v702_v11 = vmul.f32 %v700_v10, %v683_v55 }
 0xda2   :  { %v1327_v15 = vmul.f32 %v708_v12, %v702_v11 }
 0xda4   :  { %v721_v16 = vadd.f32 %v720_v14, %v1327_v15 }
 0xda6   :  { %729 = vrot.lane.b32.xlu0 %v721_v16, %s1079_s30  ;;  %v753_v17 = vrot.slane %v721_v16, 4 }
 0xda8   :  { %754 = vrot.lane.b32.xlu2 %v753_v17, %s1079_s30 }
 0xe02   :  { %v755_v18 = vpop.permute.xlu2 %754 }
 0xe03   :  { %995 = vmatmul.msk.f32.vlgmr.msrb.gmra.mxu1 %vm23_vm5, %v755_v18 }
 0xe18   :  { %v730_v19 = vpop.permute.xlu0 %729 }
 0xe19   :  { %994 = vmatmul.msk.f32.vlgmr.msrb.gmra.mxu0 %vm23_vm5, %v730_v19 }
 0xe80   :  { %v775_v1 = vpop.f32.mrf.mxu1 }
 0xe81   :  { %v779_v3 = vrot.slane %v775_v1, 4 }
 0xe96   :  { %v750_v7 = vpop.f32.mrf.mxu0 }
 0xe97   :  { %v781_v20 = vsel %vm70_vm0, %v750_v7, %v779_v3 }
 0xe98   :  { %v784_v0 = vadd.f32 %v996_v5, %v781_v20 }
 0xe9a   :  { %1061 = vtanh.f32 %v784_v0  ;;  %v997_v6 = vmul.f32 -1.442695, %v784_v0 }
 0xe9c   :  { %1063 = vpow2.f32 %v997_v6 }
 0xea0   :  { %v1062_v2 = vpop.eup %1061 }
 0xea1   :  { %807 = vrot.lane.b32.xlu1 %v1062_v2, %s1078_s29 }
 0xea2   :  { %v1064_v21 = vpop.eup %1063 }
 0xea3   :  { %v788_v22 = vadd.f32 1.0, %v1064_v21 }
 0xea5   :  { %1065 = vrcp.f32 %v788_v22  ;;  %v800_v30 = vand.u32 2147483648, %v788_v22  ;;  %vm794_vm13 = vweird.f32 %v788_v22  ;;  %v798_v31 = vand.u32 2147483647, %v788_v22 }
 0xea7   :  { %v801_v33 = vor.u32 1.1754944e-38, %v800_v30  ;;  %vm799_vm15 = vcmp.eq.f32.partialorder %v798_v31, 8.507059e+37 }
 0xea9   :  { %826 = vperm.xlu1 %1010, %v998_v4  }
 0xeab   :  { %v1066_v23 = vpop.eup %1065 }
 0xeac   :  { %v790_v24 = vmul.f32 %v1066_v23, %v788_v22  ;;  %vm795_vm12 = vweird.f32 %v1066_v23 }
 0xead   :  { %vm796_vm14 = vmor %vm794_vm13, %vm795_vm12 }
 0xeae   :  { %v791_v25 = vsub.f32 1.0, %v790_v24 }
 0xeb0   :  { %v792_v28 = vmul.f32 %v1066_v23, %v791_v25 }
 0xeb2   :  { %v793_v29 = vadd.f32 %v1066_v23, %v792_v28 }
 0xeb4   :  { %v797_v32 = vsel %vm796_vm14, %v1066_v23, %v793_v29 }
 0xeb5   :  { %v802_v35 = vsel %vm799_vm15, %v801_v33, %v797_v32 }
 0xeb6   :  { %v805_v41 = vmul.f32 %v802_v35, %v1343_v40 }
 0xf13   :  { %v808_v34 = vpop.permute.xlu1 %807 }
 0xf14   :  { %v810_v36 = vmul.f32 %v808_v34, %v802_v35 }
 0xf16   :  { %812 = vrot.lane.b32.xlu2 %v810_v36, %s1079_s30 }
 0xf1b   :  { %v827_v50 = vpop.permute.xlu1 %826 }
 0xf1e   :  { %833 = vperm.xlu2 %1011, %v830_v37  }
 0xf70   :  { %v813_v42 = vpop.permute.xlu2 %812 }
 0xf71   :  { %v1346_v44 = vadd.f32 %v813_v42, %v805_v41 }
 0xf73   :  { %1067 = vtanh.f32 %v1346_v44 }
 0xf78   :  { %v834_v46 = vpop.permute.xlu2 %833 }
 0xf79   :  { %v1068_v45 = vpop.eup %1067  ;;  %v839_v51 = vmul.f32 %v834_v46, %v721_v16  ;;  %v836_v4 = vmul.f32 %v834_v46, %v1343_v40 }
 0xf7a   :  { %818 = vrot.lane.b32.xlu0 %v1068_v45, %s1078_s29 }
 0xfec   :  { %v819_v47 = vpop.permute.xlu0 %818 }
 0xfed   :  { %v821_v49 = vmul.f32 %v819_v47, %v802_v35 }
 0xfef   :  { %v838_v52 = vmul.f32 %v827_v50, %v821_v49 }
 0xff1   :  { %v840_v53 = vadd.f32 %v839_v51, %v838_v52 }
 0xff3   :  { %848 = vrot.lane.b32.xlu1 %v840_v53, %s1079_s30  ;;  %v872_v54 = vrot.slane %v840_v53, 4 }
 0xff5   :  { %873 = vrot.lane.b32.xlu0 %v872_v54, %s1079_s30 }
0x1065   :  { %v849_v55 = vpop.permute.xlu1 %848 }
0x1066   :  { %1000 = vmatmul.msk.f32.vlgmr.msrb.gmra.mxu2 %vm23_vm5, %v849_v55 }
0x1067   :  { %v874_v56 = vpop.permute.xlu0 %873 }
0x1068   :  { %1001 = vmatmul.msk.f32.vlgmr.msrb.gmra.mxu3 %vm23_vm5, %v874_v56 }
0x10e9   :  { %v869_v60 = vpop.f32.mrf.mxu2 }
0x10eb   :  { %v894_v57 = vpop.f32.mrf.mxu3 }
0x10ec   :  { %v898_v58 = vrot.slane %v894_v57, 4 }
0x10ee   :  { %v900_v61 = vsel %vm70_vm0, %v869_v60, %v898_v58 }
0x10ef   :  { %v903_v62 = vadd.f32 %v1002_v59, %v900_v61 }
0x10f1   :  { %1069 = vtanh.f32 %v903_v62  ;;  %v1003_v9 = vmul.f32 -1.442695, %v903_v62 }
0x10f3   :  { %1071 = vpow2.f32 %v1003_v9 }
0x10f7   :  { %v1070_v63 = vpop.eup %1069 }
0x10f8   :  { %926 = vrot.lane.b32.xlu2 %v1070_v63, %s1078_s29 }
0x10f9   :  { %v1072_v10 = vpop.eup %1071 }
0x10fa   :  { %v907_v11 = vadd.f32 1.0, %v1072_v10 }
0x10fc   :  { %1073 = vrcp.f32 %v907_v11  ;;  %v919_v19 = vand.u32 2147483648, %v907_v11  ;;  %vm913_vm1 = vweird.f32 %v907_v11  ;;  %v917_v1 = vand.u32 2147483647, %v907_v11 }
0x10fe   :  { %vm918_vm3 = vcmp.eq.f32.partialorder %v917_v1, 8.507059e+37 }
0x1100   :  { %945 = vperm.xlu2 %1011, %v1004_v8  }
0x1102   :  { %v1074_v12 = vpop.eup %1073 }
0x1103   :  { %v909_v14 = vmul.f32 %v1074_v12, %v907_v11  ;;  %vm914_vm0 = vweird.f32 %v1074_v12 }
0x1104   :  { %vm915_vm2 = vmor %vm913_vm1, %vm914_vm0 }
0x1105   :  { %v910_v16 = vsub.f32 1.0, %v909_v14 }
0x1107   :  { %v911_v17 = vmul.f32 %v1074_v12, %v910_v16 }
0x1108   :  { %366 = vrot.lane.b32.xlu2 %v1262_v13, %s1079_s30  ;;  %v920_v13 = vor.u32 1.1754944e-38, %v919_v19 }
0x1109   :  { %v912_v18 = vadd.f32 %v1074_v12, %v911_v17 }
0x110b   :  { %v916_v3 = vsel %vm915_vm2, %v1074_v12, %v912_v18 }
0x1110   :  { %723 = vrot.lane.b32.xlu2 %v1327_v15, %s1079_s30  ;;  %v921_v15 = vsel %vm918_vm3, %v920_v13, %v916_v3 }
0x1152   :  { %v927_v5 = vpop.permute.xlu2 %926 }
0x1153   :  { %v929_v7 = vmul.f32 %v927_v5, %v921_v15 }
0x1155   :  { %931 = vrot.lane.b32.xlu0 %v929_v7, %s1079_s30 }
0x115a   :  { %v946_v20 = vpop.permute.xlu2 %945 }
0x115d   :  { %129 = vrot.lane.b32.xlu0 %v1194_v43, %s1079_s30  ;;  %v829_v43 = vmul.f32 %v827_v50, %v1346_v44 }
0x115f   :  { %v837_v6 = vadd.f32 %v836_v4, %v829_v43 }
0x1161   :  { %v924_v21 = vmul.f32 %v921_v15, %v837_v6 }
0x1162   :  { %v367_v0 = vpop.permute.xlu2 %366 }
0x1163   :  { %975 = vst.msk [vmem:[%s1415_s3 + $0x10] sm:$0xff] %vm23_vm5, %v367_v0 }
0x1165   :  { %485 = vrot.lane.b32.xlu0 %v1293_v48, %s1079_s30 }
0x116a   :  { %v724_v2 = vpop.permute.xlu2 %723 }
0x116b   :  { %993 = vst.msk [vmem:[%s1415_s3 + $0x28] sm:$0xff] %vm23_vm5, %v724_v2 }
0x116d   :  { %842 = vrot.lane.b32.xlu0 %v838_v52, %s1079_s30 }
0x11c7   :  { %v932_v22 = vpop.permute.xlu0 %931 }
0x11c8   :  { %v934_v23 = vadd.f32 %v932_v22, %v924_v21 }
0x11ca   :  { %1075 = vtanh.f32 %v934_v23 }
0x11cf   :  { %v130_v24 = vpop.permute.xlu0 %129 }
0x11d0   :  { %v1076_v25 = vpop.eup %1075  ;;  %132 = vst.msk [vmem:[%s1415_s3] sm:$0xff] %vm23_vm5, %v130_v24 }
0x11d1   :  { %937 = vrot.lane.b32.xlu1 %v1076_v25, %s1078_s29 }
0x11d7   :  { %v486_v48 = vpop.permute.xlu0 %485 }
0x11d8   :  { %981 = vst.msk [vmem:[%s1415_s3 + $0x18] sm:$0xff] %vm23_vm5, %v486_v48 }
0x11d9   :  { %247 = vrot.lane.b32.xlu1 %v1228_v27, %s1079_s30 }
0x11df   :  { %v843_v28 = vpop.permute.xlu0 %842 }
0x11e0   :  { %999 = vst.msk [vmem:[%s1415_s3 + $0x30] sm:$0xff] %vm23_vm5, %v843_v28 }
0x11e1   :  { %604 = vrot.lane.b32.xlu1 %v1310_v26, %s1079_s30 }
0x1243   :  { %v938_v29 = vpop.permute.xlu1 %937 }
0x1244   :  { %v940_v30 = vmul.f32 %v938_v29, %v921_v15 }
0x1246   :  { %v948_v31 = vmul.f32 %v946_v20, %v940_v30 }
0x1248   :  { %950 = vrot.lane.b32.xlu1 %v948_v31, %s1079_s30 }
0x124b   :  { %v248_v32 = vpop.permute.xlu1 %247 }
0x124c   :  { %969 = vst.msk [vmem:[%s1415_s3 + $0x8] sm:$0xff] %vm23_vm5, %v248_v32 }
0x1253   :  { %v605_v27 = vpop.permute.xlu1 %604 }
0x1254   :  { %987 = vst.msk [vmem:[%s1415_s3 + $0x20] sm:$0xff] %vm23_vm5, %v605_v27 }
0x12ba   :  { %v951_v33 = vpop.permute.xlu1 %950 }
0x12bb   :  { %1005 = vst.msk [vmem:[%s1415_s3 + $0x38] sm:$0xff] %vm23_vm5, %v951_v33 }

</bundles_post_ra>
